<compile_context>
chip_gen: v7x
topology: tpu7x:2x2x1
jax: 0.10.0
libtpu: 0.0.40
codegen_flags: <defaults>
</compile_context>

<pallas_src>
import jax
import jax.numpy as jnp
import numpy as np
from jax import lax
from jax.experimental import pallas as pl
from jax.experimental.pallas import tpu as pltpu

K = 7     # conv kernel size
PAD = 3   # reflect padding on each spatial side


def _round_up(v, m):
    return (v + m - 1) // m * m


def _reflect_src(p, n):
    """Source index in [0, n) for padded index p in [0, n + 2*PAD) (reflect mode)."""
    q = p - PAD
    if q < 0:
        q = -q
    if q > n - 1:
        q = 2 * (n - 1) - q
    return q


def _row_reflect_matrix(h, h_pad_aligned):
    """(h_pad_aligned, h) 0/1 matrix: P_h @ plane reflect-pads rows (rows beyond h+6 are zero)."""
    m = np.zeros((h_pad_aligned, h), np.float32)
    for p in range(h + 2 * PAD):
        m[p, _reflect_src(p, h)] = 1.0
    return m


def _col_reflect_matrix(w, w_pad_aligned):
    """(w, w_pad_aligned) 0/1 matrix: plane @ P_w^T reflect-pads columns (cols beyond w+6 are zero)."""
    m = np.zeros((w, w_pad_aligned), np.float32)
    for p in range(w + 2 * PAD):
        m[_reflect_src(p, w), p] = 1.0
    return m


def _pixel_attention_kernel(x_ref, p1_ref, ph_ref, pwt_ref, w_ref, b_ref, o_ref):
    # x_ref, p1_ref: (1, 1, H, W) VMEM  -- one (batch, channel) plane of x / pattn1
    # ph_ref       : (Hp_a, H)   VMEM   -- row reflection matrix (0/1), resident (constant block)
    # pwt_ref      : (W, Wp_a)   VMEM   -- column reflection matrix (0/1), resident
    # w_ref        : (C*2*49,)   SMEM   -- conv weights flattened as [c, t, kh, kw]
    # b_ref        : (C,)        SMEM   -- conv bias
    # o_ref        : (1, 1, H, W) VMEM  -- sigmoid(grouped conv) output plane
    c = pl.program_id(1)
    H, W = o_ref.shape[2], o_ref.shape[3]
    Wp_a = pwt_ref.shape[1]

    ph = ph_ref[...]
    pwt = pwt_ref[...]
    planes = (x_ref[0, 0].astype(jnp.float32), p1_ref[0, 0].astype(jnp.float32))

    # Four independent partial accumulators (breaks the 98-deep serial add chain).
    accs = [None, None, None, None]
    tap = 0
    for t in range(2):
        # Reflect padding on the MXU: (Hp_a, H) @ (H, W) @ (W, Wp_a) -> (Hp_a, Wp_a).
        # Rows/cols beyond H+6 / W+6 are zero and never read back into the kept window.
        xpw = jnp.dot(planes[t], pwt, preferred_element_type=jnp.float32)    # (H, Wp_a)
        xpad = jnp.dot(ph, xpw, preferred_element_type=jnp.float32)          # (Hp_a, Wp_a)
        for kh in range(K):
            band = xpad[kh:kh + H, :]                                        # (H, Wp_a)
            for kw in range(K):
                # shifted[:, j] = band[:, j + kw] for j < W (circular lane roll on the
                # XLU; j + kw <= W + 5 < Wp_a so the kept [:, :W] window never wraps).
                if kw == 0:
                    shifted = band
                else:
                    shifted = pltpu.roll(band, shift=Wp_a - kw, axis=1)
                w_s = w_ref[(c * 2 + t) * (K * K) + kh * K + kw]
                contrib = w_s * shifted
                slot = tap % 4
                accs[slot] = contrib if accs[slot] is None else accs[slot] + contrib
                tap += 1

    acc = (accs[0] + accs[1]) + (accs[2] + accs[3])
    z = acc[:, :W] + b_ref[c]
    # Fused sigmoid (exp runs on the EUP).
    o_ref[0, 0] = (1.0 / (1.0 + jnp.exp(-z))).astype(o_ref.dtype)


def pixel_attention(x, pattn1, w, b):
    """x, pattn1: (N, C, H, W); w: (C, 2, 7, 7); b: (C,) -> sigmoid(grouped 7x7 conv), (N, C, H, W)."""
    N, C, H, W = x.shape
    assert pattn1.shape == x.shape
    assert w.shape == (C, 2, K, K) and b.shape == (C,)
    assert H > PAD and W > PAD, "reflect padding requires H, W > 3"

    Hp_a = _round_up(H + 2 * PAD, 8)      # sublane-aligned padded height
    Wp_a = _round_up(W + 2 * PAD, 128)    # lane-aligned padded width

    ph = jnp.asarray(_row_reflect_matrix(H, Hp_a))     # (Hp_a, H)
    pwt = jnp.asarray(_col_reflect_matrix(W, Wp_a))    # (W, Wp_a)
    w_flat = w.reshape(-1).astype(jnp.float32)         # (C*2*49,)
    b = b.astype(jnp.float32)

    return pl.pallas_call(
        _pixel_attention_kernel,
        out_shape=jax.ShapeDtypeStruct((N, C, H, W), x.dtype),
        grid=(N, C),
        in_specs=[
            pl.BlockSpec((1, 1, H, W), lambda n, c: (n, c, 0, 0)),     # x plane
            pl.BlockSpec((1, 1, H, W), lambda n, c: (n, c, 0, 0)),     # pattn1 plane
            pl.BlockSpec((Hp_a, H), lambda n, c: (0, 0)),              # row reflection matrix
            pl.BlockSpec((W, Wp_a), lambda n, c: (0, 0)),              # column reflection matrix
            pl.BlockSpec(memory_space=pltpu.MemorySpace.SMEM),         # conv weights (scalars)
            pl.BlockSpec(memory_space=pltpu.MemorySpace.SMEM),         # conv bias (scalars)
        ],
        out_specs=pl.BlockSpec((1, 1, H, W), lambda n, c: (n, c, 0, 0)),
        compiler_params=pltpu.CompilerParams(
            dimension_semantics=("parallel", "parallel")),
    )(x, pattn1, ph, pwt, w_flat, b)


def reference(x, pattn1, w, b):
    """Pure-JAX reference matching the PyTorch forward."""
    N, C, H, W = x.shape
    # channel 2c = x_c, channel 2c+1 = pattn1_c  (matches cat on dim=2 + 'b c t h w -> b (c t) h w')
    x2 = jnp.stack([x, pattn1], axis=2).reshape(N, 2 * C, H, W)
    x2p = jnp.pad(x2, ((0, 0), (0, 0), (PAD, PAD), (PAD, PAD)), mode="reflect")
    out = lax.conv_general_dilated(
        x2p, w, window_strides=(1, 1), padding="VALID",
        dimension_numbers=("NCHW", "OIHW", "NCHW"),
        feature_group_count=C, precision=lax.Precision.HIGHEST)
    return jax.nn.sigmoid(out + b.reshape(1, C, 1, 1))


if __name__ == "__main__":
    key = jax.random.PRNGKey(0)
    kx, kp, kwt, kb = jax.random.split(key, 4)

    N, C, H, W = 2, 4, 16, 16
    x = jax.random.normal(kx, (N, C, H, W), dtype=jnp.float32)
    pattn1 = jax.random.normal(kp, (N, C, H, W), dtype=jnp.float32)

    # Conv2d(2C, C, 7, groups=C) PyTorch-style init: uniform(-1/sqrt(fan_in), 1/sqrt(fan_in)),
    # fan_in = (in_channels / groups) * k * k = 2 * 7 * 7.
    fan_in = 2 * K * K
    bound = 1.0 / float(np.sqrt(fan_in))
    w = jax.random.uniform(kwt, (C, 2, K, K), minval=-bound, maxval=bound, dtype=jnp.float32)
    b = jax.random.uniform(kb, (C,), minval=-bound, maxval=bound, dtype=jnp.float32)

    out = pixel_attention(x, pattn1, w, b)
    out = jax.block_until_ready(out)

    ref = reference(x, pattn1, w, b)
    assert out.shape == (N, C, H, W), out.shape
    assert jnp.allclose(out, ref, atol=1e-5, rtol=1e-5), (
        "mismatch vs reference, max abs err = %g" % float(jnp.max(jnp.abs(out - ref))))

    print("KERNEL_OK")
</pallas_src>

<mosaic_0001>
module attributes {stable_mosaic.version = 11 : i64} {
  func.func @_pixel_attention_kernel(%arg0: i32, %arg1: i32, %arg2: memref<1x1x16x16xf32, #tpu.memory_space<vmem>>, %arg3: memref<1x1x16x16xf32, #tpu.memory_space<vmem>>, %arg4: memref<24x16xf32, #tpu.memory_space<vmem>>, %arg5: memref<16x128xf32, #tpu.memory_space<vmem>>, %arg6: memref<392xf32, #tpu.memory_space<smem>>, %arg7: memref<4xf32, #tpu.memory_space<smem>>, %arg8: memref<1x1x16x16xf32, #tpu.memory_space<vmem>>) attributes {dimension_semantics = [#tpu.dimension_semantics<parallel>, #tpu.dimension_semantics<parallel>], iteration_bounds = array<i64: 2, 4>, scalar_prefetch = 0 : i64, scratch_operands = 0 : i64, tpu.core_type = #tpu.core_type<tc>, window_params = [{transform_indices = @transform_0, window_bounds = array<i64: 1, 1, 16, 16>}, {transform_indices = @transform_1, window_bounds = array<i64: 1, 1, 16, 16>}, {pipeline_mode = #tpu.pipeline_mode<synchronous>, transform_indices = @transform_2, window_bounds = array<i64: 24, 16>}, {pipeline_mode = #tpu.pipeline_mode<synchronous>, transform_indices = @transform_3, window_bounds = array<i64: 16, 128>}, {transform_indices = @transform_4, window_bounds = array<i64: 392>}, {transform_indices = @transform_5, window_bounds = array<i64: 4>}, {transform_indices = @transform_6, window_bounds = array<i64: 1, 1, 16, 16>}]} {
    %c0 = arith.constant 0 : index
    %c0_0 = arith.constant 0 : index
    %0 = vector.load %arg4[%c0, %c0_0] : memref<24x16xf32, #tpu.memory_space<vmem>>, vector<24x16xf32>
    %c0_1 = arith.constant 0 : index
    %c0_2 = arith.constant 0 : index
    %1 = vector.load %arg5[%c0_1, %c0_2] : memref<16x128xf32, #tpu.memory_space<vmem>>, vector<16x128xf32>
    %c0_3 = arith.constant 0 : index
    %c0_4 = arith.constant 0 : index
    %c0_5 = arith.constant 0 : index
    %c0_6 = arith.constant 0 : index
    %2 = vector.load %arg2[%c0_3, %c0_4, %c0_5, %c0_6] : memref<1x1x16x16xf32, #tpu.memory_space<vmem>>, vector<1x1x16x16xf32>
    %3 = vector.shape_cast %2 : vector<1x1x16x16xf32> to vector<16x16xf32>
    %c0_7 = arith.constant 0 : index
    %c0_8 = arith.constant 0 : index
    %c0_9 = arith.constant 0 : index
    %c0_10 = arith.constant 0 : index
    %4 = vector.load %arg3[%c0_7, %c0_8, %c0_9, %c0_10] : memref<1x1x16x16xf32, #tpu.memory_space<vmem>>, vector<1x1x16x16xf32>
    %5 = vector.shape_cast %4 : vector<1x1x16x16xf32> to vector<16x16xf32>
    %cst = arith.constant dense<0.000000e+00> : vector<16x128xf32>
    %6 = tpu.matmul %3, %1, %cst {dimension_numbers = #tpu.dot_dimension_numbers<[1], [0], [0], [1], [0, 0, 1, 1], [], []>} : vector<16x16xf32>, vector<16x128xf32>, vector<16x128xf32> -> vector<16x128xf32>
    %cst_11 = arith.constant dense<0.000000e+00> : vector<24x128xf32>
    %7 = tpu.matmul %0, %6, %cst_11 {dimension_numbers = #tpu.dot_dimension_numbers<[1], [0], [0], [1], [0, 0, 1, 1], [], []>} : vector<24x16xf32>, vector<16x128xf32>, vector<24x128xf32> -> vector<24x128xf32>
    %8 = vector.extract_strided_slice %7 {offsets = [0, 0], sizes = [16, 128], strides = [1, 1]} : vector<24x128xf32> to vector<16x128xf32>
    %c2_i32 = arith.constant 2 : i32
    %9 = arith.muli %arg1, %c2_i32 : i32
    %c0_i32 = arith.constant 0 : i32
    %10 = arith.addi %9, %c0_i32 : i32
    %c49_i32 = arith.constant 49 : i32
    %11 = arith.muli %10, %c49_i32 : i32
    %c0_i32_12 = arith.constant 0 : i32
    %12 = arith.addi %11, %c0_i32_12 : i32
    %c0_i32_13 = arith.constant 0 : i32
    %13 = arith.addi %12, %c0_i32_13 : i32
    %14 = arith.index_cast %13 : i32 to index
    %15 = memref.load %arg6[%14] : memref<392xf32, #tpu.memory_space<smem>>
    %16 = vector.broadcast %15 : f32 to vector<16x128xf32>
    %17 = arith.mulf %16, %8 : vector<16x128xf32>
    %c127_i32 = arith.constant 127 : i32
    %18 = tpu.dynamic_rotate %8 by %c127_i32 dim 1 : vector<16x128xf32>, i32 -> vector<16x128xf32>
    %c2_i32_14 = arith.constant 2 : i32
    %19 = arith.muli %arg1, %c2_i32_14 : i32
    %c0_i32_15 = arith.constant 0 : i32
    %20 = arith.addi %19, %c0_i32_15 : i32
    %c49_i32_16 = arith.constant 49 : i32
    %21 = arith.muli %20, %c49_i32_16 : i32
    %c0_i32_17 = arith.constant 0 : i32
    %22 = arith.addi %21, %c0_i32_17 : i32
    %c1_i32 = arith.constant 1 : i32
    %23 = arith.addi %22, %c1_i32 : i32
    %24 = arith.index_cast %23 : i32 to index
    %25 = memref.load %arg6[%24] : memref<392xf32, #tpu.memory_space<smem>>
    %26 = vector.broadcast %25 : f32 to vector<16x128xf32>
    %27 = arith.mulf %26, %18 : vector<16x128xf32>
    %c126_i32 = arith.constant 126 : i32
    %28 = tpu.dynamic_rotate %8 by %c126_i32 dim 1 : vector<16x128xf32>, i32 -> vector<16x128xf32>
    %c2_i32_18 = arith.constant 2 : i32
    %29 = arith.muli %arg1, %c2_i32_18 : i32
    %c0_i32_19 = arith.constant 0 : i32
    %30 = arith.addi %29, %c0_i32_19 : i32
    %c49_i32_20 = arith.constant 49 : i32
    %31 = arith.muli %30, %c49_i32_20 : i32
    %c0_i32_21 = arith.constant 0 : i32
    %32 = arith.addi %31, %c0_i32_21 : i32
    %c2_i32_22 = arith.constant 2 : i32
    %33 = arith.addi %32, %c2_i32_22 : i32
    %34 = arith.index_cast %33 : i32 to index
    %35 = memref.load %arg6[%34] : memref<392xf32, #tpu.memory_space<smem>>
    %36 = vector.broadcast %35 : f32 to vector<16x128xf32>
    %37 = arith.mulf %36, %28 : vector<16x128xf32>
    %c125_i32 = arith.constant 125 : i32
    %38 = tpu.dynamic_rotate %8 by %c125_i32 dim 1 : vector<16x128xf32>, i32 -> vector<16x128xf32>
    %c2_i32_23 = arith.constant 2 : i32
    %39 = arith.muli %arg1, %c2_i32_23 : i32
    %c0_i32_24 = arith.constant 0 : i32
    %40 = arith.addi %39, %c0_i32_24 : i32
    %c49_i32_25 = arith.constant 49 : i32
    %41 = arith.muli %40, %c49_i32_25 : i32
    %c0_i32_26 = arith.constant 0 : i32
    %42 = arith.addi %41, %c0_i32_26 : i32
    %c3_i32 = arith.constant 3 : i32
    %43 = arith.addi %42, %c3_i32 : i32
    %44 = arith.index_cast %43 : i32 to index
    %45 = memref.load %arg6[%44] : memref<392xf32, #tpu.memory_space<smem>>
    %46 = vector.broadcast %45 : f32 to vector<16x128xf32>
    %47 = arith.mulf %46, %38 : vector<16x128xf32>
    %c124_i32 = arith.constant 124 : i32
    %48 = tpu.dynamic_rotate %8 by %c124_i32 dim 1 : vector<16x128xf32>, i32 -> vector<16x128xf32>
    %c2_i32_27 = arith.constant 2 : i32
    %49 = arith.muli %arg1, %c2_i32_27 : i32
    %c0_i32_28 = arith.constant 0 : i32
    %50 = arith.addi %49, %c0_i32_28 : i32
    %c49_i32_29 = arith.constant 49 : i32
    %51 = arith.muli %50, %c49_i32_29 : i32
    %c0_i32_30 = arith.constant 0 : i32
    %52 = arith.addi %51, %c0_i32_30 : i32
    %c4_i32 = arith.constant 4 : i32
    %53 = arith.addi %52, %c4_i32 : i32
    %54 = arith.index_cast %53 : i32 to index
    %55 = memref.load %arg6[%54] : memref<392xf32, #tpu.memory_space<smem>>
    %56 = vector.broadcast %55 : f32 to vector<16x128xf32>
    %57 = arith.mulf %56, %48 : vector<16x128xf32>
    %58 = arith.addf %17, %57 : vector<16x128xf32>
    %c123_i32 = arith.constant 123 : i32
    %59 = tpu.dynamic_rotate %8 by %c123_i32 dim 1 : vector<16x128xf32>, i32 -> vector<16x128xf32>
    %c2_i32_31 = arith.constant 2 : i32
    %60 = arith.muli %arg1, %c2_i32_31 : i32
    %c0_i32_32 = arith.constant 0 : i32
    %61 = arith.addi %60, %c0_i32_32 : i32
    %c49_i32_33 = arith.constant 49 : i32
    %62 = arith.muli %61, %c49_i32_33 : i32
    %c0_i32_34 = arith.constant 0 : i32
    %63 = arith.addi %62, %c0_i32_34 : i32
    %c5_i32 = arith.constant 5 : i32
    %64 = arith.addi %63, %c5_i32 : i32
    %65 = arith.index_cast %64 : i32 to index
    %66 = memref.load %arg6[%65] : memref<392xf32, #tpu.memory_space<smem>>
    %67 = vector.broadcast %66 : f32 to vector<16x128xf32>
    %68 = arith.mulf %67, %59 : vector<16x128xf32>
    %69 = arith.addf %27, %68 : vector<16x128xf32>
    %c122_i32 = arith.constant 122 : i32
    %70 = tpu.dynamic_rotate %8 by %c122_i32 dim 1 : vector<16x128xf32>, i32 -> vector<16x128xf32>
    %c2_i32_35 = arith.constant 2 : i32
    %71 = arith.muli %arg1, %c2_i32_35 : i32
    %c0_i32_36 = arith.constant 0 : i32
    %72 = arith.addi %71, %c0_i32_36 : i32
    %c49_i32_37 = arith.constant 49 : i32
    %73 = arith.muli %72, %c49_i32_37 : i32
    %c0_i32_38 = arith.constant 0 : i32
    %74 = arith.addi %73, %c0_i32_38 : i32
    %c6_i32 = arith.constant 6 : i32
    %75 = arith.addi %74, %c6_i32 : i32
    %76 = arith.index_cast %75 : i32 to index
    %77 = memref.load %arg6[%76] : memref<392xf32, #tpu.memory_space<smem>>
    %78 = vector.broadcast %77 : f32 to vector<16x128xf32>
    %79 = arith.mulf %78, %70 : vector<16x128xf32>
    %80 = arith.addf %37, %79 : vector<16x128xf32>
    %81 = vector.extract_strided_slice %7 {offsets = [1, 0], sizes = [16, 128], strides = [1, 1]} : vector<24x128xf32> to vector<16x128xf32>
    %c2_i32_39 = arith.constant 2 : i32
    %82 = arith.muli %arg1, %c2_i32_39 : i32
    %c0_i32_40 = arith.constant 0 : i32
    %83 = arith.addi %82, %c0_i32_40 : i32
    %c49_i32_41 = arith.constant 49 : i32
    %84 = arith.muli %83, %c49_i32_41 : i32
    %c7_i32 = arith.constant 7 : i32
    %85 = arith.addi %84, %c7_i32 : i32
    %c0_i32_42 = arith.constant 0 : i32
    %86 = arith.addi %85, %c0_i32_42 : i32
    %87 = arith.index_cast %86 : i32 to index
    %88 = memref.load %arg6[%87] : memref<392xf32, #tpu.memory_space<smem>>
    %89 = vector.broadcast %88 : f32 to vector<16x128xf32>
    %90 = arith.mulf %89, %81 : vector<16x128xf32>
    %91 = arith.addf %47, %90 : vector<16x128xf32>
    %c127_i32_43 = arith.constant 127 : i32
    %92 = tpu.dynamic_rotate %81 by %c127_i32_43 dim 1 : vector<16x128xf32>, i32 -> vector<16x128xf32>
    %c2_i32_44 = arith.constant 2 : i32
    %93 = arith.muli %arg1, %c2_i32_44 : i32
    %c0_i32_45 = arith.constant 0 : i32
    %94 = arith.addi %93, %c0_i32_45 : i32
    %c49_i32_46 = arith.constant 49 : i32
    %95 = arith.muli %94, %c49_i32_46 : i32
    %c7_i32_47 = arith.constant 7 : i32
    %96 = arith.addi %95, %c7_i32_47 : i32
    %c1_i32_48 = arith.constant 1 : i32
    %97 = arith.addi %96, %c1_i32_48 : i32
    %98 = arith.index_cast %97 : i32 to index
    %99 = memref.load %arg6[%98] : memref<392xf32, #tpu.memory_space<smem>>
    %100 = vector.broadcast %99 : f32 to vector<16x128xf32>
    %101 = arith.mulf %100, %92 : vector<16x128xf32>
    %102 = arith.addf %58, %101 : vector<16x128xf32>
    %c126_i32_49 = arith.constant 126 : i32
    %103 = tpu.dynamic_rotate %81 by %c126_i32_49 dim 1 : vector<16x128xf32>, i32 -> vector<16x128xf32>
    %c2_i32_50 = arith.constant 2 : i32
    %104 = arith.muli %arg1, %c2_i32_50 : i32
    %c0_i32_51 = arith.constant 0 : i32
    %105 = arith.addi %104, %c0_i32_51 : i32
    %c49_i32_52 = arith.constant 49 : i32
    %106 = arith.muli %105, %c49_i32_52 : i32
    %c7_i32_53 = arith.constant 7 : i32
    %107 = arith.addi %106, %c7_i32_53 : i32
    %c2_i32_54 = arith.constant 2 : i32
    %108 = arith.addi %107, %c2_i32_54 : i32
    %109 = arith.index_cast %108 : i32 to index
    %110 = memref.load %arg6[%109] : memref<392xf32, #tpu.memory_space<smem>>
    %111 = vector.broadcast %110 : f32 to vector<16x128xf32>
    %112 = arith.mulf %111, %103 : vector<16x128xf32>
    %113 = arith.addf %69, %112 : vector<16x128xf32>
    %c125_i32_55 = arith.constant 125 : i32
    %114 = tpu.dynamic_rotate %81 by %c125_i32_55 dim 1 : vector<16x128xf32>, i32 -> vector<16x128xf32>
    %c2_i32_56 = arith.constant 2 : i32
    %115 = arith.muli %arg1, %c2_i32_56 : i32
    %c0_i32_57 = arith.constant 0 : i32
    %116 = arith.addi %115, %c0_i32_57 : i32
    %c49_i32_58 = arith.constant 49 : i32
    %117 = arith.muli %116, %c49_i32_58 : i32
    %c7_i32_59 = arith.constant 7 : i32
    %118 = arith.addi %117, %c7_i32_59 : i32
    %c3_i32_60 = arith.constant 3 : i32
    %119 = arith.addi %118, %c3_i32_60 : i32
    %120 = arith.index_cast %119 : i32 to index
    %121 = memref.load %arg6[%120] : memref<392xf32, #tpu.memory_space<smem>>
    %122 = vector.broadcast %121 : f32 to vector<16x128xf32>
    %123 = arith.mulf %122, %114 : vector<16x128xf32>
    %124 = arith.addf %80, %123 : vector<16x128xf32>
    %c124_i32_61 = arith.constant 124 : i32
    %125 = tpu.dynamic_rotate %81 by %c124_i32_61 dim 1 : vector<16x128xf32>, i32 -> vector<16x128xf32>
    %c2_i32_62 = arith.constant 2 : i32
    %126 = arith.muli %arg1, %c2_i32_62 : i32
    %c0_i32_63 = arith.constant 0 : i32
    %127 = arith.addi %126, %c0_i32_63 : i32
    %c49_i32_64 = arith.constant 49 : i32
    %128 = arith.muli %127, %c49_i32_64 : i32
    %c7_i32_65 = arith.constant 7 : i32
    %129 = arith.addi %128, %c7_i32_65 : i32
    %c4_i32_66 = arith.constant 4 : i32
    %130 = arith.addi %129, %c4_i32_66 : i32
    %131 = arith.index_cast %130 : i32 to index
    %132 = memref.load %arg6[%131] : memref<392xf32, #tpu.memory_space<smem>>
    %133 = vector.broadcast %132 : f32 to vector<16x128xf32>
    %134 = arith.mulf %133, %125 : vector<16x128xf32>
    %135 = arith.addf %91, %134 : vector<16x128xf32>
    %c123_i32_67 = arith.constant 123 : i32
    %136 = tpu.dynamic_rotate %81 by %c123_i32_67 dim 1 : vector<16x128xf32>, i32 -> vector<16x128xf32>
    %c2_i32_68 = arith.constant 2 : i32
    %137 = arith.muli %arg1, %c2_i32_68 : i32
    %c0_i32_69 = arith.constant 0 : i32
    %138 = arith.addi %137, %c0_i32_69 : i32
    %c49_i32_70 = arith.constant 49 : i32
    %139 = arith.muli %138, %c49_i32_70 : i32
    %c7_i32_71 = arith.constant 7 : i32
    %140 = arith.addi %139, %c7_i32_71 : i32
    %c5_i32_72 = arith.constant 5 : i32
    %141 = arith.addi %140, %c5_i32_72 : i32
    %142 = arith.index_cast %141 : i32 to index
    %143 = memref.load %arg6[%142] : memref<392xf32, #tpu.memory_space<smem>>
    %144 = vector.broadcast %143 : f32 to vector<16x128xf32>
    %145 = arith.mulf %144, %136 : vector<16x128xf32>
    %146 = arith.addf %102, %145 : vector<16x128xf32>
    %c122_i32_73 = arith.constant 122 : i32
    %147 = tpu.dynamic_rotate %81 by %c122_i32_73 dim 1 : vector<16x128xf32>, i32 -> vector<16x128xf32>
    %c2_i32_74 = arith.constant 2 : i32
    %148 = arith.muli %arg1, %c2_i32_74 : i32
    %c0_i32_75 = arith.constant 0 : i32
    %149 = arith.addi %148, %c0_i32_75 : i32
    %c49_i32_76 = arith.constant 49 : i32
    %150 = arith.muli %149, %c49_i32_76 : i32
    %c7_i32_77 = arith.constant 7 : i32
    %151 = arith.addi %150, %c7_i32_77 : i32
    %c6_i32_78 = arith.constant 6 : i32
    %152 = arith.addi %151, %c6_i32_78 : i32
    %153 = arith.index_cast %152 : i32 to index
    %154 = memref.load %arg6[%153] : memref<392xf32, #tpu.memory_space<smem>>
    %155 = vector.broadcast %154 : f32 to vector<16x128xf32>
    %156 = arith.mulf %155, %147 : vector<16x128xf32>
    %157 = arith.addf %113, %156 : vector<16x128xf32>
    %158 = vector.extract_strided_slice %7 {offsets = [2, 0], sizes = [16, 128], strides = [1, 1]} : vector<24x128xf32> to vector<16x128xf32>
    %c2_i32_79 = arith.constant 2 : i32
    %159 = arith.muli %arg1, %c2_i32_79 : i32
    %c0_i32_80 = arith.constant 0 : i32
    %160 = arith.addi %159, %c0_i32_80 : i32
    %c49_i32_81 = arith.constant 49 : i32
    %161 = arith.muli %160, %c49_i32_81 : i32
    %c14_i32 = arith.constant 14 : i32
    %162 = arith.addi %161, %c14_i32 : i32
    %c0_i32_82 = arith.constant 0 : i32
    %163 = arith.addi %162, %c0_i32_82 : i32
    %164 = arith.index_cast %163 : i32 to index
    %165 = memref.load %arg6[%164] : memref<392xf32, #tpu.memory_space<smem>>
    %166 = vector.broadcast %165 : f32 to vector<16x128xf32>
    %167 = arith.mulf %166, %158 : vector<16x128xf32>
    %168 = arith.addf %124, %167 : vector<16x128xf32>
    %c127_i32_83 = arith.constant 127 : i32
    %169 = tpu.dynamic_rotate %158 by %c127_i32_83 dim 1 : vector<16x128xf32>, i32 -> vector<16x128xf32>
    %c2_i32_84 = arith.constant 2 : i32
    %170 = arith.muli %arg1, %c2_i32_84 : i32
    %c0_i32_85 = arith.constant 0 : i32
    %171 = arith.addi %170, %c0_i32_85 : i32
    %c49_i32_86 = arith.constant 49 : i32
    %172 = arith.muli %171, %c49_i32_86 : i32
    %c14_i32_87 = arith.constant 14 : i32
    %173 = arith.addi %172, %c14_i32_87 : i32
    %c1_i32_88 = arith.constant 1 : i32
    %174 = arith.addi %173, %c1_i32_88 : i32
    %175 = arith.index_cast %174 : i32 to index
    %176 = memref.load %arg6[%175] : memref<392xf32, #tpu.memory_space<smem>>
    %177 = vector.broadcast %176 : f32 to vector<16x128xf32>
    %178 = arith.mulf %177, %169 : vector<16x128xf32>
    %179 = arith.addf %135, %178 : vector<16x128xf32>
    %c126_i32_89 = arith.constant 126 : i32
    %180 = tpu.dynamic_rotate %158 by %c126_i32_89 dim 1 : vector<16x128xf32>, i32 -> vector<16x128xf32>
    %c2_i32_90 = arith.constant 2 : i32
    %181 = arith.muli %arg1, %c2_i32_90 : i32
    %c0_i32_91 = arith.constant 0 : i32
    %182 = arith.addi %181, %c0_i32_91 : i32
    %c49_i32_92 = arith.constant 49 : i32
    %183 = arith.muli %182, %c49_i32_92 : i32
    %c14_i32_93 = arith.constant 14 : i32
    %184 = arith.addi %183, %c14_i32_93 : i32
    %c2_i32_94 = arith.constant 2 : i32
    %185 = arith.addi %184, %c2_i32_94 : i32
    %186 = arith.index_cast %185 : i32 to index
    %187 = memref.load %arg6[%186] : memref<392xf32, #tpu.memory_space<smem>>
    %188 = vector.broadcast %187 : f32 to vector<16x128xf32>
    %189 = arith.mulf %188, %180 : vector<16x128xf32>
    %190 = arith.addf %146, %189 : vector<16x128xf32>
    %c125_i32_95 = arith.constant 125 : i32
    %191 = tpu.dynamic_rotate %158 by %c125_i32_95 dim 1 : vector<16x128xf32>, i32 -> vector<16x128xf32>
    %c2_i32_96 = arith.constant 2 : i32
    %192 = arith.muli %arg1, %c2_i32_96 : i32
    %c0_i32_97 = arith.constant 0 : i32
    %193 = arith.addi %192, %c0_i32_97 : i32
    %c49_i32_98 = arith.constant 49 : i32
    %194 = arith.muli %193, %c49_i32_98 : i32
    %c14_i32_99 = arith.constant 14 : i32
    %195 = arith.addi %194, %c14_i32_99 : i32
    %c3_i32_100 = arith.constant 3 : i32
    %196 = arith.addi %195, %c3_i32_100 : i32
    %197 = arith.index_cast %196 : i32 to index
    %198 = memref.load %arg6[%197] : memref<392xf32, #tpu.memory_space<smem>>
    %199 = vector.broadcast %198 : f32 to vector<16x128xf32>
    %200 = arith.mulf %199, %191 : vector<16x128xf32>
    %201 = arith.addf %157, %200 : vector<16x128xf32>
    %c124_i32_101 = arith.constant 124 : i32
    %202 = tpu.dynamic_rotate %158 by %c124_i32_101 dim 1 : vector<16x128xf32>, i32 -> vector<16x128xf32>
    %c2_i32_102 = arith.constant 2 : i32
    %203 = arith.muli %arg1, %c2_i32_102 : i32
    %c0_i32_103 = arith.constant 0 : i32
    %204 = arith.addi %203, %c0_i32_103 : i32
    %c49_i32_104 = arith.constant 49 : i32
    %205 = arith.muli %204, %c49_i32_104 : i32
    %c14_i32_105 = arith.constant 14 : i32
    %206 = arith.addi %205, %c14_i32_105 : i32
    %c4_i32_106 = arith.constant 4 : i32
    %207 = arith.addi %206, %c4_i32_106 : i32
    %208 = arith.index_cast %207 : i32 to index
    %209 = memref.load %arg6[%208] : memref<392xf32, #tpu.memory_space<smem>>
    %210 = vector.broadcast %209 : f32 to vector<16x128xf32>
    %211 = arith.mulf %210, %202 : vector<16x128xf32>
    %212 = arith.addf %168, %211 : vector<16x128xf32>
    %c123_i32_107 = arith.constant 123 : i32
    %213 = tpu.dynamic_rotate %158 by %c123_i32_107 dim 1 : vector<16x128xf32>, i32 -> vector<16x128xf32>
    %c2_i32_108 = arith.constant 2 : i32
    %214 = arith.muli %arg1, %c2_i32_108 : i32
    %c0_i32_109 = arith.constant 0 : i32
    %215 = arith.addi %214, %c0_i32_109 : i32
    %c49_i32_110 = arith.constant 49 : i32
    %216 = arith.muli %215, %c49_i32_110 : i32
    %c14_i32_111 = arith.constant 14 : i32
    %217 = arith.addi %216, %c14_i32_111 : i32
    %c5_i32_112 = arith.constant 5 : i32
    %218 = arith.addi %217, %c5_i32_112 : i32
    %219 = arith.index_cast %218 : i32 to index
    %220 = memref.load %arg6[%219] : memref<392xf32, #tpu.memory_space<smem>>
    %221 = vector.broadcast %220 : f32 to vector<16x128xf32>
    %222 = arith.mulf %221, %213 : vector<16x128xf32>
    %223 = arith.addf %179, %222 : vector<16x128xf32>
    %c122_i32_113 = arith.constant 122 : i32
    %224 = tpu.dynamic_rotate %158 by %c122_i32_113 dim 1 : vector<16x128xf32>, i32 -> vector<16x128xf32>
    %c2_i32_114 = arith.constant 2 : i32
    %225 = arith.muli %arg1, %c2_i32_114 : i32
    %c0_i32_115 = arith.constant 0 : i32
    %226 = arith.addi %225, %c0_i32_115 : i32
    %c49_i32_116 = arith.constant 49 : i32
    %227 = arith.muli %226, %c49_i32_116 : i32
    %c14_i32_117 = arith.constant 14 : i32
    %228 = arith.addi %227, %c14_i32_117 : i32
    %c6_i32_118 = arith.constant 6 : i32
    %229 = arith.addi %228, %c6_i32_118 : i32
    %230 = arith.index_cast %229 : i32 to index
    %231 = memref.load %arg6[%230] : memref<392xf32, #tpu.memory_space<smem>>
    %232 = vector.broadcast %231 : f32 to vector<16x128xf32>
    %233 = arith.mulf %232, %224 : vector<16x128xf32>
    %234 = arith.addf %190, %233 : vector<16x128xf32>
    %235 = vector.extract_strided_slice %7 {offsets = [3, 0], sizes = [16, 128], strides = [1, 1]} : vector<24x128xf32> to vector<16x128xf32>
    %c2_i32_119 = arith.constant 2 : i32
    %236 = arith.muli %arg1, %c2_i32_119 : i32
    %c0_i32_120 = arith.constant 0 : i32
    %237 = arith.addi %236, %c0_i32_120 : i32
    %c49_i32_121 = arith.constant 49 : i32
    %238 = arith.muli %237, %c49_i32_121 : i32
    %c21_i32 = arith.constant 21 : i32
    %239 = arith.addi %238, %c21_i32 : i32
    %c0_i32_122 = arith.constant 0 : i32
    %240 = arith.addi %239, %c0_i32_122 : i32
    %241 = arith.index_cast %240 : i32 to index
    %242 = memref.load %arg6[%241] : memref<392xf32, #tpu.memory_space<smem>>
    %243 = vector.broadcast %242 : f32 to vector<16x128xf32>
    %244 = arith.mulf %243, %235 : vector<16x128xf32>
    %245 = arith.addf %201, %244 : vector<16x128xf32>
    %c127_i32_123 = arith.constant 127 : i32
    %246 = tpu.dynamic_rotate %235 by %c127_i32_123 dim 1 : vector<16x128xf32>, i32 -> vector<16x128xf32>
    %c2_i32_124 = arith.constant 2 : i32
    %247 = arith.muli %arg1, %c2_i32_124 : i32
    %c0_i32_125 = arith.constant 0 : i32
    %248 = arith.addi %247, %c0_i32_125 : i32
    %c49_i32_126 = arith.constant 49 : i32
    %249 = arith.muli %248, %c49_i32_126 : i32
    %c21_i32_127 = arith.constant 21 : i32
    %250 = arith.addi %249, %c21_i32_127 : i32
    %c1_i32_128 = arith.constant 1 : i32
    %251 = arith.addi %250, %c1_i32_128 : i32
    %252 = arith.index_cast %251 : i32 to index
    %253 = memref.load %arg6[%252] : memref<392xf32, #tpu.memory_space<smem>>
    %254 = vector.broadcast %253 : f32 to vector<16x128xf32>
    %255 = arith.mulf %254, %246 : vector<16x128xf32>
    %256 = arith.addf %212, %255 : vector<16x128xf32>
    %c126_i32_129 = arith.constant 126 : i32
    %257 = tpu.dynamic_rotate %235 by %c126_i32_129 dim 1 : vector<16x128xf32>, i32 -> vector<16x128xf32>
    %c2_i32_130 = arith.constant 2 : i32
    %258 = arith.muli %arg1, %c2_i32_130 : i32
    %c0_i32_131 = arith.constant 0 : i32
    %259 = arith.addi %258, %c0_i32_131 : i32
    %c49_i32_132 = arith.constant 49 : i32
    %260 = arith.muli %259, %c49_i32_132 : i32
    %c21_i32_133 = arith.constant 21 : i32
    %261 = arith.addi %260, %c21_i32_133 : i32
    %c2_i32_134 = arith.constant 2 : i32
    %262 = arith.addi %261, %c2_i32_134 : i32
    %263 = arith.index_cast %262 : i32 to index
    %264 = memref.load %arg6[%263] : memref<392xf32, #tpu.memory_space<smem>>
    %265 = vector.broadcast %264 : f32 to vector<16x128xf32>
    %266 = arith.mulf %265, %257 : vector<16x128xf32>
    %267 = arith.addf %223, %266 : vector<16x128xf32>
    %c125_i32_135 = arith.constant 125 : i32
    %268 = tpu.dynamic_rotate %235 by %c125_i32_135 dim 1 : vector<16x128xf32>, i32 -> vector<16x128xf32>
    %c2_i32_136 = arith.constant 2 : i32
    %269 = arith.muli %arg1, %c2_i32_136 : i32
    %c0_i32_137 = arith.constant 0 : i32
    %270 = arith.addi %269, %c0_i32_137 : i32
    %c49_i32_138 = arith.constant 49 : i32
    %271 = arith.muli %270, %c49_i32_138 : i32
    %c21_i32_139 = arith.constant 21 : i32
    %272 = arith.addi %271, %c21_i32_139 : i32
    %c3_i32_140 = arith.constant 3 : i32
    %273 = arith.addi %272, %c3_i32_140 : i32
    %274 = arith.index_cast %273 : i32 to index
    %275 = memref.load %arg6[%274] : memref<392xf32, #tpu.memory_space<smem>>
    %276 = vector.broadcast %275 : f32 to vector<16x128xf32>
    %277 = arith.mulf %276, %268 : vector<16x128xf32>
    %278 = arith.addf %234, %277 : vector<16x128xf32>
    %c124_i32_141 = arith.constant 124 : i32
    %279 = tpu.dynamic_rotate %235 by %c124_i32_141 dim 1 : vector<16x128xf32>, i32 -> vector<16x128xf32>
    %c2_i32_142 = arith.constant 2 : i32
    %280 = arith.muli %arg1, %c2_i32_142 : i32
    %c0_i32_143 = arith.constant 0 : i32
    %281 = arith.addi %280, %c0_i32_143 : i32
    %c49_i32_144 = arith.constant 49 : i32
    %282 = arith.muli %281, %c49_i32_144 : i32
    %c21_i32_145 = arith.constant 21 : i32
    %283 = arith.addi %282, %c21_i32_145 : i32
    %c4_i32_146 = arith.constant 4 : i32
    %284 = arith.addi %283, %c4_i32_146 : i32
    %285 = arith.index_cast %284 : i32 to index
    %286 = memref.load %arg6[%285] : memref<392xf32, #tpu.memory_space<smem>>
    %287 = vector.broadcast %286 : f32 to vector<16x128xf32>
    %288 = arith.mulf %287, %279 : vector<16x128xf32>
    %289 = arith.addf %245, %288 : vector<16x128xf32>
    %c123_i32_147 = arith.constant 123 : i32
    %290 = tpu.dynamic_rotate %235 by %c123_i32_147 dim 1 : vector<16x128xf32>, i32 -> vector<16x128xf32>
    %c2_i32_148 = arith.constant 2 : i32
    %291 = arith.muli %arg1, %c2_i32_148 : i32
    %c0_i32_149 = arith.constant 0 : i32
    %292 = arith.addi %291, %c0_i32_149 : i32
    %c49_i32_150 = arith.constant 49 : i32
    %293 = arith.muli %292, %c49_i32_150 : i32
    %c21_i32_151 = arith.constant 21 : i32
    %294 = arith.addi %293, %c21_i32_151 : i32
    %c5_i32_152 = arith.constant 5 : i32
    %295 = arith.addi %294, %c5_i32_152 : i32
    %296 = arith.index_cast %295 : i32 to index
    %297 = memref.load %arg6[%296] : memref<392xf32, #tpu.memory_space<smem>>
    %298 = vector.broadcast %297 : f32 to vector<16x128xf32>
    %299 = arith.mulf %298, %290 : vector<16x128xf32>
    %300 = arith.addf %256, %299 : vector<16x128xf32>
    %c122_i32_153 = arith.constant 122 : i32
    %301 = tpu.dynamic_rotate %235 by %c122_i32_153 dim 1 : vector<16x128xf32>, i32 -> vector<16x128xf32>
    %c2_i32_154 = arith.constant 2 : i32
    %302 = arith.muli %arg1, %c2_i32_154 : i32
    %c0_i32_155 = arith.constant 0 : i32
    %303 = arith.addi %302, %c0_i32_155 : i32
    %c49_i32_156 = arith.constant 49 : i32
    %304 = arith.muli %303, %c49_i32_156 : i32
    %c21_i32_157 = arith.constant 21 : i32
    %305 = arith.addi %304, %c21_i32_157 : i32
    %c6_i32_158 = arith.constant 6 : i32
    %306 = arith.addi %305, %c6_i32_158 : i32
    %307 = arith.index_cast %306 : i32 to index
    %308 = memref.load %arg6[%307] : memref<392xf32, #tpu.memory_space<smem>>
    %309 = vector.broadcast %308 : f32 to vector<16x128xf32>
    %310 = arith.mulf %309, %301 : vector<16x128xf32>
    %311 = arith.addf %267, %310 : vector<16x128xf32>
    %312 = vector.extract_strided_slice %7 {offsets = [4, 0], sizes = [16, 128], strides = [1, 1]} : vector<24x128xf32> to vector<16x128xf32>
    %c2_i32_159 = arith.constant 2 : i32
    %313 = arith.muli %arg1, %c2_i32_159 : i32
    %c0_i32_160 = arith.constant 0 : i32
    %314 = arith.addi %313, %c0_i32_160 : i32
    %c49_i32_161 = arith.constant 49 : i32
    %315 = arith.muli %314, %c49_i32_161 : i32
    %c28_i32 = arith.constant 28 : i32
    %316 = arith.addi %315, %c28_i32 : i32
    %c0_i32_162 = arith.constant 0 : i32
    %317 = arith.addi %316, %c0_i32_162 : i32
    %318 = arith.index_cast %317 : i32 to index
    %319 = memref.load %arg6[%318] : memref<392xf32, #tpu.memory_space<smem>>
    %320 = vector.broadcast %319 : f32 to vector<16x128xf32>
    %321 = arith.mulf %320, %312 : vector<16x128xf32>
    %322 = arith.addf %278, %321 : vector<16x128xf32>
    %c127_i32_163 = arith.constant 127 : i32
    %323 = tpu.dynamic_rotate %312 by %c127_i32_163 dim 1 : vector<16x128xf32>, i32 -> vector<16x128xf32>
    %c2_i32_164 = arith.constant 2 : i32
    %324 = arith.muli %arg1, %c2_i32_164 : i32
    %c0_i32_165 = arith.constant 0 : i32
    %325 = arith.addi %324, %c0_i32_165 : i32
    %c49_i32_166 = arith.constant 49 : i32
    %326 = arith.muli %325, %c49_i32_166 : i32
    %c28_i32_167 = arith.constant 28 : i32
    %327 = arith.addi %326, %c28_i32_167 : i32
    %c1_i32_168 = arith.constant 1 : i32
    %328 = arith.addi %327, %c1_i32_168 : i32
    %329 = arith.index_cast %328 : i32 to index
    %330 = memref.load %arg6[%329] : memref<392xf32, #tpu.memory_space<smem>>
    %331 = vector.broadcast %330 : f32 to vector<16x128xf32>
    %332 = arith.mulf %331, %323 : vector<16x128xf32>
    %333 = arith.addf %289, %332 : vector<16x128xf32>
    %c126_i32_169 = arith.constant 126 : i32
    %334 = tpu.dynamic_rotate %312 by %c126_i32_169 dim 1 : vector<16x128xf32>, i32 -> vector<16x128xf32>
    %c2_i32_170 = arith.constant 2 : i32
    %335 = arith.muli %arg1, %c2_i32_170 : i32
    %c0_i32_171 = arith.constant 0 : i32
    %336 = arith.addi %335, %c0_i32_171 : i32
    %c49_i32_172 = arith.constant 49 : i32
    %337 = arith.muli %336, %c49_i32_172 : i32
    %c28_i32_173 = arith.constant 28 : i32
    %338 = arith.addi %337, %c28_i32_173 : i32
    %c2_i32_174 = arith.constant 2 : i32
    %339 = arith.addi %338, %c2_i32_174 : i32
    %340 = arith.index_cast %339 : i32 to index
    %341 = memref.load %arg6[%340] : memref<392xf32, #tpu.memory_space<smem>>
    %342 = vector.broadcast %341 : f32 to vector<16x128xf32>
    %343 = arith.mulf %342, %334 : vector<16x128xf32>
    %344 = arith.addf %300, %343 : vector<16x128xf32>
    %c125_i32_175 = arith.constant 125 : i32
    %345 = tpu.dynamic_rotate %312 by %c125_i32_175 dim 1 : vector<16x128xf32>, i32 -> vector<16x128xf32>
    %c2_i32_176 = arith.constant 2 : i32
    %346 = arith.muli %arg1, %c2_i32_176 : i32
    %c0_i32_177 = arith.constant 0 : i32
    %347 = arith.addi %346, %c0_i32_177 : i32
    %c49_i32_178 = arith.constant 49 : i32
    %348 = arith.muli %347, %c49_i32_178 : i32
    %c28_i32_179 = arith.constant 28 : i32
    %349 = arith.addi %348, %c28_i32_179 : i32
    %c3_i32_180 = arith.constant 3 : i32
    %350 = arith.addi %349, %c3_i32_180 : i32
    %351 = arith.index_cast %350 : i32 to index
    %352 = memref.load %arg6[%351] : memref<392xf32, #tpu.memory_space<smem>>
    %353 = vector.broadcast %352 : f32 to vector<16x128xf32>
    %354 = arith.mulf %353, %345 : vector<16x128xf32>
    %355 = arith.addf %311, %354 : vector<16x128xf32>
    %c124_i32_181 = arith.constant 124 : i32
    %356 = tpu.dynamic_rotate %312 by %c124_i32_181 dim 1 : vector<16x128xf32>, i32 -> vector<16x128xf32>
    %c2_i32_182 = arith.constant 2 : i32
    %357 = arith.muli %arg1, %c2_i32_182 : i32
    %c0_i32_183 = arith.constant 0 : i32
    %358 = arith.addi %357, %c0_i32_183 : i32
    %c49_i32_184 = arith.constant 49 : i32
    %359 = arith.muli %358, %c49_i32_184 : i32
    %c28_i32_185 = arith.constant 28 : i32
    %360 = arith.addi %359, %c28_i32_185 : i32
    %c4_i32_186 = arith.constant 4 : i32
    %361 = arith.addi %360, %c4_i32_186 : i32
    %362 = arith.index_cast %361 : i32 to index
    %363 = memref.load %arg6[%362] : memref<392xf32, #tpu.memory_space<smem>>
    %364 = vector.broadcast %363 : f32 to vector<16x128xf32>
    %365 = arith.mulf %364, %356 : vector<16x128xf32>
    %366 = arith.addf %322, %365 : vector<16x128xf32>
    %c123_i32_187 = arith.constant 123 : i32
    %367 = tpu.dynamic_rotate %312 by %c123_i32_187 dim 1 : vector<16x128xf32>, i32 -> vector<16x128xf32>
    %c2_i32_188 = arith.constant 2 : i32
    %368 = arith.muli %arg1, %c2_i32_188 : i32
    %c0_i32_189 = arith.constant 0 : i32
    %369 = arith.addi %368, %c0_i32_189 : i32
    %c49_i32_190 = arith.constant 49 : i32
    %370 = arith.muli %369, %c49_i32_190 : i32
    %c28_i32_191 = arith.constant 28 : i32
    %371 = arith.addi %370, %c28_i32_191 : i32
    %c5_i32_192 = arith.constant 5 : i32
    %372 = arith.addi %371, %c5_i32_192 : i32
    %373 = arith.index_cast %372 : i32 to index
    %374 = memref.load %arg6[%373] : memref<392xf32, #tpu.memory_space<smem>>
    %375 = vector.broadcast %374 : f32 to vector<16x128xf32>
    %376 = arith.mulf %375, %367 : vector<16x128xf32>
    %377 = arith.addf %333, %376 : vector<16x128xf32>
    %c122_i32_193 = arith.constant 122 : i32
    %378 = tpu.dynamic_rotate %312 by %c122_i32_193 dim 1 : vector<16x128xf32>, i32 -> vector<16x128xf32>
    %c2_i32_194 = arith.constant 2 : i32
    %379 = arith.muli %arg1, %c2_i32_194 : i32
    %c0_i32_195 = arith.constant 0 : i32
    %380 = arith.addi %379, %c0_i32_195 : i32
    %c49_i32_196 = arith.constant 49 : i32
    %381 = arith.muli %380, %c49_i32_196 : i32
    %c28_i32_197 = arith.constant 28 : i32
    %382 = arith.addi %381, %c28_i32_197 : i32
    %c6_i32_198 = arith.constant 6 : i32
    %383 = arith.addi %382, %c6_i32_198 : i32
    %384 = arith.index_cast %383 : i32 to index
    %385 = memref.load %arg6[%384] : memref<392xf32, #tpu.memory_space<smem>>
    %386 = vector.broadcast %385 : f32 to vector<16x128xf32>
    %387 = arith.mulf %386, %378 : vector<16x128xf32>
    %388 = arith.addf %344, %387 : vector<16x128xf32>
    %389 = vector.extract_strided_slice %7 {offsets = [5, 0], sizes = [16, 128], strides = [1, 1]} : vector<24x128xf32> to vector<16x128xf32>
    %c2_i32_199 = arith.constant 2 : i32
    %390 = arith.muli %arg1, %c2_i32_199 : i32
    %c0_i32_200 = arith.constant 0 : i32
    %391 = arith.addi %390, %c0_i32_200 : i32
    %c49_i32_201 = arith.constant 49 : i32
    %392 = arith.muli %391, %c49_i32_201 : i32
    %c35_i32 = arith.constant 35 : i32
    %393 = arith.addi %392, %c35_i32 : i32
    %c0_i32_202 = arith.constant 0 : i32
    %394 = arith.addi %393, %c0_i32_202 : i32
    %395 = arith.index_cast %394 : i32 to index
    %396 = memref.load %arg6[%395] : memref<392xf32, #tpu.memory_space<smem>>
    %397 = vector.broadcast %396 : f32 to vector<16x128xf32>
    %398 = arith.mulf %397, %389 : vector<16x128xf32>
    %399 = arith.addf %355, %398 : vector<16x128xf32>
    %c127_i32_203 = arith.constant 127 : i32
    %400 = tpu.dynamic_rotate %389 by %c127_i32_203 dim 1 : vector<16x128xf32>, i32 -> vector<16x128xf32>
    %c2_i32_204 = arith.constant 2 : i32
    %401 = arith.muli %arg1, %c2_i32_204 : i32
    %c0_i32_205 = arith.constant 0 : i32
    %402 = arith.addi %401, %c0_i32_205 : i32
    %c49_i32_206 = arith.constant 49 : i32
    %403 = arith.muli %402, %c49_i32_206 : i32
    %c35_i32_207 = arith.constant 35 : i32
    %404 = arith.addi %403, %c35_i32_207 : i32
    %c1_i32_208 = arith.constant 1 : i32
    %405 = arith.addi %404, %c1_i32_208 : i32
    %406 = arith.index_cast %405 : i32 to index
    %407 = memref.load %arg6[%406] : memref<392xf32, #tpu.memory_space<smem>>
    %408 = vector.broadcast %407 : f32 to vector<16x128xf32>
    %409 = arith.mulf %408, %400 : vector<16x128xf32>
    %410 = arith.addf %366, %409 : vector<16x128xf32>
    %c126_i32_209 = arith.constant 126 : i32
    %411 = tpu.dynamic_rotate %389 by %c126_i32_209 dim 1 : vector<16x128xf32>, i32 -> vector<16x128xf32>
    %c2_i32_210 = arith.constant 2 : i32
    %412 = arith.muli %arg1, %c2_i32_210 : i32
    %c0_i32_211 = arith.constant 0 : i32
    %413 = arith.addi %412, %c0_i32_211 : i32
    %c49_i32_212 = arith.constant 49 : i32
    %414 = arith.muli %413, %c49_i32_212 : i32
    %c35_i32_213 = arith.constant 35 : i32
    %415 = arith.addi %414, %c35_i32_213 : i32
    %c2_i32_214 = arith.constant 2 : i32
    %416 = arith.addi %415, %c2_i32_214 : i32
    %417 = arith.index_cast %416 : i32 to index
    %418 = memref.load %arg6[%417] : memref<392xf32, #tpu.memory_space<smem>>
    %419 = vector.broadcast %418 : f32 to vector<16x128xf32>
    %420 = arith.mulf %419, %411 : vector<16x128xf32>
    %421 = arith.addf %377, %420 : vector<16x128xf32>
    %c125_i32_215 = arith.constant 125 : i32
    %422 = tpu.dynamic_rotate %389 by %c125_i32_215 dim 1 : vector<16x128xf32>, i32 -> vector<16x128xf32>
    %c2_i32_216 = arith.constant 2 : i32
    %423 = arith.muli %arg1, %c2_i32_216 : i32
    %c0_i32_217 = arith.constant 0 : i32
    %424 = arith.addi %423, %c0_i32_217 : i32
    %c49_i32_218 = arith.constant 49 : i32
    %425 = arith.muli %424, %c49_i32_218 : i32
    %c35_i32_219 = arith.constant 35 : i32
    %426 = arith.addi %425, %c35_i32_219 : i32
    %c3_i32_220 = arith.constant 3 : i32
    %427 = arith.addi %426, %c3_i32_220 : i32
    %428 = arith.index_cast %427 : i32 to index
    %429 = memref.load %arg6[%428] : memref<392xf32, #tpu.memory_space<smem>>
    %430 = vector.broadcast %429 : f32 to vector<16x128xf32>
    %431 = arith.mulf %430, %422 : vector<16x128xf32>
    %432 = arith.addf %388, %431 : vector<16x128xf32>
    %c124_i32_221 = arith.constant 124 : i32
    %433 = tpu.dynamic_rotate %389 by %c124_i32_221 dim 1 : vector<16x128xf32>, i32 -> vector<16x128xf32>
    %c2_i32_222 = arith.constant 2 : i32
    %434 = arith.muli %arg1, %c2_i32_222 : i32
    %c0_i32_223 = arith.constant 0 : i32
    %435 = arith.addi %434, %c0_i32_223 : i32
    %c49_i32_224 = arith.constant 49 : i32
    %436 = arith.muli %435, %c49_i32_224 : i32
    %c35_i32_225 = arith.constant 35 : i32
    %437 = arith.addi %436, %c35_i32_225 : i32
    %c4_i32_226 = arith.constant 4 : i32
    %438 = arith.addi %437, %c4_i32_226 : i32
    %439 = arith.index_cast %438 : i32 to index
    %440 = memref.load %arg6[%439] : memref<392xf32, #tpu.memory_space<smem>>
    %441 = vector.broadcast %440 : f32 to vector<16x128xf32>
    %442 = arith.mulf %441, %433 : vector<16x128xf32>
    %443 = arith.addf %399, %442 : vector<16x128xf32>
    %c123_i32_227 = arith.constant 123 : i32
    %444 = tpu.dynamic_rotate %389 by %c123_i32_227 dim 1 : vector<16x128xf32>, i32 -> vector<16x128xf32>
    %c2_i32_228 = arith.constant 2 : i32
    %445 = arith.muli %arg1, %c2_i32_228 : i32
    %c0_i32_229 = arith.constant 0 : i32
    %446 = arith.addi %445, %c0_i32_229 : i32
    %c49_i32_230 = arith.constant 49 : i32
    %447 = arith.muli %446, %c49_i32_230 : i32
    %c35_i32_231 = arith.constant 35 : i32
    %448 = arith.addi %447, %c35_i32_231 : i32
    %c5_i32_232 = arith.constant 5 : i32
    %449 = arith.addi %448, %c5_i32_232 : i32
    %450 = arith.index_cast %449 : i32 to index
    %451 = memref.load %arg6[%450] : memref<392xf32, #tpu.memory_space<smem>>
    %452 = vector.broadcast %451 : f32 to vector<16x128xf32>
    %453 = arith.mulf %452, %444 : vector<16x128xf32>
    %454 = arith.addf %410, %453 : vector<16x128xf32>
    %c122_i32_233 = arith.constant 122 : i32
    %455 = tpu.dynamic_rotate %389 by %c122_i32_233 dim 1 : vector<16x128xf32>, i32 -> vector<16x128xf32>
    %c2_i32_234 = arith.constant 2 : i32
    %456 = arith.muli %arg1, %c2_i32_234 : i32
    %c0_i32_235 = arith.constant 0 : i32
    %457 = arith.addi %456, %c0_i32_235 : i32
    %c49_i32_236 = arith.constant 49 : i32
    %458 = arith.muli %457, %c49_i32_236 : i32
    %c35_i32_237 = arith.constant 35 : i32
    %459 = arith.addi %458, %c35_i32_237 : i32
    %c6_i32_238 = arith.constant 6 : i32
    %460 = arith.addi %459, %c6_i32_238 : i32
    %461 = arith.index_cast %460 : i32 to index
    %462 = memref.load %arg6[%461] : memref<392xf32, #tpu.memory_space<smem>>
    %463 = vector.broadcast %462 : f32 to vector<16x128xf32>
    %464 = arith.mulf %463, %455 : vector<16x128xf32>
    %465 = arith.addf %421, %464 : vector<16x128xf32>
    %466 = vector.extract_strided_slice %7 {offsets = [6, 0], sizes = [16, 128], strides = [1, 1]} : vector<24x128xf32> to vector<16x128xf32>
    %c2_i32_239 = arith.constant 2 : i32
    %467 = arith.muli %arg1, %c2_i32_239 : i32
    %c0_i32_240 = arith.constant 0 : i32
    %468 = arith.addi %467, %c0_i32_240 : i32
    %c49_i32_241 = arith.constant 49 : i32
    %469 = arith.muli %468, %c49_i32_241 : i32
    %c42_i32 = arith.constant 42 : i32
    %470 = arith.addi %469, %c42_i32 : i32
    %c0_i32_242 = arith.constant 0 : i32
    %471 = arith.addi %470, %c0_i32_242 : i32
    %472 = arith.index_cast %471 : i32 to index
    %473 = memref.load %arg6[%472] : memref<392xf32, #tpu.memory_space<smem>>
    %474 = vector.broadcast %473 : f32 to vector<16x128xf32>
    %475 = arith.mulf %474, %466 : vector<16x128xf32>
    %476 = arith.addf %432, %475 : vector<16x128xf32>
    %c127_i32_243 = arith.constant 127 : i32
    %477 = tpu.dynamic_rotate %466 by %c127_i32_243 dim 1 : vector<16x128xf32>, i32 -> vector<16x128xf32>
    %c2_i32_244 = arith.constant 2 : i32
    %478 = arith.muli %arg1, %c2_i32_244 : i32
    %c0_i32_245 = arith.constant 0 : i32
    %479 = arith.addi %478, %c0_i32_245 : i32
    %c49_i32_246 = arith.constant 49 : i32
    %480 = arith.muli %479, %c49_i32_246 : i32
    %c42_i32_247 = arith.constant 42 : i32
    %481 = arith.addi %480, %c42_i32_247 : i32
    %c1_i32_248 = arith.constant 1 : i32
    %482 = arith.addi %481, %c1_i32_248 : i32
    %483 = arith.index_cast %482 : i32 to index
    %484 = memref.load %arg6[%483] : memref<392xf32, #tpu.memory_space<smem>>
    %485 = vector.broadcast %484 : f32 to vector<16x128xf32>
    %486 = arith.mulf %485, %477 : vector<16x128xf32>
    %487 = arith.addf %443, %486 : vector<16x128xf32>
    %c126_i32_249 = arith.constant 126 : i32
    %488 = tpu.dynamic_rotate %466 by %c126_i32_249 dim 1 : vector<16x128xf32>, i32 -> vector<16x128xf32>
    %c2_i32_250 = arith.constant 2 : i32
    %489 = arith.muli %arg1, %c2_i32_250 : i32
    %c0_i32_251 = arith.constant 0 : i32
    %490 = arith.addi %489, %c0_i32_251 : i32
    %c49_i32_252 = arith.constant 49 : i32
    %491 = arith.muli %490, %c49_i32_252 : i32
    %c42_i32_253 = arith.constant 42 : i32
    %492 = arith.addi %491, %c42_i32_253 : i32
    %c2_i32_254 = arith.constant 2 : i32
    %493 = arith.addi %492, %c2_i32_254 : i32
    %494 = arith.index_cast %493 : i32 to index
    %495 = memref.load %arg6[%494] : memref<392xf32, #tpu.memory_space<smem>>
    %496 = vector.broadcast %495 : f32 to vector<16x128xf32>
    %497 = arith.mulf %496, %488 : vector<16x128xf32>
    %498 = arith.addf %454, %497 : vector<16x128xf32>
    %c125_i32_255 = arith.constant 125 : i32
    %499 = tpu.dynamic_rotate %466 by %c125_i32_255 dim 1 : vector<16x128xf32>, i32 -> vector<16x128xf32>
    %c2_i32_256 = arith.constant 2 : i32
    %500 = arith.muli %arg1, %c2_i32_256 : i32
    %c0_i32_257 = arith.constant 0 : i32
    %501 = arith.addi %500, %c0_i32_257 : i32
    %c49_i32_258 = arith.constant 49 : i32
    %502 = arith.muli %501, %c49_i32_258 : i32
    %c42_i32_259 = arith.constant 42 : i32
    %503 = arith.addi %502, %c42_i32_259 : i32
    %c3_i32_260 = arith.constant 3 : i32
    %504 = arith.addi %503, %c3_i32_260 : i32
    %505 = arith.index_cast %504 : i32 to index
    %506 = memref.load %arg6[%505] : memref<392xf32, #tpu.memory_space<smem>>
    %507 = vector.broadcast %506 : f32 to vector<16x128xf32>
    %508 = arith.mulf %507, %499 : vector<16x128xf32>
    %509 = arith.addf %465, %508 : vector<16x128xf32>
    %c124_i32_261 = arith.constant 124 : i32
    %510 = tpu.dynamic_rotate %466 by %c124_i32_261 dim 1 : vector<16x128xf32>, i32 -> vector<16x128xf32>
    %c2_i32_262 = arith.constant 2 : i32
    %511 = arith.muli %arg1, %c2_i32_262 : i32
    %c0_i32_263 = arith.constant 0 : i32
    %512 = arith.addi %511, %c0_i32_263 : i32
    %c49_i32_264 = arith.constant 49 : i32
    %513 = arith.muli %512, %c49_i32_264 : i32
    %c42_i32_265 = arith.constant 42 : i32
    %514 = arith.addi %513, %c42_i32_265 : i32
    %c4_i32_266 = arith.constant 4 : i32
    %515 = arith.addi %514, %c4_i32_266 : i32
    %516 = arith.index_cast %515 : i32 to index
    %517 = memref.load %arg6[%516] : memref<392xf32, #tpu.memory_space<smem>>
    %518 = vector.broadcast %517 : f32 to vector<16x128xf32>
    %519 = arith.mulf %518, %510 : vector<16x128xf32>
    %520 = arith.addf %476, %519 : vector<16x128xf32>
    %c123_i32_267 = arith.constant 123 : i32
    %521 = tpu.dynamic_rotate %466 by %c123_i32_267 dim 1 : vector<16x128xf32>, i32 -> vector<16x128xf32>
    %c2_i32_268 = arith.constant 2 : i32
    %522 = arith.muli %arg1, %c2_i32_268 : i32
    %c0_i32_269 = arith.constant 0 : i32
    %523 = arith.addi %522, %c0_i32_269 : i32
    %c49_i32_270 = arith.constant 49 : i32
    %524 = arith.muli %523, %c49_i32_270 : i32
    %c42_i32_271 = arith.constant 42 : i32
    %525 = arith.addi %524, %c42_i32_271 : i32
    %c5_i32_272 = arith.constant 5 : i32
    %526 = arith.addi %525, %c5_i32_272 : i32
    %527 = arith.index_cast %526 : i32 to index
    %528 = memref.load %arg6[%527] : memref<392xf32, #tpu.memory_space<smem>>
    %529 = vector.broadcast %528 : f32 to vector<16x128xf32>
    %530 = arith.mulf %529, %521 : vector<16x128xf32>
    %531 = arith.addf %487, %530 : vector<16x128xf32>
    %c122_i32_273 = arith.constant 122 : i32
    %532 = tpu.dynamic_rotate %466 by %c122_i32_273 dim 1 : vector<16x128xf32>, i32 -> vector<16x128xf32>
    %c2_i32_274 = arith.constant 2 : i32
    %533 = arith.muli %arg1, %c2_i32_274 : i32
    %c0_i32_275 = arith.constant 0 : i32
    %534 = arith.addi %533, %c0_i32_275 : i32
    %c49_i32_276 = arith.constant 49 : i32
    %535 = arith.muli %534, %c49_i32_276 : i32
    %c42_i32_277 = arith.constant 42 : i32
    %536 = arith.addi %535, %c42_i32_277 : i32
    %c6_i32_278 = arith.constant 6 : i32
    %537 = arith.addi %536, %c6_i32_278 : i32
    %538 = arith.index_cast %537 : i32 to index
    %539 = memref.load %arg6[%538] : memref<392xf32, #tpu.memory_space<smem>>
    %540 = vector.broadcast %539 : f32 to vector<16x128xf32>
    %541 = arith.mulf %540, %532 : vector<16x128xf32>
    %542 = arith.addf %498, %541 : vector<16x128xf32>
    %cst_279 = arith.constant dense<0.000000e+00> : vector<16x128xf32>
    %543 = tpu.matmul %5, %1, %cst_279 {dimension_numbers = #tpu.dot_dimension_numbers<[1], [0], [0], [1], [0, 0, 1, 1], [], []>} : vector<16x16xf32>, vector<16x128xf32>, vector<16x128xf32> -> vector<16x128xf32>
    %cst_280 = arith.constant dense<0.000000e+00> : vector<24x128xf32>
    %544 = tpu.matmul %0, %543, %cst_280 {dimension_numbers = #tpu.dot_dimension_numbers<[1], [0], [0], [1], [0, 0, 1, 1], [], []>} : vector<24x16xf32>, vector<16x128xf32>, vector<24x128xf32> -> vector<24x128xf32>
    %545 = vector.extract_strided_slice %544 {offsets = [0, 0], sizes = [16, 128], strides = [1, 1]} : vector<24x128xf32> to vector<16x128xf32>
    %c2_i32_281 = arith.constant 2 : i32
    %546 = arith.muli %arg1, %c2_i32_281 : i32
    %c1_i32_282 = arith.constant 1 : i32
    %547 = arith.addi %546, %c1_i32_282 : i32
    %c49_i32_283 = arith.constant 49 : i32
    %548 = arith.muli %547, %c49_i32_283 : i32
    %c0_i32_284 = arith.constant 0 : i32
    %549 = arith.addi %548, %c0_i32_284 : i32
    %c0_i32_285 = arith.constant 0 : i32
    %550 = arith.addi %549, %c0_i32_285 : i32
    %551 = arith.index_cast %550 : i32 to index
    %552 = memref.load %arg6[%551] : memref<392xf32, #tpu.memory_space<smem>>
    %553 = vector.broadcast %552 : f32 to vector<16x128xf32>
    %554 = arith.mulf %553, %545 : vector<16x128xf32>
    %555 = arith.addf %509, %554 : vector<16x128xf32>
    %c127_i32_286 = arith.constant 127 : i32
    %556 = tpu.dynamic_rotate %545 by %c127_i32_286 dim 1 : vector<16x128xf32>, i32 -> vector<16x128xf32>
    %c2_i32_287 = arith.constant 2 : i32
    %557 = arith.muli %arg1, %c2_i32_287 : i32
    %c1_i32_288 = arith.constant 1 : i32
    %558 = arith.addi %557, %c1_i32_288 : i32
    %c49_i32_289 = arith.constant 49 : i32
    %559 = arith.muli %558, %c49_i32_289 : i32
    %c0_i32_290 = arith.constant 0 : i32
    %560 = arith.addi %559, %c0_i32_290 : i32
    %c1_i32_291 = arith.constant 1 : i32
    %561 = arith.addi %560, %c1_i32_291 : i32
    %562 = arith.index_cast %561 : i32 to index
    %563 = memref.load %arg6[%562] : memref<392xf32, #tpu.memory_space<smem>>
    %564 = vector.broadcast %563 : f32 to vector<16x128xf32>
    %565 = arith.mulf %564, %556 : vector<16x128xf32>
    %566 = arith.addf %520, %565 : vector<16x128xf32>
    %c126_i32_292 = arith.constant 126 : i32
    %567 = tpu.dynamic_rotate %545 by %c126_i32_292 dim 1 : vector<16x128xf32>, i32 -> vector<16x128xf32>
    %c2_i32_293 = arith.constant 2 : i32
    %568 = arith.muli %arg1, %c2_i32_293 : i32
    %c1_i32_294 = arith.constant 1 : i32
    %569 = arith.addi %568, %c1_i32_294 : i32
    %c49_i32_295 = arith.constant 49 : i32
    %570 = arith.muli %569, %c49_i32_295 : i32
    %c0_i32_296 = arith.constant 0 : i32
    %571 = arith.addi %570, %c0_i32_296 : i32
    %c2_i32_297 = arith.constant 2 : i32
    %572 = arith.addi %571, %c2_i32_297 : i32
    %573 = arith.index_cast %572 : i32 to index
    %574 = memref.load %arg6[%573] : memref<392xf32, #tpu.memory_space<smem>>
    %575 = vector.broadcast %574 : f32 to vector<16x128xf32>
    %576 = arith.mulf %575, %567 : vector<16x128xf32>
    %577 = arith.addf %531, %576 : vector<16x128xf32>
    %c125_i32_298 = arith.constant 125 : i32
    %578 = tpu.dynamic_rotate %545 by %c125_i32_298 dim 1 : vector<16x128xf32>, i32 -> vector<16x128xf32>
    %c2_i32_299 = arith.constant 2 : i32
    %579 = arith.muli %arg1, %c2_i32_299 : i32
    %c1_i32_300 = arith.constant 1 : i32
    %580 = arith.addi %579, %c1_i32_300 : i32
    %c49_i32_301 = arith.constant 49 : i32
    %581 = arith.muli %580, %c49_i32_301 : i32
    %c0_i32_302 = arith.constant 0 : i32
    %582 = arith.addi %581, %c0_i32_302 : i32
    %c3_i32_303 = arith.constant 3 : i32
    %583 = arith.addi %582, %c3_i32_303 : i32
    %584 = arith.index_cast %583 : i32 to index
    %585 = memref.load %arg6[%584] : memref<392xf32, #tpu.memory_space<smem>>
    %586 = vector.broadcast %585 : f32 to vector<16x128xf32>
    %587 = arith.mulf %586, %578 : vector<16x128xf32>
    %588 = arith.addf %542, %587 : vector<16x128xf32>
    %c124_i32_304 = arith.constant 124 : i32
    %589 = tpu.dynamic_rotate %545 by %c124_i32_304 dim 1 : vector<16x128xf32>, i32 -> vector<16x128xf32>
    %c2_i32_305 = arith.constant 2 : i32
    %590 = arith.muli %arg1, %c2_i32_305 : i32
    %c1_i32_306 = arith.constant 1 : i32
    %591 = arith.addi %590, %c1_i32_306 : i32
    %c49_i32_307 = arith.constant 49 : i32
    %592 = arith.muli %591, %c49_i32_307 : i32
    %c0_i32_308 = arith.constant 0 : i32
    %593 = arith.addi %592, %c0_i32_308 : i32
    %c4_i32_309 = arith.constant 4 : i32
    %594 = arith.addi %593, %c4_i32_309 : i32
    %595 = arith.index_cast %594 : i32 to index
    %596 = memref.load %arg6[%595] : memref<392xf32, #tpu.memory_space<smem>>
    %597 = vector.broadcast %596 : f32 to vector<16x128xf32>
    %598 = arith.mulf %597, %589 : vector<16x128xf32>
    %599 = arith.addf %555, %598 : vector<16x128xf32>
    %c123_i32_310 = arith.constant 123 : i32
    %600 = tpu.dynamic_rotate %545 by %c123_i32_310 dim 1 : vector<16x128xf32>, i32 -> vector<16x128xf32>
    %c2_i32_311 = arith.constant 2 : i32
    %601 = arith.muli %arg1, %c2_i32_311 : i32
    %c1_i32_312 = arith.constant 1 : i32
    %602 = arith.addi %601, %c1_i32_312 : i32
    %c49_i32_313 = arith.constant 49 : i32
    %603 = arith.muli %602, %c49_i32_313 : i32
    %c0_i32_314 = arith.constant 0 : i32
    %604 = arith.addi %603, %c0_i32_314 : i32
    %c5_i32_315 = arith.constant 5 : i32
    %605 = arith.addi %604, %c5_i32_315 : i32
    %606 = arith.index_cast %605 : i32 to index
    %607 = memref.load %arg6[%606] : memref<392xf32, #tpu.memory_space<smem>>
    %608 = vector.broadcast %607 : f32 to vector<16x128xf32>
    %609 = arith.mulf %608, %600 : vector<16x128xf32>
    %610 = arith.addf %566, %609 : vector<16x128xf32>
    %c122_i32_316 = arith.constant 122 : i32
    %611 = tpu.dynamic_rotate %545 by %c122_i32_316 dim 1 : vector<16x128xf32>, i32 -> vector<16x128xf32>
    %c2_i32_317 = arith.constant 2 : i32
    %612 = arith.muli %arg1, %c2_i32_317 : i32
    %c1_i32_318 = arith.constant 1 : i32
    %613 = arith.addi %612, %c1_i32_318 : i32
    %c49_i32_319 = arith.constant 49 : i32
    %614 = arith.muli %613, %c49_i32_319 : i32
    %c0_i32_320 = arith.constant 0 : i32
    %615 = arith.addi %614, %c0_i32_320 : i32
    %c6_i32_321 = arith.constant 6 : i32
    %616 = arith.addi %615, %c6_i32_321 : i32
    %617 = arith.index_cast %616 : i32 to index
    %618 = memref.load %arg6[%617] : memref<392xf32, #tpu.memory_space<smem>>
    %619 = vector.broadcast %618 : f32 to vector<16x128xf32>
    %620 = arith.mulf %619, %611 : vector<16x128xf32>
    %621 = arith.addf %577, %620 : vector<16x128xf32>
    %622 = vector.extract_strided_slice %544 {offsets = [1, 0], sizes = [16, 128], strides = [1, 1]} : vector<24x128xf32> to vector<16x128xf32>
    %c2_i32_322 = arith.constant 2 : i32
    %623 = arith.muli %arg1, %c2_i32_322 : i32
    %c1_i32_323 = arith.constant 1 : i32
    %624 = arith.addi %623, %c1_i32_323 : i32
    %c49_i32_324 = arith.constant 49 : i32
    %625 = arith.muli %624, %c49_i32_324 : i32
    %c7_i32_325 = arith.constant 7 : i32
    %626 = arith.addi %625, %c7_i32_325 : i32
    %c0_i32_326 = arith.constant 0 : i32
    %627 = arith.addi %626, %c0_i32_326 : i32
    %628 = arith.index_cast %627 : i32 to index
    %629 = memref.load %arg6[%628] : memref<392xf32, #tpu.memory_space<smem>>
    %630 = vector.broadcast %629 : f32 to vector<16x128xf32>
    %631 = arith.mulf %630, %622 : vector<16x128xf32>
    %632 = arith.addf %588, %631 : vector<16x128xf32>
    %c127_i32_327 = arith.constant 127 : i32
    %633 = tpu.dynamic_rotate %622 by %c127_i32_327 dim 1 : vector<16x128xf32>, i32 -> vector<16x128xf32>
    %c2_i32_328 = arith.constant 2 : i32
    %634 = arith.muli %arg1, %c2_i32_328 : i32
    %c1_i32_329 = arith.constant 1 : i32
    %635 = arith.addi %634, %c1_i32_329 : i32
    %c49_i32_330 = arith.constant 49 : i32
    %636 = arith.muli %635, %c49_i32_330 : i32
    %c7_i32_331 = arith.constant 7 : i32
    %637 = arith.addi %636, %c7_i32_331 : i32
    %c1_i32_332 = arith.constant 1 : i32
    %638 = arith.addi %637, %c1_i32_332 : i32
    %639 = arith.index_cast %638 : i32 to index
    %640 = memref.load %arg6[%639] : memref<392xf32, #tpu.memory_space<smem>>
    %641 = vector.broadcast %640 : f32 to vector<16x128xf32>
    %642 = arith.mulf %641, %633 : vector<16x128xf32>
    %643 = arith.addf %599, %642 : vector<16x128xf32>
    %c126_i32_333 = arith.constant 126 : i32
    %644 = tpu.dynamic_rotate %622 by %c126_i32_333 dim 1 : vector<16x128xf32>, i32 -> vector<16x128xf32>
    %c2_i32_334 = arith.constant 2 : i32
    %645 = arith.muli %arg1, %c2_i32_334 : i32
    %c1_i32_335 = arith.constant 1 : i32
    %646 = arith.addi %645, %c1_i32_335 : i32
    %c49_i32_336 = arith.constant 49 : i32
    %647 = arith.muli %646, %c49_i32_336 : i32
    %c7_i32_337 = arith.constant 7 : i32
    %648 = arith.addi %647, %c7_i32_337 : i32
    %c2_i32_338 = arith.constant 2 : i32
    %649 = arith.addi %648, %c2_i32_338 : i32
    %650 = arith.index_cast %649 : i32 to index
    %651 = memref.load %arg6[%650] : memref<392xf32, #tpu.memory_space<smem>>
    %652 = vector.broadcast %651 : f32 to vector<16x128xf32>
    %653 = arith.mulf %652, %644 : vector<16x128xf32>
    %654 = arith.addf %610, %653 : vector<16x128xf32>
    %c125_i32_339 = arith.constant 125 : i32
    %655 = tpu.dynamic_rotate %622 by %c125_i32_339 dim 1 : vector<16x128xf32>, i32 -> vector<16x128xf32>
    %c2_i32_340 = arith.constant 2 : i32
    %656 = arith.muli %arg1, %c2_i32_340 : i32
    %c1_i32_341 = arith.constant 1 : i32
    %657 = arith.addi %656, %c1_i32_341 : i32
    %c49_i32_342 = arith.constant 49 : i32
    %658 = arith.muli %657, %c49_i32_342 : i32
    %c7_i32_343 = arith.constant 7 : i32
    %659 = arith.addi %658, %c7_i32_343 : i32
    %c3_i32_344 = arith.constant 3 : i32
    %660 = arith.addi %659, %c3_i32_344 : i32
    %661 = arith.index_cast %660 : i32 to index
    %662 = memref.load %arg6[%661] : memref<392xf32, #tpu.memory_space<smem>>
    %663 = vector.broadcast %662 : f32 to vector<16x128xf32>
    %664 = arith.mulf %663, %655 : vector<16x128xf32>
    %665 = arith.addf %621, %664 : vector<16x128xf32>
    %c124_i32_345 = arith.constant 124 : i32
    %666 = tpu.dynamic_rotate %622 by %c124_i32_345 dim 1 : vector<16x128xf32>, i32 -> vector<16x128xf32>
    %c2_i32_346 = arith.constant 2 : i32
    %667 = arith.muli %arg1, %c2_i32_346 : i32
    %c1_i32_347 = arith.constant 1 : i32
    %668 = arith.addi %667, %c1_i32_347 : i32
    %c49_i32_348 = arith.constant 49 : i32
    %669 = arith.muli %668, %c49_i32_348 : i32
    %c7_i32_349 = arith.constant 7 : i32
    %670 = arith.addi %669, %c7_i32_349 : i32
    %c4_i32_350 = arith.constant 4 : i32
    %671 = arith.addi %670, %c4_i32_350 : i32
    %672 = arith.index_cast %671 : i32 to index
    %673 = memref.load %arg6[%672] : memref<392xf32, #tpu.memory_space<smem>>
    %674 = vector.broadcast %673 : f32 to vector<16x128xf32>
    %675 = arith.mulf %674, %666 : vector<16x128xf32>
    %676 = arith.addf %632, %675 : vector<16x128xf32>
    %c123_i32_351 = arith.constant 123 : i32
    %677 = tpu.dynamic_rotate %622 by %c123_i32_351 dim 1 : vector<16x128xf32>, i32 -> vector<16x128xf32>
    %c2_i32_352 = arith.constant 2 : i32
    %678 = arith.muli %arg1, %c2_i32_352 : i32
    %c1_i32_353 = arith.constant 1 : i32
    %679 = arith.addi %678, %c1_i32_353 : i32
    %c49_i32_354 = arith.constant 49 : i32
    %680 = arith.muli %679, %c49_i32_354 : i32
    %c7_i32_355 = arith.constant 7 : i32
    %681 = arith.addi %680, %c7_i32_355 : i32
    %c5_i32_356 = arith.constant 5 : i32
    %682 = arith.addi %681, %c5_i32_356 : i32
    %683 = arith.index_cast %682 : i32 to index
    %684 = memref.load %arg6[%683] : memref<392xf32, #tpu.memory_space<smem>>
    %685 = vector.broadcast %684 : f32 to vector<16x128xf32>
    %686 = arith.mulf %685, %677 : vector<16x128xf32>
    %687 = arith.addf %643, %686 : vector<16x128xf32>
    %c122_i32_357 = arith.constant 122 : i32
    %688 = tpu.dynamic_rotate %622 by %c122_i32_357 dim 1 : vector<16x128xf32>, i32 -> vector<16x128xf32>
    %c2_i32_358 = arith.constant 2 : i32
    %689 = arith.muli %arg1, %c2_i32_358 : i32
    %c1_i32_359 = arith.constant 1 : i32
    %690 = arith.addi %689, %c1_i32_359 : i32
    %c49_i32_360 = arith.constant 49 : i32
    %691 = arith.muli %690, %c49_i32_360 : i32
    %c7_i32_361 = arith.constant 7 : i32
    %692 = arith.addi %691, %c7_i32_361 : i32
    %c6_i32_362 = arith.constant 6 : i32
    %693 = arith.addi %692, %c6_i32_362 : i32
    %694 = arith.index_cast %693 : i32 to index
    %695 = memref.load %arg6[%694] : memref<392xf32, #tpu.memory_space<smem>>
    %696 = vector.broadcast %695 : f32 to vector<16x128xf32>
    %697 = arith.mulf %696, %688 : vector<16x128xf32>
    %698 = arith.addf %654, %697 : vector<16x128xf32>
    %699 = vector.extract_strided_slice %544 {offsets = [2, 0], sizes = [16, 128], strides = [1, 1]} : vector<24x128xf32> to vector<16x128xf32>
    %c2_i32_363 = arith.constant 2 : i32
    %700 = arith.muli %arg1, %c2_i32_363 : i32
    %c1_i32_364 = arith.constant 1 : i32
    %701 = arith.addi %700, %c1_i32_364 : i32
    %c49_i32_365 = arith.constant 49 : i32
    %702 = arith.muli %701, %c49_i32_365 : i32
    %c14_i32_366 = arith.constant 14 : i32
    %703 = arith.addi %702, %c14_i32_366 : i32
    %c0_i32_367 = arith.constant 0 : i32
    %704 = arith.addi %703, %c0_i32_367 : i32
    %705 = arith.index_cast %704 : i32 to index
    %706 = memref.load %arg6[%705] : memref<392xf32, #tpu.memory_space<smem>>
    %707 = vector.broadcast %706 : f32 to vector<16x128xf32>
    %708 = arith.mulf %707, %699 : vector<16x128xf32>
    %709 = arith.addf %665, %708 : vector<16x128xf32>
    %c127_i32_368 = arith.constant 127 : i32
    %710 = tpu.dynamic_rotate %699 by %c127_i32_368 dim 1 : vector<16x128xf32>, i32 -> vector<16x128xf32>
    %c2_i32_369 = arith.constant 2 : i32
    %711 = arith.muli %arg1, %c2_i32_369 : i32
    %c1_i32_370 = arith.constant 1 : i32
    %712 = arith.addi %711, %c1_i32_370 : i32
    %c49_i32_371 = arith.constant 49 : i32
    %713 = arith.muli %712, %c49_i32_371 : i32
    %c14_i32_372 = arith.constant 14 : i32
    %714 = arith.addi %713, %c14_i32_372 : i32
    %c1_i32_373 = arith.constant 1 : i32
    %715 = arith.addi %714, %c1_i32_373 : i32
    %716 = arith.index_cast %715 : i32 to index
    %717 = memref.load %arg6[%716] : memref<392xf32, #tpu.memory_space<smem>>
    %718 = vector.broadcast %717 : f32 to vector<16x128xf32>
    %719 = arith.mulf %718, %710 : vector<16x128xf32>
    %720 = arith.addf %676, %719 : vector<16x128xf32>
    %c126_i32_374 = arith.constant 126 : i32
    %721 = tpu.dynamic_rotate %699 by %c126_i32_374 dim 1 : vector<16x128xf32>, i32 -> vector<16x128xf32>
    %c2_i32_375 = arith.constant 2 : i32
    %722 = arith.muli %arg1, %c2_i32_375 : i32
    %c1_i32_376 = arith.constant 1 : i32
    %723 = arith.addi %722, %c1_i32_376 : i32
    %c49_i32_377 = arith.constant 49 : i32
    %724 = arith.muli %723, %c49_i32_377 : i32
    %c14_i32_378 = arith.constant 14 : i32
    %725 = arith.addi %724, %c14_i32_378 : i32
    %c2_i32_379 = arith.constant 2 : i32
    %726 = arith.addi %725, %c2_i32_379 : i32
    %727 = arith.index_cast %726 : i32 to index
    %728 = memref.load %arg6[%727] : memref<392xf32, #tpu.memory_space<smem>>
    %729 = vector.broadcast %728 : f32 to vector<16x128xf32>
    %730 = arith.mulf %729, %721 : vector<16x128xf32>
    %731 = arith.addf %687, %730 : vector<16x128xf32>
    %c125_i32_380 = arith.constant 125 : i32
    %732 = tpu.dynamic_rotate %699 by %c125_i32_380 dim 1 : vector<16x128xf32>, i32 -> vector<16x128xf32>
    %c2_i32_381 = arith.constant 2 : i32
    %733 = arith.muli %arg1, %c2_i32_381 : i32
    %c1_i32_382 = arith.constant 1 : i32
    %734 = arith.addi %733, %c1_i32_382 : i32
    %c49_i32_383 = arith.constant 49 : i32
    %735 = arith.muli %734, %c49_i32_383 : i32
    %c14_i32_384 = arith.constant 14 : i32
    %736 = arith.addi %735, %c14_i32_384 : i32
    %c3_i32_385 = arith.constant 3 : i32
    %737 = arith.addi %736, %c3_i32_385 : i32
    %738 = arith.index_cast %737 : i32 to index
    %739 = memref.load %arg6[%738] : memref<392xf32, #tpu.memory_space<smem>>
    %740 = vector.broadcast %739 : f32 to vector<16x128xf32>
    %741 = arith.mulf %740, %732 : vector<16x128xf32>
    %742 = arith.addf %698, %741 : vector<16x128xf32>
    %c124_i32_386 = arith.constant 124 : i32
    %743 = tpu.dynamic_rotate %699 by %c124_i32_386 dim 1 : vector<16x128xf32>, i32 -> vector<16x128xf32>
    %c2_i32_387 = arith.constant 2 : i32
    %744 = arith.muli %arg1, %c2_i32_387 : i32
    %c1_i32_388 = arith.constant 1 : i32
    %745 = arith.addi %744, %c1_i32_388 : i32
    %c49_i32_389 = arith.constant 49 : i32
    %746 = arith.muli %745, %c49_i32_389 : i32
    %c14_i32_390 = arith.constant 14 : i32
    %747 = arith.addi %746, %c14_i32_390 : i32
    %c4_i32_391 = arith.constant 4 : i32
    %748 = arith.addi %747, %c4_i32_391 : i32
    %749 = arith.index_cast %748 : i32 to index
    %750 = memref.load %arg6[%749] : memref<392xf32, #tpu.memory_space<smem>>
    %751 = vector.broadcast %750 : f32 to vector<16x128xf32>
    %752 = arith.mulf %751, %743 : vector<16x128xf32>
    %753 = arith.addf %709, %752 : vector<16x128xf32>
    %c123_i32_392 = arith.constant 123 : i32
    %754 = tpu.dynamic_rotate %699 by %c123_i32_392 dim 1 : vector<16x128xf32>, i32 -> vector<16x128xf32>
    %c2_i32_393 = arith.constant 2 : i32
    %755 = arith.muli %arg1, %c2_i32_393 : i32
    %c1_i32_394 = arith.constant 1 : i32
    %756 = arith.addi %755, %c1_i32_394 : i32
    %c49_i32_395 = arith.constant 49 : i32
    %757 = arith.muli %756, %c49_i32_395 : i32
    %c14_i32_396 = arith.constant 14 : i32
    %758 = arith.addi %757, %c14_i32_396 : i32
    %c5_i32_397 = arith.constant 5 : i32
    %759 = arith.addi %758, %c5_i32_397 : i32
    %760 = arith.index_cast %759 : i32 to index
    %761 = memref.load %arg6[%760] : memref<392xf32, #tpu.memory_space<smem>>
    %762 = vector.broadcast %761 : f32 to vector<16x128xf32>
    %763 = arith.mulf %762, %754 : vector<16x128xf32>
    %764 = arith.addf %720, %763 : vector<16x128xf32>
    %c122_i32_398 = arith.constant 122 : i32
    %765 = tpu.dynamic_rotate %699 by %c122_i32_398 dim 1 : vector<16x128xf32>, i32 -> vector<16x128xf32>
    %c2_i32_399 = arith.constant 2 : i32
    %766 = arith.muli %arg1, %c2_i32_399 : i32
    %c1_i32_400 = arith.constant 1 : i32
    %767 = arith.addi %766, %c1_i32_400 : i32
    %c49_i32_401 = arith.constant 49 : i32
    %768 = arith.muli %767, %c49_i32_401 : i32
    %c14_i32_402 = arith.constant 14 : i32
    %769 = arith.addi %768, %c14_i32_402 : i32
    %c6_i32_403 = arith.constant 6 : i32
    %770 = arith.addi %769, %c6_i32_403 : i32
    %771 = arith.index_cast %770 : i32 to index
    %772 = memref.load %arg6[%771] : memref<392xf32, #tpu.memory_space<smem>>
    %773 = vector.broadcast %772 : f32 to vector<16x128xf32>
    %774 = arith.mulf %773, %765 : vector<16x128xf32>
    %775 = arith.addf %731, %774 : vector<16x128xf32>
    %776 = vector.extract_strided_slice %544 {offsets = [3, 0], sizes = [16, 128], strides = [1, 1]} : vector<24x128xf32> to vector<16x128xf32>
    %c2_i32_404 = arith.constant 2 : i32
    %777 = arith.muli %arg1, %c2_i32_404 : i32
    %c1_i32_405 = arith.constant 1 : i32
    %778 = arith.addi %777, %c1_i32_405 : i32
    %c49_i32_406 = arith.constant 49 : i32
    %779 = arith.muli %778, %c49_i32_406 : i32
    %c21_i32_407 = arith.constant 21 : i32
    %780 = arith.addi %779, %c21_i32_407 : i32
    %c0_i32_408 = arith.constant 0 : i32
    %781 = arith.addi %780, %c0_i32_408 : i32
    %782 = arith.index_cast %781 : i32 to index
    %783 = memref.load %arg6[%782] : memref<392xf32, #tpu.memory_space<smem>>
    %784 = vector.broadcast %783 : f32 to vector<16x128xf32>
    %785 = arith.mulf %784, %776 : vector<16x128xf32>
    %786 = arith.addf %742, %785 : vector<16x128xf32>
    %c127_i32_409 = arith.constant 127 : i32
    %787 = tpu.dynamic_rotate %776 by %c127_i32_409 dim 1 : vector<16x128xf32>, i32 -> vector<16x128xf32>
    %c2_i32_410 = arith.constant 2 : i32
    %788 = arith.muli %arg1, %c2_i32_410 : i32
    %c1_i32_411 = arith.constant 1 : i32
    %789 = arith.addi %788, %c1_i32_411 : i32
    %c49_i32_412 = arith.constant 49 : i32
    %790 = arith.muli %789, %c49_i32_412 : i32
    %c21_i32_413 = arith.constant 21 : i32
    %791 = arith.addi %790, %c21_i32_413 : i32
    %c1_i32_414 = arith.constant 1 : i32
    %792 = arith.addi %791, %c1_i32_414 : i32
    %793 = arith.index_cast %792 : i32 to index
    %794 = memref.load %arg6[%793] : memref<392xf32, #tpu.memory_space<smem>>
    %795 = vector.broadcast %794 : f32 to vector<16x128xf32>
    %796 = arith.mulf %795, %787 : vector<16x128xf32>
    %797 = arith.addf %753, %796 : vector<16x128xf32>
    %c126_i32_415 = arith.constant 126 : i32
    %798 = tpu.dynamic_rotate %776 by %c126_i32_415 dim 1 : vector<16x128xf32>, i32 -> vector<16x128xf32>
    %c2_i32_416 = arith.constant 2 : i32
    %799 = arith.muli %arg1, %c2_i32_416 : i32
    %c1_i32_417 = arith.constant 1 : i32
    %800 = arith.addi %799, %c1_i32_417 : i32
    %c49_i32_418 = arith.constant 49 : i32
    %801 = arith.muli %800, %c49_i32_418 : i32
    %c21_i32_419 = arith.constant 21 : i32
    %802 = arith.addi %801, %c21_i32_419 : i32
    %c2_i32_420 = arith.constant 2 : i32
    %803 = arith.addi %802, %c2_i32_420 : i32
    %804 = arith.index_cast %803 : i32 to index
    %805 = memref.load %arg6[%804] : memref<392xf32, #tpu.memory_space<smem>>
    %806 = vector.broadcast %805 : f32 to vector<16x128xf32>
    %807 = arith.mulf %806, %798 : vector<16x128xf32>
    %808 = arith.addf %764, %807 : vector<16x128xf32>
    %c125_i32_421 = arith.constant 125 : i32
    %809 = tpu.dynamic_rotate %776 by %c125_i32_421 dim 1 : vector<16x128xf32>, i32 -> vector<16x128xf32>
    %c2_i32_422 = arith.constant 2 : i32
    %810 = arith.muli %arg1, %c2_i32_422 : i32
    %c1_i32_423 = arith.constant 1 : i32
    %811 = arith.addi %810, %c1_i32_423 : i32
    %c49_i32_424 = arith.constant 49 : i32
    %812 = arith.muli %811, %c49_i32_424 : i32
    %c21_i32_425 = arith.constant 21 : i32
    %813 = arith.addi %812, %c21_i32_425 : i32
    %c3_i32_426 = arith.constant 3 : i32
    %814 = arith.addi %813, %c3_i32_426 : i32
    %815 = arith.index_cast %814 : i32 to index
    %816 = memref.load %arg6[%815] : memref<392xf32, #tpu.memory_space<smem>>
    %817 = vector.broadcast %816 : f32 to vector<16x128xf32>
    %818 = arith.mulf %817, %809 : vector<16x128xf32>
    %819 = arith.addf %775, %818 : vector<16x128xf32>
    %c124_i32_427 = arith.constant 124 : i32
    %820 = tpu.dynamic_rotate %776 by %c124_i32_427 dim 1 : vector<16x128xf32>, i32 -> vector<16x128xf32>
    %c2_i32_428 = arith.constant 2 : i32
    %821 = arith.muli %arg1, %c2_i32_428 : i32
    %c1_i32_429 = arith.constant 1 : i32
    %822 = arith.addi %821, %c1_i32_429 : i32
    %c49_i32_430 = arith.constant 49 : i32
    %823 = arith.muli %822, %c49_i32_430 : i32
    %c21_i32_431 = arith.constant 21 : i32
    %824 = arith.addi %823, %c21_i32_431 : i32
    %c4_i32_432 = arith.constant 4 : i32
    %825 = arith.addi %824, %c4_i32_432 : i32
    %826 = arith.index_cast %825 : i32 to index
    %827 = memref.load %arg6[%826] : memref<392xf32, #tpu.memory_space<smem>>
    %828 = vector.broadcast %827 : f32 to vector<16x128xf32>
    %829 = arith.mulf %828, %820 : vector<16x128xf32>
    %830 = arith.addf %786, %829 : vector<16x128xf32>
    %c123_i32_433 = arith.constant 123 : i32
    %831 = tpu.dynamic_rotate %776 by %c123_i32_433 dim 1 : vector<16x128xf32>, i32 -> vector<16x128xf32>
    %c2_i32_434 = arith.constant 2 : i32
    %832 = arith.muli %arg1, %c2_i32_434 : i32
    %c1_i32_435 = arith.constant 1 : i32
    %833 = arith.addi %832, %c1_i32_435 : i32
    %c49_i32_436 = arith.constant 49 : i32
    %834 = arith.muli %833, %c49_i32_436 : i32
    %c21_i32_437 = arith.constant 21 : i32
    %835 = arith.addi %834, %c21_i32_437 : i32
    %c5_i32_438 = arith.constant 5 : i32
    %836 = arith.addi %835, %c5_i32_438 : i32
    %837 = arith.index_cast %836 : i32 to index
    %838 = memref.load %arg6[%837] : memref<392xf32, #tpu.memory_space<smem>>
    %839 = vector.broadcast %838 : f32 to vector<16x128xf32>
    %840 = arith.mulf %839, %831 : vector<16x128xf32>
    %841 = arith.addf %797, %840 : vector<16x128xf32>
    %c122_i32_439 = arith.constant 122 : i32
    %842 = tpu.dynamic_rotate %776 by %c122_i32_439 dim 1 : vector<16x128xf32>, i32 -> vector<16x128xf32>
    %c2_i32_440 = arith.constant 2 : i32
    %843 = arith.muli %arg1, %c2_i32_440 : i32
    %c1_i32_441 = arith.constant 1 : i32
    %844 = arith.addi %843, %c1_i32_441 : i32
    %c49_i32_442 = arith.constant 49 : i32
    %845 = arith.muli %844, %c49_i32_442 : i32
    %c21_i32_443 = arith.constant 21 : i32
    %846 = arith.addi %845, %c21_i32_443 : i32
    %c6_i32_444 = arith.constant 6 : i32
    %847 = arith.addi %846, %c6_i32_444 : i32
    %848 = arith.index_cast %847 : i32 to index
    %849 = memref.load %arg6[%848] : memref<392xf32, #tpu.memory_space<smem>>
    %850 = vector.broadcast %849 : f32 to vector<16x128xf32>
    %851 = arith.mulf %850, %842 : vector<16x128xf32>
    %852 = arith.addf %808, %851 : vector<16x128xf32>
    %853 = vector.extract_strided_slice %544 {offsets = [4, 0], sizes = [16, 128], strides = [1, 1]} : vector<24x128xf32> to vector<16x128xf32>
    %c2_i32_445 = arith.constant 2 : i32
    %854 = arith.muli %arg1, %c2_i32_445 : i32
    %c1_i32_446 = arith.constant 1 : i32
    %855 = arith.addi %854, %c1_i32_446 : i32
    %c49_i32_447 = arith.constant 49 : i32
    %856 = arith.muli %855, %c49_i32_447 : i32
    %c28_i32_448 = arith.constant 28 : i32
    %857 = arith.addi %856, %c28_i32_448 : i32
    %c0_i32_449 = arith.constant 0 : i32
    %858 = arith.addi %857, %c0_i32_449 : i32
    %859 = arith.index_cast %858 : i32 to index
    %860 = memref.load %arg6[%859] : memref<392xf32, #tpu.memory_space<smem>>
    %861 = vector.broadcast %860 : f32 to vector<16x128xf32>
    %862 = arith.mulf %861, %853 : vector<16x128xf32>
    %863 = arith.addf %819, %862 : vector<16x128xf32>
    %c127_i32_450 = arith.constant 127 : i32
    %864 = tpu.dynamic_rotate %853 by %c127_i32_450 dim 1 : vector<16x128xf32>, i32 -> vector<16x128xf32>
    %c2_i32_451 = arith.constant 2 : i32
    %865 = arith.muli %arg1, %c2_i32_451 : i32
    %c1_i32_452 = arith.constant 1 : i32
    %866 = arith.addi %865, %c1_i32_452 : i32
    %c49_i32_453 = arith.constant 49 : i32
    %867 = arith.muli %866, %c49_i32_453 : i32
    %c28_i32_454 = arith.constant 28 : i32
    %868 = arith.addi %867, %c28_i32_454 : i32
    %c1_i32_455 = arith.constant 1 : i32
    %869 = arith.addi %868, %c1_i32_455 : i32
    %870 = arith.index_cast %869 : i32 to index
    %871 = memref.load %arg6[%870] : memref<392xf32, #tpu.memory_space<smem>>
    %872 = vector.broadcast %871 : f32 to vector<16x128xf32>
    %873 = arith.mulf %872, %864 : vector<16x128xf32>
    %874 = arith.addf %830, %873 : vector<16x128xf32>
    %c126_i32_456 = arith.constant 126 : i32
    %875 = tpu.dynamic_rotate %853 by %c126_i32_456 dim 1 : vector<16x128xf32>, i32 -> vector<16x128xf32>
    %c2_i32_457 = arith.constant 2 : i32
    %876 = arith.muli %arg1, %c2_i32_457 : i32
    %c1_i32_458 = arith.constant 1 : i32
    %877 = arith.addi %876, %c1_i32_458 : i32
    %c49_i32_459 = arith.constant 49 : i32
    %878 = arith.muli %877, %c49_i32_459 : i32
    %c28_i32_460 = arith.constant 28 : i32
    %879 = arith.addi %878, %c28_i32_460 : i32
    %c2_i32_461 = arith.constant 2 : i32
    %880 = arith.addi %879, %c2_i32_461 : i32
    %881 = arith.index_cast %880 : i32 to index
    %882 = memref.load %arg6[%881] : memref<392xf32, #tpu.memory_space<smem>>
    %883 = vector.broadcast %882 : f32 to vector<16x128xf32>
    %884 = arith.mulf %883, %875 : vector<16x128xf32>
    %885 = arith.addf %841, %884 : vector<16x128xf32>
    %c125_i32_462 = arith.constant 125 : i32
    %886 = tpu.dynamic_rotate %853 by %c125_i32_462 dim 1 : vector<16x128xf32>, i32 -> vector<16x128xf32>
    %c2_i32_463 = arith.constant 2 : i32
    %887 = arith.muli %arg1, %c2_i32_463 : i32
    %c1_i32_464 = arith.constant 1 : i32
    %888 = arith.addi %887, %c1_i32_464 : i32
    %c49_i32_465 = arith.constant 49 : i32
    %889 = arith.muli %888, %c49_i32_465 : i32
    %c28_i32_466 = arith.constant 28 : i32
    %890 = arith.addi %889, %c28_i32_466 : i32
    %c3_i32_467 = arith.constant 3 : i32
    %891 = arith.addi %890, %c3_i32_467 : i32
    %892 = arith.index_cast %891 : i32 to index
    %893 = memref.load %arg6[%892] : memref<392xf32, #tpu.memory_space<smem>>
    %894 = vector.broadcast %893 : f32 to vector<16x128xf32>
    %895 = arith.mulf %894, %886 : vector<16x128xf32>
    %896 = arith.addf %852, %895 : vector<16x128xf32>
    %c124_i32_468 = arith.constant 124 : i32
    %897 = tpu.dynamic_rotate %853 by %c124_i32_468 dim 1 : vector<16x128xf32>, i32 -> vector<16x128xf32>
    %c2_i32_469 = arith.constant 2 : i32
    %898 = arith.muli %arg1, %c2_i32_469 : i32
    %c1_i32_470 = arith.constant 1 : i32
    %899 = arith.addi %898, %c1_i32_470 : i32
    %c49_i32_471 = arith.constant 49 : i32
    %900 = arith.muli %899, %c49_i32_471 : i32
    %c28_i32_472 = arith.constant 28 : i32
    %901 = arith.addi %900, %c28_i32_472 : i32
    %c4_i32_473 = arith.constant 4 : i32
    %902 = arith.addi %901, %c4_i32_473 : i32
    %903 = arith.index_cast %902 : i32 to index
    %904 = memref.load %arg6[%903] : memref<392xf32, #tpu.memory_space<smem>>
    %905 = vector.broadcast %904 : f32 to vector<16x128xf32>
    %906 = arith.mulf %905, %897 : vector<16x128xf32>
    %907 = arith.addf %863, %906 : vector<16x128xf32>
    %c123_i32_474 = arith.constant 123 : i32
    %908 = tpu.dynamic_rotate %853 by %c123_i32_474 dim 1 : vector<16x128xf32>, i32 -> vector<16x128xf32>
    %c2_i32_475 = arith.constant 2 : i32
    %909 = arith.muli %arg1, %c2_i32_475 : i32
    %c1_i32_476 = arith.constant 1 : i32
    %910 = arith.addi %909, %c1_i32_476 : i32
    %c49_i32_477 = arith.constant 49 : i32
    %911 = arith.muli %910, %c49_i32_477 : i32
    %c28_i32_478 = arith.constant 28 : i32
    %912 = arith.addi %911, %c28_i32_478 : i32
    %c5_i32_479 = arith.constant 5 : i32
    %913 = arith.addi %912, %c5_i32_479 : i32
    %914 = arith.index_cast %913 : i32 to index
    %915 = memref.load %arg6[%914] : memref<392xf32, #tpu.memory_space<smem>>
    %916 = vector.broadcast %915 : f32 to vector<16x128xf32>
    %917 = arith.mulf %916, %908 : vector<16x128xf32>
    %918 = arith.addf %874, %917 : vector<16x128xf32>
    %c122_i32_480 = arith.constant 122 : i32
    %919 = tpu.dynamic_rotate %853 by %c122_i32_480 dim 1 : vector<16x128xf32>, i32 -> vector<16x128xf32>
    %c2_i32_481 = arith.constant 2 : i32
    %920 = arith.muli %arg1, %c2_i32_481 : i32
    %c1_i32_482 = arith.constant 1 : i32
    %921 = arith.addi %920, %c1_i32_482 : i32
    %c49_i32_483 = arith.constant 49 : i32
    %922 = arith.muli %921, %c49_i32_483 : i32
    %c28_i32_484 = arith.constant 28 : i32
    %923 = arith.addi %922, %c28_i32_484 : i32
    %c6_i32_485 = arith.constant 6 : i32
    %924 = arith.addi %923, %c6_i32_485 : i32
    %925 = arith.index_cast %924 : i32 to index
    %926 = memref.load %arg6[%925] : memref<392xf32, #tpu.memory_space<smem>>
    %927 = vector.broadcast %926 : f32 to vector<16x128xf32>
    %928 = arith.mulf %927, %919 : vector<16x128xf32>
    %929 = arith.addf %885, %928 : vector<16x128xf32>
    %930 = vector.extract_strided_slice %544 {offsets = [5, 0], sizes = [16, 128], strides = [1, 1]} : vector<24x128xf32> to vector<16x128xf32>
    %c2_i32_486 = arith.constant 2 : i32
    %931 = arith.muli %arg1, %c2_i32_486 : i32
    %c1_i32_487 = arith.constant 1 : i32
    %932 = arith.addi %931, %c1_i32_487 : i32
    %c49_i32_488 = arith.constant 49 : i32
    %933 = arith.muli %932, %c49_i32_488 : i32
    %c35_i32_489 = arith.constant 35 : i32
    %934 = arith.addi %933, %c35_i32_489 : i32
    %c0_i32_490 = arith.constant 0 : i32
    %935 = arith.addi %934, %c0_i32_490 : i32
    %936 = arith.index_cast %935 : i32 to index
    %937 = memref.load %arg6[%936] : memref<392xf32, #tpu.memory_space<smem>>
    %938 = vector.broadcast %937 : f32 to vector<16x128xf32>
    %939 = arith.mulf %938, %930 : vector<16x128xf32>
    %940 = arith.addf %896, %939 : vector<16x128xf32>
    %c127_i32_491 = arith.constant 127 : i32
    %941 = tpu.dynamic_rotate %930 by %c127_i32_491 dim 1 : vector<16x128xf32>, i32 -> vector<16x128xf32>
    %c2_i32_492 = arith.constant 2 : i32
    %942 = arith.muli %arg1, %c2_i32_492 : i32
    %c1_i32_493 = arith.constant 1 : i32
    %943 = arith.addi %942, %c1_i32_493 : i32
    %c49_i32_494 = arith.constant 49 : i32
    %944 = arith.muli %943, %c49_i32_494 : i32
    %c35_i32_495 = arith.constant 35 : i32
    %945 = arith.addi %944, %c35_i32_495 : i32
    %c1_i32_496 = arith.constant 1 : i32
    %946 = arith.addi %945, %c1_i32_496 : i32
    %947 = arith.index_cast %946 : i32 to index
    %948 = memref.load %arg6[%947] : memref<392xf32, #tpu.memory_space<smem>>
    %949 = vector.broadcast %948 : f32 to vector<16x128xf32>
    %950 = arith.mulf %949, %941 : vector<16x128xf32>
    %951 = arith.addf %907, %950 : vector<16x128xf32>
    %c126_i32_497 = arith.constant 126 : i32
    %952 = tpu.dynamic_rotate %930 by %c126_i32_497 dim 1 : vector<16x128xf32>, i32 -> vector<16x128xf32>
    %c2_i32_498 = arith.constant 2 : i32
    %953 = arith.muli %arg1, %c2_i32_498 : i32
    %c1_i32_499 = arith.constant 1 : i32
    %954 = arith.addi %953, %c1_i32_499 : i32
    %c49_i32_500 = arith.constant 49 : i32
    %955 = arith.muli %954, %c49_i32_500 : i32
    %c35_i32_501 = arith.constant 35 : i32
    %956 = arith.addi %955, %c35_i32_501 : i32
    %c2_i32_502 = arith.constant 2 : i32
    %957 = arith.addi %956, %c2_i32_502 : i32
    %958 = arith.index_cast %957 : i32 to index
    %959 = memref.load %arg6[%958] : memref<392xf32, #tpu.memory_space<smem>>
    %960 = vector.broadcast %959 : f32 to vector<16x128xf32>
    %961 = arith.mulf %960, %952 : vector<16x128xf32>
    %962 = arith.addf %918, %961 : vector<16x128xf32>
    %c125_i32_503 = arith.constant 125 : i32
    %963 = tpu.dynamic_rotate %930 by %c125_i32_503 dim 1 : vector<16x128xf32>, i32 -> vector<16x128xf32>
    %c2_i32_504 = arith.constant 2 : i32
    %964 = arith.muli %arg1, %c2_i32_504 : i32
    %c1_i32_505 = arith.constant 1 : i32
    %965 = arith.addi %964, %c1_i32_505 : i32
    %c49_i32_506 = arith.constant 49 : i32
    %966 = arith.muli %965, %c49_i32_506 : i32
    %c35_i32_507 = arith.constant 35 : i32
    %967 = arith.addi %966, %c35_i32_507 : i32
    %c3_i32_508 = arith.constant 3 : i32
    %968 = arith.addi %967, %c3_i32_508 : i32
    %969 = arith.index_cast %968 : i32 to index
    %970 = memref.load %arg6[%969] : memref<392xf32, #tpu.memory_space<smem>>
    %971 = vector.broadcast %970 : f32 to vector<16x128xf32>
    %972 = arith.mulf %971, %963 : vector<16x128xf32>
    %973 = arith.addf %929, %972 : vector<16x128xf32>
    %c124_i32_509 = arith.constant 124 : i32
    %974 = tpu.dynamic_rotate %930 by %c124_i32_509 dim 1 : vector<16x128xf32>, i32 -> vector<16x128xf32>
    %c2_i32_510 = arith.constant 2 : i32
    %975 = arith.muli %arg1, %c2_i32_510 : i32
    %c1_i32_511 = arith.constant 1 : i32
    %976 = arith.addi %975, %c1_i32_511 : i32
    %c49_i32_512 = arith.constant 49 : i32
    %977 = arith.muli %976, %c49_i32_512 : i32
    %c35_i32_513 = arith.constant 35 : i32
    %978 = arith.addi %977, %c35_i32_513 : i32
    %c4_i32_514 = arith.constant 4 : i32
    %979 = arith.addi %978, %c4_i32_514 : i32
    %980 = arith.index_cast %979 : i32 to index
    %981 = memref.load %arg6[%980] : memref<392xf32, #tpu.memory_space<smem>>
    %982 = vector.broadcast %981 : f32 to vector<16x128xf32>
    %983 = arith.mulf %982, %974 : vector<16x128xf32>
    %984 = arith.addf %940, %983 : vector<16x128xf32>
    %c123_i32_515 = arith.constant 123 : i32
    %985 = tpu.dynamic_rotate %930 by %c123_i32_515 dim 1 : vector<16x128xf32>, i32 -> vector<16x128xf32>
    %c2_i32_516 = arith.constant 2 : i32
    %986 = arith.muli %arg1, %c2_i32_516 : i32
    %c1_i32_517 = arith.constant 1 : i32
    %987 = arith.addi %986, %c1_i32_517 : i32
    %c49_i32_518 = arith.constant 49 : i32
    %988 = arith.muli %987, %c49_i32_518 : i32
    %c35_i32_519 = arith.constant 35 : i32
    %989 = arith.addi %988, %c35_i32_519 : i32
    %c5_i32_520 = arith.constant 5 : i32
    %990 = arith.addi %989, %c5_i32_520 : i32
    %991 = arith.index_cast %990 : i32 to index
    %992 = memref.load %arg6[%991] : memref<392xf32, #tpu.memory_space<smem>>
    %993 = vector.broadcast %992 : f32 to vector<16x128xf32>
    %994 = arith.mulf %993, %985 : vector<16x128xf32>
    %995 = arith.addf %951, %994 : vector<16x128xf32>
    %c122_i32_521 = arith.constant 122 : i32
    %996 = tpu.dynamic_rotate %930 by %c122_i32_521 dim 1 : vector<16x128xf32>, i32 -> vector<16x128xf32>
    %c2_i32_522 = arith.constant 2 : i32
    %997 = arith.muli %arg1, %c2_i32_522 : i32
    %c1_i32_523 = arith.constant 1 : i32
    %998 = arith.addi %997, %c1_i32_523 : i32
    %c49_i32_524 = arith.constant 49 : i32
    %999 = arith.muli %998, %c49_i32_524 : i32
    %c35_i32_525 = arith.constant 35 : i32
    %1000 = arith.addi %999, %c35_i32_525 : i32
    %c6_i32_526 = arith.constant 6 : i32
    %1001 = arith.addi %1000, %c6_i32_526 : i32
    %1002 = arith.index_cast %1001 : i32 to index
    %1003 = memref.load %arg6[%1002] : memref<392xf32, #tpu.memory_space<smem>>
    %1004 = vector.broadcast %1003 : f32 to vector<16x128xf32>
    %1005 = arith.mulf %1004, %996 : vector<16x128xf32>
    %1006 = arith.addf %962, %1005 : vector<16x128xf32>
    %1007 = vector.extract_strided_slice %544 {offsets = [6, 0], sizes = [16, 128], strides = [1, 1]} : vector<24x128xf32> to vector<16x128xf32>
    %c2_i32_527 = arith.constant 2 : i32
    %1008 = arith.muli %arg1, %c2_i32_527 : i32
    %c1_i32_528 = arith.constant 1 : i32
    %1009 = arith.addi %1008, %c1_i32_528 : i32
    %c49_i32_529 = arith.constant 49 : i32
    %1010 = arith.muli %1009, %c49_i32_529 : i32
    %c42_i32_530 = arith.constant 42 : i32
    %1011 = arith.addi %1010, %c42_i32_530 : i32
    %c0_i32_531 = arith.constant 0 : i32
    %1012 = arith.addi %1011, %c0_i32_531 : i32
    %1013 = arith.index_cast %1012 : i32 to index
    %1014 = memref.load %arg6[%1013] : memref<392xf32, #tpu.memory_space<smem>>
    %1015 = vector.broadcast %1014 : f32 to vector<16x128xf32>
    %1016 = arith.mulf %1015, %1007 : vector<16x128xf32>
    %1017 = arith.addf %973, %1016 : vector<16x128xf32>
    %c127_i32_532 = arith.constant 127 : i32
    %1018 = tpu.dynamic_rotate %1007 by %c127_i32_532 dim 1 : vector<16x128xf32>, i32 -> vector<16x128xf32>
    %c2_i32_533 = arith.constant 2 : i32
    %1019 = arith.muli %arg1, %c2_i32_533 : i32
    %c1_i32_534 = arith.constant 1 : i32
    %1020 = arith.addi %1019, %c1_i32_534 : i32
    %c49_i32_535 = arith.constant 49 : i32
    %1021 = arith.muli %1020, %c49_i32_535 : i32
    %c42_i32_536 = arith.constant 42 : i32
    %1022 = arith.addi %1021, %c42_i32_536 : i32
    %c1_i32_537 = arith.constant 1 : i32
    %1023 = arith.addi %1022, %c1_i32_537 : i32
    %1024 = arith.index_cast %1023 : i32 to index
    %1025 = memref.load %arg6[%1024] : memref<392xf32, #tpu.memory_space<smem>>
    %1026 = vector.broadcast %1025 : f32 to vector<16x128xf32>
    %1027 = arith.mulf %1026, %1018 : vector<16x128xf32>
    %1028 = arith.addf %984, %1027 : vector<16x128xf32>
    %c126_i32_538 = arith.constant 126 : i32
    %1029 = tpu.dynamic_rotate %1007 by %c126_i32_538 dim 1 : vector<16x128xf32>, i32 -> vector<16x128xf32>
    %c2_i32_539 = arith.constant 2 : i32
    %1030 = arith.muli %arg1, %c2_i32_539 : i32
    %c1_i32_540 = arith.constant 1 : i32
    %1031 = arith.addi %1030, %c1_i32_540 : i32
    %c49_i32_541 = arith.constant 49 : i32
    %1032 = arith.muli %1031, %c49_i32_541 : i32
    %c42_i32_542 = arith.constant 42 : i32
    %1033 = arith.addi %1032, %c42_i32_542 : i32
    %c2_i32_543 = arith.constant 2 : i32
    %1034 = arith.addi %1033, %c2_i32_543 : i32
    %1035 = arith.index_cast %1034 : i32 to index
    %1036 = memref.load %arg6[%1035] : memref<392xf32, #tpu.memory_space<smem>>
    %1037 = vector.broadcast %1036 : f32 to vector<16x128xf32>
    %1038 = arith.mulf %1037, %1029 : vector<16x128xf32>
    %1039 = arith.addf %995, %1038 : vector<16x128xf32>
    %c125_i32_544 = arith.constant 125 : i32
    %1040 = tpu.dynamic_rotate %1007 by %c125_i32_544 dim 1 : vector<16x128xf32>, i32 -> vector<16x128xf32>
    %c2_i32_545 = arith.constant 2 : i32
    %1041 = arith.muli %arg1, %c2_i32_545 : i32
    %c1_i32_546 = arith.constant 1 : i32
    %1042 = arith.addi %1041, %c1_i32_546 : i32
    %c49_i32_547 = arith.constant 49 : i32
    %1043 = arith.muli %1042, %c49_i32_547 : i32
    %c42_i32_548 = arith.constant 42 : i32
    %1044 = arith.addi %1043, %c42_i32_548 : i32
    %c3_i32_549 = arith.constant 3 : i32
    %1045 = arith.addi %1044, %c3_i32_549 : i32
    %1046 = arith.index_cast %1045 : i32 to index
    %1047 = memref.load %arg6[%1046] : memref<392xf32, #tpu.memory_space<smem>>
    %1048 = vector.broadcast %1047 : f32 to vector<16x128xf32>
    %1049 = arith.mulf %1048, %1040 : vector<16x128xf32>
    %1050 = arith.addf %1006, %1049 : vector<16x128xf32>
    %c124_i32_550 = arith.constant 124 : i32
    %1051 = tpu.dynamic_rotate %1007 by %c124_i32_550 dim 1 : vector<16x128xf32>, i32 -> vector<16x128xf32>
    %c2_i32_551 = arith.constant 2 : i32
    %1052 = arith.muli %arg1, %c2_i32_551 : i32
    %c1_i32_552 = arith.constant 1 : i32
    %1053 = arith.addi %1052, %c1_i32_552 : i32
    %c49_i32_553 = arith.constant 49 : i32
    %1054 = arith.muli %1053, %c49_i32_553 : i32
    %c42_i32_554 = arith.constant 42 : i32
    %1055 = arith.addi %1054, %c42_i32_554 : i32
    %c4_i32_555 = arith.constant 4 : i32
    %1056 = arith.addi %1055, %c4_i32_555 : i32
    %1057 = arith.index_cast %1056 : i32 to index
    %1058 = memref.load %arg6[%1057] : memref<392xf32, #tpu.memory_space<smem>>
    %1059 = vector.broadcast %1058 : f32 to vector<16x128xf32>
    %1060 = arith.mulf %1059, %1051 : vector<16x128xf32>
    %1061 = arith.addf %1017, %1060 : vector<16x128xf32>
    %c123_i32_556 = arith.constant 123 : i32
    %1062 = tpu.dynamic_rotate %1007 by %c123_i32_556 dim 1 : vector<16x128xf32>, i32 -> vector<16x128xf32>
    %c2_i32_557 = arith.constant 2 : i32
    %1063 = arith.muli %arg1, %c2_i32_557 : i32
    %c1_i32_558 = arith.constant 1 : i32
    %1064 = arith.addi %1063, %c1_i32_558 : i32
    %c49_i32_559 = arith.constant 49 : i32
    %1065 = arith.muli %1064, %c49_i32_559 : i32
    %c42_i32_560 = arith.constant 42 : i32
    %1066 = arith.addi %1065, %c42_i32_560 : i32
    %c5_i32_561 = arith.constant 5 : i32
    %1067 = arith.addi %1066, %c5_i32_561 : i32
    %1068 = arith.index_cast %1067 : i32 to index
    %1069 = memref.load %arg6[%1068] : memref<392xf32, #tpu.memory_space<smem>>
    %1070 = vector.broadcast %1069 : f32 to vector<16x128xf32>
    %1071 = arith.mulf %1070, %1062 : vector<16x128xf32>
    %1072 = arith.addf %1028, %1071 : vector<16x128xf32>
    %c122_i32_562 = arith.constant 122 : i32
    %1073 = tpu.dynamic_rotate %1007 by %c122_i32_562 dim 1 : vector<16x128xf32>, i32 -> vector<16x128xf32>
    %c2_i32_563 = arith.constant 2 : i32
    %1074 = arith.muli %arg1, %c2_i32_563 : i32
    %c1_i32_564 = arith.constant 1 : i32
    %1075 = arith.addi %1074, %c1_i32_564 : i32
    %c49_i32_565 = arith.constant 49 : i32
    %1076 = arith.muli %1075, %c49_i32_565 : i32
    %c42_i32_566 = arith.constant 42 : i32
    %1077 = arith.addi %1076, %c42_i32_566 : i32
    %c6_i32_567 = arith.constant 6 : i32
    %1078 = arith.addi %1077, %c6_i32_567 : i32
    %1079 = arith.index_cast %1078 : i32 to index
    %1080 = memref.load %arg6[%1079] : memref<392xf32, #tpu.memory_space<smem>>
    %1081 = vector.broadcast %1080 : f32 to vector<16x128xf32>
    %1082 = arith.mulf %1081, %1073 : vector<16x128xf32>
    %1083 = arith.addf %1039, %1082 : vector<16x128xf32>
    %1084 = arith.addf %1072, %1083 : vector<16x128xf32>
    %1085 = arith.addf %1050, %1061 : vector<16x128xf32>
    %1086 = arith.addf %1084, %1085 : vector<16x128xf32>
    %1087 = vector.extract_strided_slice %1086 {offsets = [0, 0], sizes = [16, 16], strides = [1, 1]} : vector<16x128xf32> to vector<16x16xf32>
    %1088 = arith.index_cast %arg1 : i32 to index
    %1089 = memref.load %arg7[%1088] : memref<4xf32, #tpu.memory_space<smem>>
    %1090 = vector.broadcast %1089 : f32 to vector<16x16xf32>
    %1091 = arith.addf %1087, %1090 : vector<16x16xf32>
    %cst_568 = arith.constant 0.000000e+00 : f32
    %1092 = vector.broadcast %cst_568 : f32 to vector<16x16xf32>
    %1093 = arith.subf %1092, %1091 : vector<16x16xf32>
    %1094 = math.exp %1093 : vector<16x16xf32>
    %cst_569 = arith.constant 1.000000e+00 : f32
    %1095 = vector.broadcast %cst_569 : f32 to vector<16x16xf32>
    %1096 = arith.addf %1095, %1094 : vector<16x16xf32>
    %cst_570 = arith.constant 1.000000e+00 : f32
    %1097 = vector.broadcast %cst_570 : f32 to vector<16x16xf32>
    %1098 = arith.divf %1097, %1096 : vector<16x16xf32>
    %c0_571 = arith.constant 0 : index
    %c0_572 = arith.constant 0 : index
    %c0_573 = arith.constant 0 : index
    %c0_574 = arith.constant 0 : index
    %1099 = vector.load %arg8[%c0_571, %c0_572, %c0_573, %c0_574] : memref<1x1x16x16xf32, #tpu.memory_space<vmem>>, vector<1x1x16x16xf32>
    %1100 = vector.shape_cast %1099 : vector<1x1x16x16xf32> to vector<16x16xf32>
    %1101 = vector.shape_cast %1098 : vector<16x16xf32> to vector<1x1x16x16xf32>
    tpu.vector_store %arg8[%c0_571, %c0_572, %c0_573, %c0_574], %1101 {strides = array<i32>} : memref<1x1x16x16xf32, #tpu.memory_space<vmem>>, vector<1x1x16x16xf32>,
    return
  }
  func.func @transform_0(%arg0: i32, %arg1: i32) -> (i32, i32, i32, i32) {
    %c0_i32 = arith.constant 0 : i32
    %c0_i32_0 = arith.constant 0 : i32
    %c0_i32_1 = arith.constant 0 : i32
    return %arg0, %arg1, %c0_i32, %c0_i32_0 : i32, i32, i32, i32
  }
  func.func @transform_1(%arg0: i32, %arg1: i32) -> (i32, i32, i32, i32) {
    %c0_i32 = arith.constant 0 : i32
    %c0_i32_0 = arith.constant 0 : i32
    %c0_i32_1 = arith.constant 0 : i32
    return %arg0, %arg1, %c0_i32, %c0_i32_0 : i32, i32, i32, i32
  }
  func.func @transform_2(%arg0: i32, %arg1: i32) -> (i32, i32) {
    %c0_i32 = arith.constant 0 : i32
    %c0_i32_0 = arith.constant 0 : i32
    %c0_i32_1 = arith.constant 0 : i32
    return %c0_i32, %c0_i32_0 : i32, i32
  }
  func.func @transform_3(%arg0: i32, %arg1: i32) -> (i32, i32) {
    %c0_i32 = arith.constant 0 : i32
    %c0_i32_0 = arith.constant 0 : i32
    %c0_i32_1 = arith.constant 0 : i32
    return %c0_i32, %c0_i32_0 : i32, i32
  }
  func.func @transform_4(%arg0: i32, %arg1: i32) -> i32 {
    %c0_i32 = arith.constant 0 : i32
    %c0_i32_0 = arith.constant 0 : i32
    return %c0_i32 : i32
  }
  func.func @transform_5(%arg0: i32, %arg1: i32) -> i32 {
    %c0_i32 = arith.constant 0 : i32
    %c0_i32_0 = arith.constant 0 : i32
    return %c0_i32 : i32
  }
  func.func @transform_6(%arg0: i32, %arg1: i32) -> (i32, i32, i32, i32) {
    %c0_i32 = arith.constant 0 : i32
    %c0_i32_0 = arith.constant 0 : i32
    %c0_i32_1 = arith.constant 0 : i32
    return %arg0, %arg1, %c0_i32, %c0_i32_0 : i32, i32, i32, i32
  }
}

</mosaic_0001>

<bundles_post_ra>
// kernel: tpu_custom_call.1
= control target key start
LH: loop header
LB: loop body
LE: loop exit
PB: predicated region body
PF: predicated region fallthrough
CT: control target
= control target key end

     0   :  { %s4180_s0 = inlined_call_operand.hbm [shape: f32[2,4,16,16], index: 0, kind: input, shape index: {}]   ;;  %s4181_s1 = inlined_call_operand.hbm [shape: f32[2,4,16,16], index: 1, kind: input, shape index: {}]   ;;  %s4182_s2 = inlined_call_operand.vmem [shape: f32[24,16], index: 2, kind: input, shape index: {}]   ;;  %s4183_s3 = inlined_call_operand.vmem [shape: f32[16,128], index: 3, kind: input, shape index: {}]   ;;  %s4184_s4 = inlined_call_operand.vmem [shape: f32[392], index: 4, kind: input, shape index: {}]   ;;  %s4185_s5 = inlined_call_operand.vmem [shape: f32[4], index: 5, kind: input, shape index: {}]   ;;  %s4186_s6 = inlined_call_operand.hbm [shape: f32[2,4,16,16], index: 6, kind: output, shape index: {}]  }
   0x1   :  { %4222 = sst [smem:[#allocation62_spill]] %s4180_s0 }
   0x2   :  { %4223 = sst [smem:[#allocation63_spill]] %s4181_s1 }
   0x3   :  { %4224 = sst [smem:[#allocation64_spill]] %s4182_s2 }
   0x4   :  { %4225 = sst [smem:[#allocation65_spill]] %s4183_s3 }
   0x5   :  { %4226 = sst [smem:[#allocation66_spill]] %s4184_s4 }
   0x6   :  { %4227 = sst [smem:[#allocation67_spill]] %s4185_s5 }
   0x7   :  { %11 = vsyncpa [#allocation3], 0 }
   0x8   :  { %13 = vsyncpa [#allocation3 + $0x1], 0 }
   0x9   :  { %14 = vsyncpa [#allocation7], 0 }
   0xa   :  { %16 = vsyncpa [#allocation7 + $0x1], 0 }
   0xb   :  { %17 = vsyncpa [#allocation5], 0 }
   0xc   :  { %18 = vsyncpa [#allocation10], 0 }
   0xd   :  { %19 = vsyncpa [#allocation4], 0 }
   0xe   :  { %21 = vsyncpa [#allocation4 + $0x1], 0  ;;  %s2611_s21 = smov 0   ;;  %s2613_s22 = smov 0  }
   0xf   :  { %s2615_s23 = smov 0   ;;  %s2617_s24 = smov 0  }
  0x10   :  { %s2619_s25 = smov 0   ;;  %s2621_s26 = smov 0  }
  0x11   :  { %s2623_s27 = smov 0   ;;  %s2625_s28 = smov 0  }
  0x12 LB: > { %4228 = sst [smem:[#allocation17_spill]] %s2528_s21  ;;  %s2122_s29 = sadd.s32 4294967295, %s2556_s28   ;;  %s2556_s28 = sphi %s2625_s28, %s27_s28   ;;  %s2552_s27 = sphi %s2623_s27, %s4349_s27   ;;  %s2548_s26 = sphi %s2621_s26, %s4348_s26   ;;  %s2544_s25 = sphi %s2619_s25, %s4347_s25   ;;  %s2540_s24 = sphi %s2617_s24, %s4346_s24   ;;  %s2536_s23 = sphi %s2615_s23, %s4352_s23   ;;  %s2532_s22 = sphi %s2613_s22, %s4351_s22   ;;  %s2528_s21 = sphi %s2611_s21, %s4350_s21  }
  0x13   : > { %4229 = sst [smem:[#allocation18_spill]] %s2548_s26  ;;  %s2123_s30 = sadd.s32 4294967294, %s2556_s28  }
  0x14   : > { %4230 = sst [smem:[#allocation19_spill]] %s2552_s27  ;;  %p55_p0 = scmp.ne.s32.totalorder %s2536_s23, %s2532_s22 }
  0x15   : > { %p56_p1 = scmp.eq.s32.totalorder %s2556_s28, 0  ;;  %p61_p2 = scmp.ne.s32.totalorder %s2532_s22, %s2528_s21 }
  0x16   : > { %p2659_p3 = scmp.eq.s32.totalorder %s2122_s29, 0  ;;  %p199_p4 = scmp.eq.s32.totalorder %s2122_s29, 7 }
  0x17   : > { %p2663_p5 = por %p56_p1, %p55_p0  ;;  %p205_p6 = scmp.eq.s32.totalorder %s2123_s30, 7 }
  0x18   : > { %s4231_s8 = scalar_select %p2659_p3, 1, 0 }
  0x19   : > { %p2669_p7 = por %p2659_p3, %p61_p2  ;;  %p2673_p8 = por %p199_p4, %p55_p0 }
  0x1a   : > { %p2677_p9 = por %p205_p6, %p61_p2  ;;  %p2124_p10 = scmp.ge.s32.totalorder %s2556_s28, 1 }
  0x1b   : > { %s4233_s10 = scalar_select %p2669_p7, 1, 0 }
  0x1c   : > { %s4234_s11 = scalar_select %p2673_p8, 1, 0 }
  0x1d   : > { %s4235_s12 = scalar_select %p2677_p9, 1, 0 }
  0x1e   : > { %p212_p11 = scmp.lt.s32.totalorder %s2556_s28, 9  ;;  %s4237_s4 = sld [smem:[#allocation66_spill]] }
  0x1f   : > { %4236 = sst [smem:[#allocation20_spill]] %s4235_s12  ;;  %p2265_p13 = scmp.lt.s32.totalorder %s2556_s28, 8 }
  0x20   : > { %p2686_p12 = pnand %p2124_p10, %p212_p11  ;;  %s4239_s5 = sld [smem:[#allocation67_spill]] }
  0x21   : > { %p2698_p1 = pnand %p2265_p13, %p2663_p5 }
  0x22   : > { %s4238_s16 = scalar_select %p2686_p12, 1, 0 }
  0x23   : > { %p2245_p0 = pneg %p2686_p12 }
  0x24   : > { %s231_s15 = sshll.u32 %s4237_s4, 4  ;;  %s232_s15 = int_to_ptr.vmem [resolvable:$true] %s231_s15 }
  0x25   : > { %s4240_s20 = scalar_select %p2698_p1, 1, 0 }
  0x26   : > { %s242_s19 = sshll.u32 %s4239_s5, 4  ;;  %p2704_p2 = pnand %p2245_p0, %p2659_p3  ;;  %s243_s19 = int_to_ptr.vmem [resolvable:$true] %s242_s19 }
  0x27   : > { %s2356_s30 = scalar_lea.vmem %s232_s15, 64  ;;  %p2364_p9 = scmp.lt.s32.totalorder %s232_s15, %s232_s15 }
  0x28   : > { %p2357_p4 = scmp.ne.s32.totalorder %s232_s15, %s2356_s30  ;;  %p2358_p6 = pneg %p2704_p2 }
  0x29   : > { %p2365_p8 = scmp.lt.s32.totalorder %s2356_s30, %s2356_s30 }
  0x2a   : > { %p2359_p10 = pnand %p2358_p6, %p2357_p4 }
  0x2b   : > { %p2366_p7 = por %p2365_p8, %p2364_p9 }
  0x2c   : > { %p2360_p11 = pneg %p2359_p10 }
  0x2e   : > { %p2367_p5 = pnand %p2366_p7, %p2360_p11 }
  0x30   : > { %2370 = shalt.err (!%p2367_p5)
}
  0x31   : > { %s2558_s9 = smov [#allocation8]   ;;  %s2371_s13 = scalar_lea.vmem %s243_s19, 16 }
  0x32   : > { %2248 = dma.vmem_to_smem (!%p2704_p2), %s232_s15, 64, %s2558_s9, [#allocation5]  }
  0x33   : > { %p2372_p13 = scmp.ne.s32.totalorder %s243_s19, %s2371_s13  ;;  %p2379_p12 = scmp.lt.s32.totalorder %s243_s19, %s243_s19 }
  0x34   : > { %p2380_p1 = scmp.lt.s32.totalorder %s2371_s13, %s2371_s13 }
  0x35   : > { %p2374_p0 = pnand %p2372_p13, %p2358_p6 }
  0x36   : > { %p2381_p4 = por %p2380_p1, %p2379_p12 }
  0x37   : > { %p2375_p3 = pneg %p2374_p0 }
  0x39   : > { %p2382_p10 = pnand %p2381_p4, %p2375_p3 }
  0x3b   : > { %2385 = shalt.err (!%p2382_p10)
}
  0x3c   : > { %s2559_s14 = smov [#allocation9]   ;;  %s36_s15 = sadd.s32 1, %s2548_s26 }
  0x3d   : > { %2251 = dma.vmem_to_smem (!%p2704_p2), %s243_s19, 16, %s2559_s14, [#allocation10]  }
  0x3e   : > { %s39_s17 = sadd.s32 1, %s2552_s27  ;;  %p37_p7 = scmp.ge.s32.totalorder %s36_s15, 4 }
  0x3f   : > { %s2717_s18 = sand.u32 1, %s2536_s23   ;;  %s2129_s9 = sshll.u32 %s2548_s26, 1 }
  0x40   : > { %s4197_s30 = sshll.u32 %s2717_s18, 4  ;;  %s4354_s15 = smov (%p37_p7, %s36_s15), 0 }
  0x41   : > { %4242 = sst [smem:[#allocation21_spill]] %s4354_s15  ;;  %s4356_s17 = smov (!%p37_p7, %s39_s17), %s2552_s27 }
  0x42   : > { %s44_s29 = ssub.s32 %s2548_s26, %s4354_s15  ;;  %p41_p3 = scmp.ge.s32.totalorder %s4356_s17, 2 }
  0x43   : > { %s2130_s19 = sshll.u32 %s2552_s27, 3  ;;  %s257_s13 = scalar_lea.vmem [#allocation2], %s4197_s30 }
  0x44   : > { %s266_s14 = sshll.u32 %s257_s13, 4  ;;  %s4358_s17 = smov (%p41_p3, %s4356_s17), 0  ;;  %s2733_s14 = int_to_ptr.vmem [resolvable:$true] %s266_s14 }
  0x45   : > { %4243 = sst [smem:[#allocation22_spill]] %s4358_s17  ;;  %s2731_s7 = sadd.s32 %s2130_s19, %s2129_s9 }
  0x46   : > { %s43_s4 = ssub.s32 %s2552_s27, %s4358_s17  ;;  %s4198_s5 = sshll.u32 %s2731_s7, 7 }
  0x47   : > { %s45_s15 = sor.u32 %s44_s29, %s43_s4  ;;  %s4244_s0 = sld [smem:[#allocation62_spill]] }
  0x48   : > { %p46_p8 = scmp.eq.s32.totalorder %s45_s15, 0  ;;  %s4245_s9 = sadd.s32 1, %s2536_s23 }
  0x49   : > { %s254_s13 = scalar_lea.sflag [#allocation3], %s2717_s18  ;;  %p4247_p12 = scmp.ne.s32.totalorder %s4240_s20, 0 }
  0x4a   : > { %s2748_s19 = scalar_select %p46_p8, %s2536_s23, %s4245_s9  }
  0x4b   : > { %p2388_p1 = pneg %p4247_p12 }
  0x4c   : > { %4246 = sst [smem:[#allocation23_spill]] %s2748_s19 }
  0x4d   : > { %s2743_s21 = scalar_lea.hbm %s4244_s0, %s4198_s5  ;;  %s2391_s12 = scalar_lea.hbm %s4244_s0, 2048 }
  0x4e   : > { %s2386_s30 = scalar_lea.hbm %s2743_s21, 256  ;;  %p2392_p11 = scmp.lt.u32.totalorder %s2743_s21, %s4244_s0 }
  0x4f   : > { %p2387_p9 = scmp.ne.s32.totalorder %s2743_s21, %s2386_s30  ;;  %p2393_p5 = scmp.lt.u32.totalorder %s2391_s12, %s2386_s30 }
  0x50   : > { %p2395_p0 = scmp.lt.u32.totalorder %s2386_s30, %s2743_s21 }
  0x51   : > { %p2389_p2 = pnand %p2388_p1, %p2387_p9  ;;  %p2394_p13 = por %p2393_p5, %p2392_p11 }
  0x53   : > { %p2390_p6 = pneg %p2389_p2  ;;  %p2396_p4 = por %p2395_p0, %p2394_p13 }
  0x55   : > { %p2397_p10 = pnand %p2396_p4, %p2390_p6 }
  0x57   : > { %2400 = shalt.err (!%p2397_p10)
}
  0x58   : > { %s2401_s15 = scalar_lea.vmem %s2733_s14, 256  ;;  %s2560_s9 = smov [#allocation2]  }
  0x59   : > { %p2402_p7 = scmp.ne.s32.totalorder %s2733_s14, %s2401_s15  ;;  %s2406_s4 = sshll.u32 %s2560_s9, 4  ;;  %s2407_s4 = int_to_ptr.vmem [resolvable:$false] %s2406_s4 }
  0x5a   : > { %s2408_s5 = scalar_lea.vmem %s2407_s4, 512  ;;  %p2409_p9 = scmp.lt.s32.totalorder %s2733_s14, %s2407_s4 }
  0x5b   : > { %p2404_p3 = pnand %p2402_p7, %p2388_p1  ;;  %p2410_p2 = scmp.lt.s32.totalorder %s2408_s5, %s2401_s15 }
  0x5d   : > { %p2405_p8 = pneg %p2404_p3  ;;  %p2411_p11 = por %p2410_p2, %p2409_p9 }
  0x5f   : > { %p2412_p5 = pnand %p2411_p11, %p2405_p8 }
  0x61   : > { %2415 = shalt.err (!%p2412_p5)
}
  0x62   : > { %s2561_s30 = smov 128   ;;  %s2562_s26 = smov 8  }
  0x63   : > { %2255 = dma.hbm_to_vmem [thread:$0]  (!%p4247_p12), %s2743_s21, 256, %s2733_s14, %s254_s13, %s2561_s30, %s2561_s30, %s2562_s26  }
  0x64   : > { %s4248_s12 = sshll.u32 %s2731_s7, 7  ;;  %s4249_s1 = sld [smem:[#allocation63_spill]] }
  0x65   : > { %s4250_s4 = sshll.u32 %s2717_s18, 4  ;;  %s277_s17 = scalar_lea.sflag [#allocation7], %s2717_s18 }
  0x66   : > { %s280_s5 = scalar_lea.vmem [#allocation6], %s4250_s4 }
  0x67   : > { %s289_s0 = sshll.u32 %s280_s5, 4  ;;  %s2790_s0 = int_to_ptr.vmem [resolvable:$true] %s289_s0 }
  0x6a   : > { %s2786_s9 = scalar_lea.hbm %s4249_s1, %s4248_s12  ;;  %s2421_s14 = scalar_lea.hbm %s4249_s1, 2048 }
  0x6b   : > { %s2416_s27 = scalar_lea.hbm %s2786_s9, 256  ;;  %p2422_p4 = scmp.lt.u32.totalorder %s2786_s9, %s4249_s1 }
  0x6c   : > { %p2417_p6 = scmp.ne.s32.totalorder %s2786_s9, %s2416_s27  ;;  %p2423_p10 = scmp.lt.u32.totalorder %s2421_s14, %s2416_s27 }
  0x6d   : > { %p2425_p3 = scmp.lt.u32.totalorder %s2416_s27, %s2786_s9 }
  0x6e   : > { %p2419_p13 = pnand %p2417_p6, %p2388_p1  ;;  %p2424_p7 = por %p2423_p10, %p2422_p4 }
  0x70   : > { %p2420_p0 = pneg %p2419_p13  ;;  %p2426_p8 = por %p2425_p3, %p2424_p7 }
  0x72   : > { %p2427_p9 = pnand %p2426_p8, %p2420_p0 }
  0x74   : > { %2430 = shalt.err (!%p2427_p9)
}
  0x75   : > { %s2431_s29 = scalar_lea.vmem %s2790_s0, 256  ;;  %s2563_s15 = smov [#allocation6]  }
  0x76   : > { %p2432_p2 = scmp.ne.s32.totalorder %s2790_s0, %s2431_s29  ;;  %s2436_s4 = sshll.u32 %s2563_s15, 4  ;;  %s2437_s4 = int_to_ptr.vmem [resolvable:$false] %s2436_s4 }
  0x77   : > { %s2438_s5 = scalar_lea.vmem %s2437_s4, 512  ;;  %p2439_p6 = scmp.lt.s32.totalorder %s2790_s0, %s2437_s4 }
  0x78   : > { %p2434_p11 = pnand %p2432_p2, %p2388_p1  ;;  %p2440_p13 = scmp.lt.s32.totalorder %s2438_s5, %s2431_s29 }
  0x7a   : > { %p2435_p5 = pneg %p2434_p11  ;;  %p2441_p4 = por %p2440_p13, %p2439_p6 }
  0x7c   : > { %p2442_p10 = pnand %p2441_p4, %p2435_p5 }
  0x7e   : > { %2445 = shalt.err (!%p2442_p10)
}
  0x7f   : > { %2258 = dma.hbm_to_vmem [thread:$0]  (!%p4247_p12), %s2786_s9, 256, %s2790_s0, %s277_s17, %s2561_s30, %s2561_s30, %s2562_s26  }
  0x80   : > { %p4251_p1 = scmp.ne.s32.totalorder %s4238_s16, 0 }
  0x82   : > { %301 = sbr.rel (%p4251_p1) target bundleno = 1094 (0x446), region = 44 }
  0x89   : > { %s2824_s27 = sand.u32 1, %s2532_s22   ;;  %p4252_p0 = scmp.ne.s32.totalorder %s4233_s10, 0 }
  0x8a   : > { %s2827_s21 = sshll.u32 %s2824_s27, 4  ;;  %s304_s20 = scalar_lea.sflag [#allocation3], %s2824_s27 }
  0x8b   : > { %s307_s7 = scalar_lea.vmem [#allocation2], %s2827_s21 }
  0x8c   : > { %2507 = dma.done.wait (%p4252_p0), %s304_s20, 256  }
  0x8d   : > { %2509 = vsyncadd (%p4252_p0), %s304_s20, 4294967040  ;;  %s313_s0 = scalar_lea.sflag [#allocation7], %s2824_s27  ;;  %s316_s16 = scalar_lea.vmem [#allocation6], %s2827_s21 }
  0x8e   : > { %2511 = dma.done.wait (%p4252_p0), %s313_s0, 256  }
  0x8f   : > { %2513 = vsyncadd (%p4252_p0), %s313_s0, 4294967040  ;;  %p4253_p12 = scmp.ne.s32.totalorder %s4231_s8, 0 }
  0x91   : > { %2515 = dma.done.wait (%p4253_p12), [#allocation5], 64  }
  0x92   : > { %2517 = vsyncadd (%p4253_p12), [#allocation5], 4294967232 }
  0x93   : > { %2519 = dma.done.wait (%p4253_p12), [#allocation10], 16  }
  0x94   : > { %2521 = vsyncadd (%p4253_p12), [#allocation10], 4294967280 }
  0x95   : > { %329 = sfence }
  0x96   : > { %s4254_s3 = sld [smem:[#allocation65_spill]]  ;;  %v364_v2 = vld [vmem:[%s307_s7] sm:$0xff]  ;;  %vm368_vm0 = vcmask 130048   ;;  %v365_v5 = vld [vmem:[%s307_s7 + $0x8] sm:$0xff]  ;;  %v2564_v7 = vmov 0.0|0.0   ;;  %vm2565_vm1 = vmmov 0  }
  0x97   : > { %2181 = vmatprep.mubr.msk.f32.mxu1 %vm368_vm0, %v364_v2  ;;  %v366_v4 = vld [vmem:[%s316_s16] sm:$0xff]  ;;  %v367_v6 = vld [vmem:[%s316_s16 + $0x8] sm:$0xff]  ;;  %v2566_v8 = vmov 0.0   ;;  %s4255_s2 = sld [smem:[#allocation64_spill]]  ;;  %s2881_s29 = smul.u32 98, %s2540_s24  ;;  %vm613_vm2 = vcmask 1046528  }
  0x98   : > { %2201 = vmatprep.mubr.msk.f32.mxu0 %vm368_vm0, %v366_v4  ;;  %vm708_vm3 = vcmask 1045504   ;;  %vm800_vm4 = vcmask 1044480   ;;  %s4220_s10 = smov 126   ;;  %s4214_s8 = smov 127   ;;  %vm892_vm5 = vcmask 1043456   ;;  %vm984_vm6 = vcmask 1042432  }
  0x99   : > { %s604_s15 = sadd.s32 7, %s2881_s29  ;;  %s699_s4 = sadd.s32 14, %s2881_s29  ;;  %vm1076_vm7 = vcmask 1041408  }
  0x9a   : > { %s605_s5 = sld [smem:[#allocation8 + %s604_s15]]  ;;  %s791_s20 = sadd.s32 21, %s2881_s29 }
  0x9b   : > { %s883_s7 = sadd.s32 28, %s2881_s29  ;;  %s975_s0 = sadd.s32 35, %s2881_s29 }
  0x9c   : > { %v362_v0 = vld [vmem:[%s4254_s3] sm:$0xff]  ;;  %v363_v1 = vld [vmem:[%s4254_s3 + $0x8] sm:$0xff]  ;;  %s700_s16 = sld [smem:[#allocation8 + %s699_s4]]  ;;  %s4209_s26 = sshll.u32 %s2540_s24, 1 }
  0x9d   : > { %v2217_v3 = vpack.c.bf16 %v363_v1, %v362_v0  ;;  %v359_v15 = vld [vmem:[%s4255_s2] sm:$0xff]  ;;  %v360_v16 = vld [vmem:[%s4255_s2 + $0x8] sm:$0xff]  ;;  %v361_v17 = vld [vmem:[%s4255_s2 + $0x10] sm:$0xff]  ;;  %s792_s17 = sld [smem:[#allocation8 + %s791_s20]]  ;;  %s4218_s9 = smov 125  }
  0x9e   : > { %s884_s18 = sld [smem:[#allocation8 + %s883_s7]]  ;;  %s1321_s14 = sadd.s32 1, %s4209_s26 }
  0x9f   : > { %2218 = vmatprep.subr.bf16.mxu1 %v2217_v3  ;;  %2225 = vmatprep.subr.bf16.mxu0 %v2217_v3  ;;  %s976_s30 = sld [smem:[#allocation8 + %s975_s0]]  ;;  %s1067_s13 = sadd.s32 42, %s2881_s29 }
  0xa0   : > { %2220 = vmatpush3.bf16.msra.mxu1 %v2217_v3  ;;  %2227 = vmatpush3.bf16.msra.mxu0 %v2217_v3  ;;  %v2888_v18 = vstv %s605_s5  ;;  %s4216_s12 = smov 124   ;;  %s2976_s15 = smul.u32 49, %s1321_s14 }
  0xa1   : > { %2221 = vmatprep.subr.bf16.mxu1 %v2564_v7  ;;  %2228 = vmatprep.subr.bf16.mxu0 %v2564_v7  ;;  %s2993_s4 = sld [smem:[#allocation8 + %s1067_s13]]  ;;  %s4212_s5 = smov 123  }
  0xa2   : > { %v2894_v21 = vstv %s700_s16  ;;  %s1395_s20 = sadd.s32 7, %s2976_s15  ;;  %s1489_s7 = sadd.s32 14, %s2976_s15 }
  0xa3   : > { %2182 = vmatmul.mubr.msk.f32.vlgmr.msra.gmra.mrb[0].mxu1 %vm368_vm0, %v365_v5  ;;  %2202 = vmatmul.mubr.msk.f32.vlgmr.msra.gmra.mrb[0].mxu0 %vm368_vm0, %v367_v6  ;;  %v2903_v26 = vstv %s792_s17  ;;  %s1580_s0 = sadd.s32 21, %s2976_s15  ;;  %s3037_s16 = sld [smem:[#allocation8 + %s1395_s20]] }
  0xa4   : > { %2188 = vmatprep.mubr.msk.f32.mxu1 %vm2565_vm1, %v2566_v8  ;;  %2208 = vmatprep.mubr.msk.f32.mxu0 %vm2565_vm1, %v2566_v8  ;;  %v2905_v27 = vstv %s884_s18  ;;  %s4210_s17 = smov 122   ;;  %s3051_s18 = sld [smem:[#allocation8 + %s1489_s7]] }
  0xa5   : > { %v2907_v28 = vstv %s976_s30  ;;  %s1671_s30 = sadd.s32 28, %s2976_s15  ;;  %s3061_s14 = sld [smem:[#allocation8 + %s1580_s0]] }
  0xa6   : > { %s3075_s13 = sld [smem:[#allocation8 + %s1671_s30]]  ;;  %s1853_s7 = sadd.s32 42, %s2976_s15 }
  0xa7   : > { %s3136_s0 = sld [smem:[#allocation8 + %s1853_s7]]  ;;  %s670_s26 = sadd.s32 11, %s2881_s29 }
  0xa8   : > { %s876_s1 = sadd.s32 27, %s2881_s29  ;;  %s968_s3 = sadd.s32 34, %s2881_s29 }
  0xa9   : > { %p4341_p3 = scmp.ne.s32.totalorder %s4234_s11, 0 }
 0x176   : > { %v2183_v9 = vpop.f32.mrb[0].mxu1  ;;  %v2203_v10 = vpop.f32.mrb[0].mxu0 }
 0x177   : > { %v441_v11 = vpop.f32.mrb[1].mxu1  ;;  %v1231_v12 = vpop.f32.mrb[1].mxu0 }
 0x178   : > { %v2222_v13 = vpack.c.bf16 %v2183_v9, %v441_v11  ;;  %v2229_v14 = vpack.c.bf16 %v2203_v10, %v1231_v12 }
 0x17a   : > { %2223 = vmatpush3.bf16.msra.mxu1 %v2222_v13  ;;  %2230 = vmatpush3.bf16.msra.mxu0 %v2229_v14 }
 0x17d   : > { %2189 = vmatmul.mubr.msk.f32.vlgmr.msra.gmra.mrb[2].mxu1 %vm368_vm0, %v359_v15  ;;  %2209 = vmatmul.mubr.msk.f32.vlgmr.msra.gmra.mrb[2].mxu0 %vm368_vm0, %v359_v15 }
 0x17e   : > { %2191 = vmatprep.mubr.msk.f32.mxu1 %vm2565_vm1, %v2566_v8  ;;  %2211 = vmatprep.mubr.msk.f32.mxu0 %vm2565_vm1, %v2566_v8 }
 0x181   : > { %2192 = vmatmul.mubr.msk.f32.gmra.mrb[4].mxu1 %vm368_vm0, %v360_v16  ;;  %2212 = vmatmul.mubr.msk.f32.gmra.mrb[4].mxu0 %vm368_vm0, %v360_v16 }
 0x182   : > { %2194 = vmatprep.mubr.msk.f32.mxu1 %vm2565_vm1, %v2566_v8  ;;  %2214 = vmatprep.mubr.msk.f32.mxu0 %vm2565_vm1, %v2566_v8 }
 0x185   : > { %2195 = vmatmul.mubr.msk.f32.gmra.mrb[6].mxu1 %vm368_vm0, %v361_v17  ;;  %2215 = vmatmul.mubr.msk.f32.gmra.mrb[6].mxu0 %vm368_vm0, %v361_v17 }
 0x250   : > { %v2890_v19 = vpop.f32.mrb[2].mxu1  ;;  %v2892_v20 = vpop.f32.mrb[2].mxu0 }
 0x251   : > { %4256 = vst [vmem:[#allocation24_spill] sm:$0xff] %v2892_v20  ;;  %553 = vrot.lane.b32.xlu1 %v2890_v19, %s4220_s10  ;;  %544 = vrot.lane.b32.xlu0 %v2890_v19, %s4214_s8  ;;  %v2190_v22 = vpop.f32.mrb[3].mxu1  ;;  %v2210_v23 = vpop.f32.mrb[3].mxu0  ;;  %v607_v24 = vmul.f32 %v2888_v18, %v2890_v19  ;;  %v626_v25 = vrot.slane %v2890_v19, 1  ;;  %v718_v29 = vrot.slane %v2890_v19, 2  ;;  %v810_v30 = vrot.slane %v2890_v19, 3 }
 0x252   : > { %v902_v31 = vrot.slane %v2890_v19, 4  ;;  %v994_v32 = vrot.slane %v2890_v19, 5  ;;  %v1086_v36 = vrot.slane %v2890_v19, 6  ;;  %v1416_v37 = vrot.slane %v2892_v20, 1 }
 0x253   : > { %v614_v35 = vrot.slane %v607_v24, 1  ;;  %v2922_v38 = vmul.f32 %v2894_v21, %v2890_v19  ;;  %v1507_v48 = vrot.slane %v2892_v20, 2  ;;  %v2963_v58 = vmul.f32 %v2903_v26, %v2890_v19 }
 0x254   : > { %v2914_v33 = vpop.f32.mrb[4].mxu1  ;;  %v2916_v34 = vpop.f32.mrb[4].mxu0  ;;  %v1598_v12 = vrot.slane %v2892_v20, 3 }
 0x255   : > { %4257 = vst [vmem:[#allocation25_spill] sm:$0xff] %v2916_v34  ;;  %562 = vrot.lane.b32.xlu0 %v2890_v19, %s4218_s9  ;;  %555 = vrot.lane.b32.xlu1 %v2914_v33, %s4220_s10  ;;  %v2193_v39 = vpop.f32.mrb[5].mxu1  ;;  %v2213_v40 = vpop.f32.mrb[5].mxu0  ;;  %v627_v41 = vrot.slane %v2914_v33, 1  ;;  %v719_v42 = vrot.slane %v2914_v33, 2  ;;  %v811_v43 = vrot.slane %v2914_v33, 3  ;;  %v608_v44 = vmul.f32 %v2888_v18, %v2914_v33 }
 0x256   : > { %v903_v45 = vrot.slane %v2914_v33, 4  ;;  %v995_v46 = vrot.slane %v2914_v33, 5  ;;  %v1087_v47 = vrot.slane %v2914_v33, 6  ;;  %v1417_v8 = vrot.slane %v2916_v34, 1 }
 0x257   : > { %v2940_v49 = vsel %vm613_vm2, %v626_v25, %v627_v41  ;;  %v2943_v50 = vsel %vm708_vm3, %v718_v29, %v719_v42  ;;  %v2946_v51 = vsel %vm800_vm4, %v810_v30, %v811_v43  ;;  %v615_v52 = vrot.slane %v608_v44, 1 }
 0x258   : > { %v2948_v53 = vpop.f32.mrb[6].mxu1  ;;  %v2950_v54 = vpop.f32.mrb[6].mxu0  ;;  %v2953_v55 = vsel %vm892_vm5, %v902_v31, %v903_v45  ;;  %v2956_v56 = vsel %vm984_vm6, %v994_v32, %v995_v46  ;;  %v2959_v57 = vsel %vm1076_vm7, %v1086_v36, %v1087_v47  ;;  %v3010_v14 = vsel %vm613_vm2, %v1416_v37, %v1417_v8 }
 0x259   : > { %571 = vrot.lane.b32.xlu0 %v2890_v19, %s4216_s12  ;;  %564 = vrot.lane.b32.xlu1 %v2914_v33, %s4218_s9  ;;  %v2196_v59 = vpop.f32.mrb[7].mxu1  ;;  %v629_v60 = vrot.slane %v2948_v53, 1  ;;  %v721_v61 = vrot.slane %v2948_v53, 2  ;;  %v813_v62 = vrot.slane %v2948_v53, 3  ;;  %v2974_v63 = vsel %vm613_vm2, %v614_v35, %v615_v52  ;;  %v2216_v0 = vpop.f32.mrb[7].mxu0 }
 0x25a   : > { %v905_v1 = vrot.slane %v2948_v53, 4  ;;  %v609_v2 = vmul.f32 %v2888_v18, %v2948_v53  ;;  %v997_v3 = vrot.slane %v2948_v53, 5  ;;  %v1089_v4 = vrot.slane %v2948_v53, 6 }
 0x25b   : > { %v2984_v5 = vsel %vm613_vm2, %v627_v41, %v629_v60  ;;  %v2987_v6 = vsel %vm708_vm3, %v719_v42, %v721_v61  ;;  %v2990_v7 = vsel %vm800_vm4, %v811_v43, %v813_v62  ;;  %v1419_v15 = vrot.slane %v2950_v54, 1 }
 0x25c   : > { %v2996_v9 = vsel %vm892_vm5, %v903_v45, %v905_v1  ;;  %v617_v10 = vrot.slane %v609_v2, 1  ;;  %v2999_v11 = vsel %vm984_vm6, %v995_v46, %v997_v3  ;;  %v3007_v13 = vsel %vm1076_vm7, %v1087_v47, %v1089_v4 }
 0x25d   : > { %582 = vrot.lane.b32.xlu0 %v2890_v19, %s4212_s5  ;;  %573 = vrot.lane.b32.xlu1 %v2914_v33, %s4216_s12  ;;  %v703_v16 = vmul.f32 %v2894_v21, %v2914_v33  ;;  %v709_v18 = vrot.slane %v2922_v38, 2  ;;  %v704_v22 = vmul.f32 %v2894_v21, %v2948_v53  ;;  %v1508_v23 = vrot.slane %v2916_v34, 2 }
 0x25e   : > { %v3017_v17 = vsel %vm613_vm2, %v615_v52, %v617_v10  ;;  %v3025_v24 = vsel %vm613_vm2, %v1417_v8, %v1419_v15  ;;  %v1510_v29 = vrot.slane %v2950_v54, 2  ;;  %v795_v30 = vmul.f32 %v2903_v26, %v2914_v33 }
 0x25f   : > { %v710_v25 = vrot.slane %v703_v16, 2  ;;  %v712_v31 = vrot.slane %v704_v22, 2  ;;  %v3032_v32 = vsel %vm708_vm3, %v1507_v48, %v1508_v23  ;;  %v801_v21 = vrot.slane %v2963_v58, 3 }
 0x260   : > { %v886_v35 = vmul.f32 %v2905_v27, %v2890_v19  ;;  %v3047_v37 = vsel %vm708_vm3, %v1508_v23, %v1510_v29  ;;  %v802_v38 = vrot.slane %v795_v30, 3  ;;  %v796_v39 = vmul.f32 %v2903_v26, %v2948_v53 }
 0x261   : > { %593 = vrot.lane.b32.xlu0 %v2890_v19, %s4210_s17  ;;  %584 = vrot.lane.b32.xlu1 %v2914_v33, %s4212_s5  ;;  %v3044_v36 = vsel %vm708_vm3, %v709_v18, %v710_v25  ;;  %v3055_v40 = vsel %vm708_vm3, %v710_v25, %v712_v31  ;;  %v1599_v41 = vrot.slane %v2916_v34, 3  ;;  %v1601_v42 = vrot.slane %v2950_v54, 3 }
 0x262   : > { %v887_v43 = vmul.f32 %v2905_v27, %v2914_v33  ;;  %v3064_v44 = vsel %vm800_vm4, %v801_v21, %v802_v38  ;;  %v804_v45 = vrot.slane %v796_v39, 3  ;;  %v888_v26 = vmul.f32 %v2905_v27, %v2948_v53 }
 0x263   : > { %4258 = vst [vmem:[#allocation26_spill] sm:$0xff] %v3064_v44  ;;  %v1069_v46 = vstv %s2993_s4  ;;  %v3070_v47 = vsel %vm800_vm4, %v1598_v12, %v1599_v41  ;;  %v3073_v48 = vsel %vm800_vm4, %v1599_v41, %v1601_v42  ;;  %v893_v52 = vrot.slane %v886_v35, 4  ;;  %s1762_s4 = sadd.s32 35, %s2976_s15 }
 0x264   : > { %v894_v58 = vrot.slane %v887_v43, 4  ;;  %v3082_v27 = vsel %vm800_vm4, %v802_v38, %v804_v45  ;;  %v896_v59 = vrot.slane %v888_v26, 4  ;;  %v1689_v60 = vrot.slane %v2892_v20, 4  ;;  %s3115_s20 = sld [smem:[#allocation8 + %s1762_s4]] }
 0x265   : > { %1329 = vrot.lane.b32.xlu0 %v2892_v20, %s4214_s8  ;;  %595 = vrot.lane.b32.xlu1 %v2914_v33, %s4210_s17  ;;  %4259 = vst [vmem:[#allocation27_spill] sm:$0xff] %v3082_v27  ;;  %v1690_v61 = vrot.slane %v2916_v34, 4  ;;  %v1692_v0 = vrot.slane %v2950_v54, 4  ;;  %v978_v1 = vmul.f32 %v2907_v28, %v2890_v19  ;;  %v979_v2 = vmul.f32 %v2907_v28, %v2914_v33 }
 0x266   : > { %v3087_v62 = vsel %vm892_vm5, %v893_v52, %v894_v58  ;;  %v3096_v3 = vsel %vm892_vm5, %v894_v58, %v896_v59  ;;  %v980_v8 = vmul.f32 %v2907_v28, %v2948_v53  ;;  %v1780_v10 = vrot.slane %v2892_v20, 5 }
 0x267   : > { %v3099_v4 = vsel %vm892_vm5, %v1689_v60, %v1690_v61  ;;  %v3105_v12 = vsel %vm892_vm5, %v1690_v61, %v1692_v0  ;;  %v985_v15 = vrot.slane %v978_v1, 5  ;;  %v986_v16 = vrot.slane %v979_v2, 5 }
 0x268   : > { %4260 = vst [vmem:[#allocation28_spill] sm:$0xff] %v3099_v4  ;;  %4261 = vst [vmem:[#allocation29_spill] sm:$0xff] %v3105_v12  ;;  %v1397_v18 = vstv %s3037_s16  ;;  %v988_v22 = vrot.slane %v980_v8, 5  ;;  %v1781_v23 = vrot.slane %v2916_v34, 5  ;;  %v1783_v28 = vrot.slane %v2950_v54, 5  ;;  %s575_s16 = sadd.s32 4, %s2881_s29 }
 0x269   : > { %1340 = vrot.lane.b32.xlu0 %v2892_v20, %s4220_s10  ;;  %1331 = vrot.lane.b32.xlu1 %v2916_v34, %s4214_s8  ;;  %v1491_v25 = vstv %s3051_s18  ;;  %v3119_v29 = vsel %vm984_vm6, %v985_v15, %v986_v16  ;;  %v1070_v30 = vmul.f32 %v1069_v46, %v2890_v19  ;;  %v1071_v31 = vmul.f32 %v1069_v46, %v2914_v33  ;;  %s637_s18 = sadd.s32 8, %s2881_s29  ;;  %s576_s30 = sld [smem:[#allocation8 + %s575_s16]] }
 0x26a   : > { %v1582_v21 = vstv %s3061_s14  ;;  %v3125_v35 = vsel %vm984_vm6, %v986_v16, %v988_v22  ;;  %v3128_v38 = vsel %vm984_vm6, %v1780_v10, %v1781_v23  ;;  %v3131_v39 = vsel %vm984_vm6, %v1781_v23, %v1783_v28  ;;  %s681_s14 = sadd.s32 12, %s2881_s29  ;;  %s638_s4 = sld [smem:[#allocation8 + %s637_s18]] }
 0x26b   : > { %4262 = vst [vmem:[#allocation30_spill] sm:$0xff] %v3128_v38  ;;  %4263 = vst [vmem:[#allocation31_spill] sm:$0xff] %v3131_v39  ;;  %v1072_v41 = vmul.f32 %v1069_v46, %v2948_v53  ;;  %v1077_v42 = vrot.slane %v1070_v30, 6  ;;  %v1078_v43 = vrot.slane %v1071_v31, 6  ;;  %v1871_v45 = vrot.slane %v2892_v20, 6  ;;  %s3465_s7 = sld [smem:[#allocation8 + %s681_s14]] }
 0x26c   : > { %v1673_v26 = vstv %s3075_s13  ;;  %v1872_v58 = vrot.slane %v2916_v34, 6  ;;  %v1874_v59 = vrot.slane %v2950_v54, 6  ;;  %v1398_v53 = vmul.f32 %v1397_v18, %v2892_v20  ;;  %s540_s13 = sld [smem:[#allocation8 + %s2881_s29]]  ;;  %s843_s14 = sadd.s32 24, %s2881_s29 }
 0x26d   : > { %1351 = vrot.lane.b32.xlu0 %v2892_v20, %s4218_s9  ;;  %1342 = vrot.lane.b32.xlu1 %v2916_v34, %s4220_s10  ;;  %v1080_v52 = vrot.slane %v1072_v41, 6  ;;  %v3146_v46 = vsel %vm1076_vm7, %v1077_v42, %v1078_v43  ;;  %v1399_v60 = vmul.f32 %v1397_v18, %v2916_v34  ;;  %v1400_v61 = vmul.f32 %v1397_v18, %v2950_v54 }
 0x26e   : > { %4264 = vst [vmem:[#allocation32_spill] sm:$0xff] %v3146_v46  ;;  %v1492_v0 = vmul.f32 %v1491_v25, %v2892_v20  ;;  %v3155_v2 = vsel %vm1076_vm7, %v1871_v45, %v1872_v58  ;;  %v3158_v8 = vsel %vm1076_vm7, %v1872_v58, %v1874_v59  ;;  %v1404_v10 = vrot.slane %v1398_v53, 1 }
 0x26f   : > { %v3152_v1 = vsel %vm1076_vm7, %v1078_v43, %v1080_v52  ;;  %4266 = vst [vmem:[#allocation34_spill] sm:$0xff] %v3155_v2  ;;  %4267 = vst [vmem:[#allocation35_spill] sm:$0xff] %v3158_v8  ;;  %v1405_v15 = vrot.slane %v1399_v60, 1  ;;  %v1407_v16 = vrot.slane %v1400_v61, 1  ;;  %v1493_v22 = vmul.f32 %v1491_v25, %v2916_v34 }
 0x270   : > { %4265 = vst [vmem:[#allocation33_spill] sm:$0xff] %v3152_v1  ;;  %v1498_v23 = vrot.slane %v1492_v0, 2  ;;  %v1494_v18 = vmul.f32 %v1491_v25, %v2950_v54  ;;  %v1583_v28 = vmul.f32 %v1582_v21, %v2892_v20  ;;  %v1584_v30 = vmul.f32 %v1582_v21, %v2916_v34 }
 0x271   : > { %1362 = vrot.lane.b32.xlu0 %v2892_v20, %s4216_s12  ;;  %1353 = vrot.lane.b32.xlu1 %v2916_v34, %s4218_s9  ;;  %v1764_v31 = vstv %s3115_s20  ;;  %v3170_v41 = vsel %vm613_vm2, %v1404_v10, %v1405_v15  ;;  %v3173_v42 = vsel %vm613_vm2, %v1405_v15, %v1407_v16  ;;  %v1499_v43 = vrot.slane %v1493_v22, 2  ;;  %s740_s20 = sadd.s32 16, %s2881_s29 }
 0x272   : > { %4268 = vst [vmem:[#allocation36_spill] sm:$0xff] %v3170_v41  ;;  %4269 = vst [vmem:[#allocation37_spill] sm:$0xff] %v3173_v42  ;;  %v1585_v45 = vmul.f32 %v1582_v21, %v2950_v54  ;;  %v1501_v52 = vrot.slane %v1494_v18, 2  ;;  %v1589_v58 = vrot.slane %v1583_v28, 3  ;;  %v1590_v59 = vrot.slane %v1584_v30, 3  ;;  %s3472_s16 = sld [smem:[#allocation8 + %s740_s20]] }
 0x273   : > { %v1674_v53 = vmul.f32 %v1673_v26, %v2892_v20  ;;  %v3178_v25 = vsel %vm708_vm3, %v1498_v23, %v1499_v43  ;;  %v1675_v61 = vmul.f32 %v1673_v26, %v2916_v34  ;;  %v1855_v0 = vstv %s3136_s0  ;;  %s784_s0 = sadd.s32 20, %s2881_s29  ;;  %s566_s20 = sadd.s32 3, %s2881_s29 }
 0x274   : > { %4270 = vst [vmem:[#allocation38_spill] sm:$0xff] %v3178_v25  ;;  %v1592_v60 = vrot.slane %v1585_v45, 3  ;;  %v3187_v21 = vsel %vm708_vm3, %v1499_v43, %v1501_v52  ;;  %v3190_v10 = vsel %vm800_vm4, %v1589_v58, %v1590_v59  ;;  %v1676_v16 = vmul.f32 %v1673_v26, %v2950_v54  ;;  %s3482_s18 = sld [smem:[#allocation8 + %s784_s0]]  ;;  %s586_s0 = sadd.s32 5, %s2881_s29 }
 0x275   : > { %1373 = vrot.lane.b32.xlu0 %v2892_v20, %s4212_s5  ;;  %1364 = vrot.lane.b32.xlu1 %v2916_v34, %s4216_s12  ;;  %4271 = vst [vmem:[#allocation39_spill] sm:$0xff] %v3187_v21  ;;  %4272 = vst [vmem:[#allocation40_spill] sm:$0xff] %v3190_v10  ;;  %v1680_v15 = vrot.slane %v1674_v53, 4  ;;  %v1681_v23 = vrot.slane %v1675_v61, 4  ;;  %v1765_v18 = vmul.f32 %v1764_v31, %v2892_v20  ;;  %v683_v38 = vstv %s3465_s7 }
 0x276   : > { %v3194_v22 = vsel %vm800_vm4, %v1590_v59, %v1592_v60  ;;  %v1766_v28 = vmul.f32 %v1764_v31, %v2916_v34  ;;  %v1683_v30 = vrot.slane %v1676_v16, 4  ;;  %v1767_v45 = vmul.f32 %v1764_v31, %v2950_v54 }
 0x277   : > { %4273 = vst [vmem:[#allocation41_spill] sm:$0xff] %v3194_v22  ;;  %v1856_v43 = vmul.f32 %v1855_v0, %v2892_v20  ;;  %v1857_v52 = vmul.f32 %v1855_v0, %v2916_v34  ;;  %v3202_v58 = vsel %vm892_vm5, %v1680_v15, %v1681_v23  ;;  %v1771_v53 = vrot.slane %v1765_v18, 5 }
 0x278   : > { %4274 = vst [vmem:[#allocation42_spill] sm:$0xff] %v3202_v58  ;;  %v1772_v26 = vrot.slane %v1766_v28, 5  ;;  %v3209_v59 = vsel %vm892_vm5, %v1681_v23, %v1683_v30  ;;  %v1774_v60 = vrot.slane %v1767_v45, 5  ;;  %v1858_v15 = vmul.f32 %v1855_v0, %v2950_v54 }
 0x279   : > { %1384 = vrot.lane.b32.xlu0 %v2892_v20, %s4210_s17  ;;  %1375 = vrot.lane.b32.xlu1 %v2916_v34, %s4212_s5  ;;  %4275 = vst [vmem:[#allocation43_spill] sm:$0xff] %v3209_v59  ;;  %v1862_v31 = vrot.slane %v1856_v43, 6  ;;  %v1863_v61 = vrot.slane %v1857_v52, 6 }
 0x27a   : > { %v3212_v16 = vsel %vm984_vm6, %v1771_v53, %v1772_v26  ;;  %v3216_v18 = vsel %vm984_vm6, %v1772_v26, %v1774_v60  ;;  %v1865_v58 = vrot.slane %v1858_v15, 6 }
 0x27b   : > { %4276 = vst [vmem:[#allocation44_spill] sm:$0xff] %v3212_v16  ;;  %4277 = vst [vmem:[#allocation45_spill] sm:$0xff] %v3216_v18  ;;  %v3219_v28 = vsel %vm1076_vm7, %v1862_v31, %v1863_v61 }
 0x27c   : > { %4278 = vst [vmem:[#allocation46_spill] sm:$0xff] %v3219_v28  ;;  %v3226_v23 = vsel %vm1076_vm7, %v1863_v61, %v1865_v58 }
 0x27d   : > { %1386 = vrot.lane.b32.xlu1 %v2916_v34, %s4210_s17  ;;  %546 = vrot.lane.b32.xlu0 %v2914_v33, %s4214_s8  ;;  %4279 = vst [vmem:[#allocation47_spill] sm:$0xff] %v3226_v23 }
 0x281   : > { %633 = vrot.lane.b32.xlu0 %v2940_v49, %s4214_s8  ;;  %635 = vrot.lane.b32.xlu1 %v2984_v5, %s4214_s8 }
 0x285   : > { %644 = vrot.lane.b32.xlu0 %v2940_v49, %s4220_s10  ;;  %646 = vrot.lane.b32.xlu1 %v2984_v5, %s4220_s10 }
 0x289   : > { %655 = vrot.lane.b32.xlu0 %v2940_v49, %s4218_s9  ;;  %657 = vrot.lane.b32.xlu1 %v2984_v5, %s4218_s9 }
 0x28d   : > { %666 = vrot.lane.b32.xlu0 %v2940_v49, %s4216_s12  ;;  %668 = vrot.lane.b32.xlu1 %v2984_v5, %s4216_s12 }
 0x291   : > { %677 = vrot.lane.b32.xlu0 %v2940_v49, %s4212_s5  ;;  %679 = vrot.lane.b32.xlu1 %v2984_v5, %s4212_s5 }
 0x295   : > { %688 = vrot.lane.b32.xlu0 %v2940_v49, %s4210_s17  ;;  %690 = vrot.lane.b32.xlu1 %v2984_v5, %s4210_s17 }
 0x299   : > { %725 = vrot.lane.b32.xlu0 %v2943_v50, %s4214_s8  ;;  %727 = vrot.lane.b32.xlu1 %v2987_v6, %s4214_s8 }
 0x29d   : > { %736 = vrot.lane.b32.xlu0 %v2943_v50, %s4220_s10  ;;  %738 = vrot.lane.b32.xlu1 %v2987_v6, %s4220_s10 }
 0x2a1   : > { %747 = vrot.lane.b32.xlu0 %v2943_v50, %s4218_s9  ;;  %749 = vrot.lane.b32.xlu1 %v2987_v6, %s4218_s9 }
 0x2a5   : > { %758 = vrot.lane.b32.xlu0 %v2943_v50, %s4216_s12  ;;  %760 = vrot.lane.b32.xlu1 %v2987_v6, %s4216_s12 }
 0x2a9   : > { %769 = vrot.lane.b32.xlu0 %v2943_v50, %s4212_s5  ;;  %771 = vrot.lane.b32.xlu1 %v2987_v6, %s4212_s5 }
 0x2ad   : > { %780 = vrot.lane.b32.xlu0 %v2943_v50, %s4210_s17  ;;  %782 = vrot.lane.b32.xlu1 %v2987_v6, %s4210_s17 }
 0x2b1   : > { %817 = vrot.lane.b32.xlu0 %v2946_v51, %s4214_s8  ;;  %819 = vrot.lane.b32.xlu1 %v2990_v7, %s4214_s8 }
 0x2b5   : > { %828 = vrot.lane.b32.xlu0 %v2946_v51, %s4220_s10  ;;  %830 = vrot.lane.b32.xlu1 %v2990_v7, %s4220_s10 }
 0x2b9   : > { %839 = vrot.lane.b32.xlu0 %v2946_v51, %s4218_s9  ;;  %841 = vrot.lane.b32.xlu1 %v2990_v7, %s4218_s9 }
 0x2bd   : > { %850 = vrot.lane.b32.xlu0 %v2946_v51, %s4216_s12  ;;  %852 = vrot.lane.b32.xlu1 %v2990_v7, %s4216_s12 }
 0x2c1   : > { %861 = vrot.lane.b32.xlu0 %v2946_v51, %s4212_s5  ;;  %863 = vrot.lane.b32.xlu1 %v2990_v7, %s4212_s5 }
 0x2c3   : > { %v3296_v49 = vpop.permute.xlu1 %553  ;;  %v3298_v50 = vpop.permute.xlu0 %544 }
 0x2c5   : > { %872 = vrot.lane.b32.xlu0 %v2946_v51, %s4210_s17  ;;  %874 = vrot.lane.b32.xlu1 %v2990_v7, %s4210_s17 }
 0x2c7   : > { %v3304_v54 = vpop.permute.xlu0 %562  ;;  %v3306_v5 = vpop.permute.xlu1 %555 }
 0x2c9   : > { %909 = vrot.lane.b32.xlu0 %v2953_v55, %s4214_s8  ;;  %911 = vrot.lane.b32.xlu1 %v2996_v9, %s4214_s8 }
 0x2cb   : > { %v3312_v6 = vpop.permute.xlu0 %571  ;;  %v3314_v0 = vpop.permute.xlu1 %564 }
 0x2cd   : > { %920 = vrot.lane.b32.xlu0 %v2953_v55, %s4220_s10  ;;  %922 = vrot.lane.b32.xlu1 %v2996_v9, %s4220_s10 }
 0x2cf   : > { %v3320_v51 = vpop.permute.xlu0 %582  ;;  %v3322_v7 = vpop.permute.xlu1 %573 }
 0x2d1   : > { %931 = vrot.lane.b32.xlu0 %v2953_v55, %s4218_s9  ;;  %933 = vrot.lane.b32.xlu1 %v2996_v9, %s4218_s9 }
 0x2d3   : > { %v3328_v30 = vpop.permute.xlu0 %593  ;;  %v3330_v45 = vpop.permute.xlu1 %584 }
 0x2d5   : > { %942 = vrot.lane.b32.xlu0 %v2953_v55, %s4216_s12  ;;  %944 = vrot.lane.b32.xlu1 %v2996_v9, %s4216_s12 }
 0x2d7   : > { %v3336_v43 = vpop.permute.xlu0 %1329  ;;  %v3338_v52 = vpop.permute.xlu1 %595 }
 0x2d8   : > { %4280 = vst [vmem:[#allocation48_spill] sm:$0xff] %v3336_v43 }
 0x2d9   : > { %953 = vrot.lane.b32.xlu0 %v2953_v55, %s4212_s5  ;;  %955 = vrot.lane.b32.xlu1 %v2996_v9, %s4212_s5 }
 0x2db   : > { %v3344_v58 = vpop.permute.xlu0 %1340  ;;  %v3346_v53 = vpop.permute.xlu1 %1331 }
 0x2dc   : > { %4281 = vst [vmem:[#allocation49_spill] sm:$0xff] %v3344_v58  ;;  %4282 = vst [vmem:[#allocation50_spill] sm:$0xff] %v3346_v53  ;;  %v541_v53 = vstv %s540_s13  ;;  %v639_v58 = vstv %s638_s4  ;;  %s557_s13 = sadd.s32 2, %s2881_s29  ;;  %s548_s4 = sadd.s32 1, %s2881_s29 }
 0x2dd   : > { %964 = vrot.lane.b32.xlu0 %v2953_v55, %s4210_s17  ;;  %966 = vrot.lane.b32.xlu1 %v2996_v9, %s4210_s17  ;;  %v542_v1 = vmul.f32 %v541_v53, %v2890_v19  ;;  %v543_v46 = vmul.f32 %v541_v53, %v2914_v33  ;;  %v786_v19 = vstv %s3482_s18  ;;  %s3511_s7 = sld [smem:[#allocation8 + %s557_s13]]  ;;  %s648_s13 = sadd.s32 9, %s2881_s29 }
 0x2de   : > { %s3519_s18 = sld [smem:[#allocation8 + %s548_s4]]  ;;  %s659_s4 = sadd.s32 10, %s2881_s29 }
 0x2df   : > { %v3352_v26 = vpop.permute.xlu0 %1351  ;;  %v3354_v60 = vpop.permute.xlu1 %1342 }
 0x2e0   : > { %4283 = vst [vmem:[#allocation51_spill] sm:$0xff] %v3352_v26  ;;  %4284 = vst [vmem:[#allocation52_spill] sm:$0xff] %v3354_v60 }
 0x2e1   : > { %1001 = vrot.lane.b32.xlu0 %v2956_v56, %s4214_s8  ;;  %1003 = vrot.lane.b32.xlu1 %v2999_v11, %s4214_s8 }
 0x2e3   : > { %v3360_v31 = vpop.permute.xlu0 %1362  ;;  %v3362_v61 = vpop.permute.xlu1 %1353 }
 0x2e4   : > { %4285 = vst [vmem:[#allocation53_spill] sm:$0xff] %v3360_v31  ;;  %4286 = vst [vmem:[#allocation54_spill] sm:$0xff] %v3362_v61  ;;  %v577_v31 = vstv %s576_s30  ;;  %s3492_s30 = sld [smem:[#allocation8 + %s843_s14]] }
 0x2e5   : > { %1012 = vrot.lane.b32.xlu0 %v2956_v56, %s4220_s10  ;;  %1014 = vrot.lane.b32.xlu1 %v2999_v11, %s4220_s10  ;;  %v578_v20 = vmul.f32 %v577_v31, %v3312_v6  ;;  %v579_v39 = vmul.f32 %v577_v31, %v3322_v7  ;;  %v742_v31 = vstv %s3472_s16  ;;  %s597_s16 = sadd.s32 6, %s2881_s29  ;;  %s3521_s14 = sld [smem:[#allocation8 + %s566_s20]] }
 0x2e6   : > { %s729_s20 = sadd.s32 15, %s2881_s29 }
 0x2e7   : > { %v3368_v55 = vpop.permute.xlu0 %1373  ;;  %v3370_v9 = vpop.permute.xlu1 %1364  ;;  %v580_v27 = vadd.f32 %v578_v20, %v542_v1  ;;  %v581_v44 = vadd.f32 %v579_v39, %v543_v46 }
 0x2e8   : > { %4287 = vst [vmem:[#allocation55_spill] sm:$0xff] %v3368_v55  ;;  %4288 = vst [vmem:[#allocation56_spill] sm:$0xff] %v3370_v9 }
 0x2e9   : > { %1023 = vrot.lane.b32.xlu0 %v2956_v56, %s4218_s9  ;;  %1025 = vrot.lane.b32.xlu1 %v2999_v11, %s4218_s9 }
 0x2eb   : > { %v3376_v15 = vpop.permute.xlu0 %1384  ;;  %v3378_v23 = vpop.permute.xlu1 %1375 }
 0x2ec   : > { %4289 = vst [vmem:[#allocation57_spill] sm:$0xff] %v3376_v15  ;;  %4290 = vst [vmem:[#allocation58_spill] sm:$0xff] %v3378_v23 }
 0x2ed   : > { %1034 = vrot.lane.b32.xlu0 %v2956_v56, %s4216_s12  ;;  %1036 = vrot.lane.b32.xlu1 %v2999_v11, %s4216_s12 }
 0x2ef   : > { %v3384_v28 = vpop.permute.xlu1 %1386  ;;  %v3386_v18 = vpop.permute.xlu0 %546 }
 0x2f0   : > { %4291 = vst [vmem:[#allocation59_spill] sm:$0xff] %v3384_v28 }
 0x2f1   : > { %1045 = vrot.lane.b32.xlu0 %v2956_v56, %s4212_s5  ;;  %1047 = vrot.lane.b32.xlu1 %v2999_v11, %s4212_s5 }
 0x2f3   : > { %v3392_v16 = vpop.permute.xlu0 %633  ;;  %v3394_v59 = vpop.permute.xlu1 %635 }
 0x2f4   : > { %v640_v6 = vmul.f32 %v639_v58, %v3392_v16  ;;  %v641_v7 = vmul.f32 %v639_v58, %v3394_v59 }
 0x2f5   : > { %1056 = vrot.lane.b32.xlu0 %v2956_v56, %s4210_s17  ;;  %1058 = vrot.lane.b32.xlu1 %v2999_v11, %s4210_s17 }
 0x2f6   : > { %v642_v33 = vadd.f32 %v640_v6, %v580_v27  ;;  %v643_v59 = vadd.f32 %v641_v7, %v581_v44  ;;  %v845_v44 = vstv %s3492_s30  ;;  %s3536_s30 = sld [smem:[#allocation8 + %s648_s13]]  ;;  %s832_s13 = sadd.s32 23, %s2881_s29 }
 0x2f7   : > { %v3400_v22 = vpop.permute.xlu0 %644  ;;  %v3402_v10 = vpop.permute.xlu1 %646 }
 0x2f9   : > { %1093 = vrot.lane.b32.xlu0 %v2959_v57, %s4214_s8  ;;  %1095 = vrot.lane.b32.xlu1 %v3007_v13, %s4214_s8 }
 0x2fb   : > { %v3408_v21 = vpop.permute.xlu0 %655  ;;  %v3410_v25 = vpop.permute.xlu1 %657 }
 0x2fd   : > { %1104 = vrot.lane.b32.xlu0 %v2959_v57, %s4220_s10  ;;  %1106 = vrot.lane.b32.xlu1 %v3007_v13, %s4220_s10 }
 0x2ff   : > { %v3416_v56 = vpop.permute.xlu0 %666  ;;  %v3418_v11 = vpop.permute.xlu1 %668 }
 0x301   : > { %1115 = vrot.lane.b32.xlu0 %v2959_v57, %s4218_s9  ;;  %1117 = vrot.lane.b32.xlu1 %v3007_v13, %s4218_s9 }
 0x303   : > { %v678_v28 = vpop.permute.xlu0 %677  ;;  %v680_v15 = vpop.permute.xlu1 %679 }
 0x305   : > { %1126 = vrot.lane.b32.xlu0 %v2959_v57, %s4216_s12  ;;  %1128 = vrot.lane.b32.xlu1 %v3007_v13, %s4216_s12 }
 0x307   : > { %v3428_v8 = vpop.permute.xlu0 %688  ;;  %v3430_v2 = vpop.permute.xlu1 %690 }
 0x309   : > { %1137 = vrot.lane.b32.xlu0 %v2959_v57, %s4212_s5  ;;  %1139 = vrot.lane.b32.xlu1 %v3007_v13, %s4212_s5 }
 0x30b   : > { %v3436_v42 = vpop.permute.xlu0 %725  ;;  %v3438_v41 = vpop.permute.xlu1 %727 }
 0x30d   : > { %1148 = vrot.lane.b32.xlu0 %v2959_v57, %s4210_s17  ;;  %1150 = vrot.lane.b32.xlu1 %v3007_v13, %s4210_s17 }
 0x30f   : > { %v737_v23 = vpop.permute.xlu0 %736  ;;  %v739_v55 = vpop.permute.xlu1 %738 }
 0x310   : > { %v743_v16 = vmul.f32 %v742_v31, %v737_v23  ;;  %v744_v20 = vmul.f32 %v742_v31, %v739_v55 }
 0x311   : > { %1423 = vrot.lane.b32.xlu0 %v3010_v14, %s4214_s8  ;;  %1425 = vrot.lane.b32.xlu1 %v3025_v24, %s4214_s8 }
 0x313   : > { %v3449_v60 = vpop.permute.xlu0 %747  ;;  %v3451_v61 = vpop.permute.xlu1 %749 }
 0x314   : > { %4292 = vst [vmem:[#allocation60_spill] sm:$0xff] %v3449_v60  ;;  %4293 = vst [vmem:[#allocation61_spill] sm:$0xff] %v3451_v61  ;;  %v684_v61 = vmul.f32 %v683_v38, %v678_v28  ;;  %v685_v60 = vmul.f32 %v683_v38, %v680_v15 }
 0x315   : > { %1434 = vrot.lane.b32.xlu0 %v3010_v14, %s4220_s10  ;;  %1436 = vrot.lane.b32.xlu1 %v3025_v24, %s4220_s10 }
 0x316   : > { %v687_v46 = vadd.f32 %v685_v60, %v643_v59  ;;  %v559_v59 = vstv %s3511_s7  ;;  %s4296_s7 = smov 123  }
 0x317   : > { %v3460_v57 = vpop.permute.xlu0 %758  ;;  %v3462_v13 = vpop.permute.xlu1 %760 }
 0x318   : > { %v746_v28 = vadd.f32 %v744_v20, %v687_v46 }
 0x319   : > { %1445 = vrot.lane.b32.xlu0 %v3010_v14, %s4218_s9  ;;  %1447 = vrot.lane.b32.xlu1 %v3025_v24, %s4218_s9  ;;  %s3548_s9 = sld [smem:[#allocation8 + %s729_s20]]  ;;  %s4294_s20 = smov 125  }
 0x31b   : > { %v3474_v26 = vpop.permute.xlu0 %769  ;;  %v3476_v9 = vpop.permute.xlu1 %771 }
 0x31d   : > { %1456 = vrot.lane.b32.xlu0 %v3010_v14, %s4216_s12  ;;  %1458 = vrot.lane.b32.xlu1 %v3025_v24, %s4216_s12  ;;  %s3546_s12 = sld [smem:[#allocation8 + %s659_s4]] }
 0x31f   : > { %v781_v43 = vpop.permute.xlu0 %780  ;;  %v783_v34 = vpop.permute.xlu1 %782 }
 0x320   : > { %v788_v27 = vmul.f32 %v786_v19, %v783_v34 }
 0x321   : > { %1467 = vrot.lane.b32.xlu0 %v3010_v14, %s4212_s5  ;;  %1469 = vrot.lane.b32.xlu1 %v3025_v24, %s4212_s5  ;;  %s3532_s5 = sld [smem:[#allocation8 + %s597_s16]]  ;;  %s773_s16 = sadd.s32 19, %s2881_s29 }
 0x322   : > { %v790_v58 = vadd.f32 %v788_v27, %v746_v28  ;;  %s3564_s4 = sld [smem:[#allocation8 + %s773_s16]]  ;;  %s4295_s16 = smov 124   ;;  %v731_v27 = vstv %s3548_s9  ;;  %v650_v28 = vstv %s3536_s30 }
 0x323   : > { %v3499_v12 = vpop.permute.xlu0 %817  ;;  %v3501_v4 = vpop.permute.xlu1 %819  ;;  %s957_s30 = sadd.s32 33, %s2881_s29 }
 0x325   : > { %1478 = vrot.lane.b32.xlu0 %v3010_v14, %s4210_s17  ;;  %1480 = vrot.lane.b32.xlu1 %v3025_v24, %s4210_s17  ;;  %v686_v14 = vadd.f32 %v684_v61, %v642_v33  ;;  %v787_v24 = vmul.f32 %v786_v19, %v781_v43  ;;  %s3530_s17 = sld [smem:[#allocation8 + %s586_s0]]  ;;  %s692_s0 = sadd.s32 13, %s2881_s29 }
 0x327   : > { %v3513_v39 = vpop.permute.xlu0 %828  ;;  %v3515_v38 = vpop.permute.xlu1 %830  ;;  %v745_v1 = vadd.f32 %v743_v16, %v686_v14  ;;  %v550_v14 = vstv %s3519_s18 }
 0x329   : > { %1514 = vrot.lane.b32.xlu0 %v3032_v32, %s4214_s8  ;;  %1516 = vrot.lane.b32.xlu1 %v3047_v37, %s4214_s8  ;;  %v789_v43 = vadd.f32 %v787_v24, %v745_v1  ;;  %s3538_s8 = sld [smem:[#allocation8 + %s670_s26]]  ;;  %s751_s26 = sadd.s32 17, %s2881_s29  ;;  %v599_v24 = vstv %s3532_s5 }
 0x32a   : > { %s3572_s2 = sld [smem:[#allocation8 + %s751_s26]]  ;;  %s762_s26 = sadd.s32 18, %s2881_s29 }
 0x32b   : > { %v840_v34 = vpop.permute.xlu0 %839  ;;  %v842_v23 = vpop.permute.xlu1 %841  ;;  %v588_v46 = vstv %s3530_s17  ;;  %s865_s5 = sadd.s32 26, %s2881_s29 }
 0x32c   : > { %v846_v53 = vmul.f32 %v845_v44, %v840_v34  ;;  %v847_v60 = vmul.f32 %v845_v44, %v842_v23  ;;  %v661_v34 = vstv %s3546_s12  ;;  %s3631_s18 = sld [smem:[#allocation8 + %s865_s5]]  ;;  %s913_s5 = sadd.s32 29, %s2881_s29 }
 0x32d   : > { %1525 = vrot.lane.b32.xlu0 %v3032_v32, %s4220_s10  ;;  %1527 = vrot.lane.b32.xlu1 %v3047_v37, %s4220_s10  ;;  %s3562_s10 = sld [smem:[#allocation8 + %s692_s0]] }
 0x32e   : > { %v848_v61 = vadd.f32 %v846_v53, %v789_v43  ;;  %v849_v55 = vadd.f32 %v847_v60, %v790_v58  ;;  %s3574_s0 = sld [smem:[#allocation8 + %s832_s13]]  ;;  %s935_s13 = sadd.s32 31, %s2881_s29  ;;  %v775_v43 = vstv %s3564_s4  ;;  %v732_v53 = vmul.f32 %v731_v27, %v3436_v42 }
 0x32f   : > { %v3550_v15 = vpop.permute.xlu0 %850  ;;  %v3552_v6 = vpop.permute.xlu1 %852  ;;  %v672_v33 = vstv %s3538_s8  ;;  %s821_s8 = sadd.s32 22, %s2881_s29  ;;  %s3609_s9 = sld [smem:[#allocation8 + %s935_s13]]  ;;  %v560_v60 = vmul.f32 %v559_v59, %v3296_v49  ;;  %v777_v42 = vmul.f32 %v775_v43, %v3476_v9  ;;  %v561_v49 = vmul.f32 %v559_v59, %v3306_v5 }
 0x330   : > { %v3557_v7 = vadd.f32 %v3087_v62, %v848_v61  ;;  %v3560_v31 = vadd.f32 %v3096_v3, %v849_v55  ;;  %v568_v62 = vstv %s3521_s14  ;;  %s3585_s14 = sld [smem:[#allocation8 + %s876_s1]]  ;;  %v673_v23 = vmul.f32 %v672_v33, %v3416_v56  ;;  %s4297_s4 = smov 122  }
 0x331   : > { %1536 = vrot.lane.b32.xlu0 %v3032_v32, %s4294_s20  ;;  %1538 = vrot.lane.b32.xlu1 %v3047_v37, %s4294_s20  ;;  %v569_v16 = vmul.f32 %v568_v62, %v3304_v54  ;;  %v570_v20 = vmul.f32 %v568_v62, %v3314_v0  ;;  %v674_v54 = vmul.f32 %v672_v33, %v3418_v11  ;;  %s3602_s1 = sld [smem:[#allocation8 + %s762_s26]]  ;;  %v753_v55 = vstv %s3572_s2  ;;  %s946_s26 = sadd.s32 32, %s2881_s29 }
 0x332   : > { %v733_v11 = vmul.f32 %v731_v27, %v3438_v41  ;;  %s3615_s12 = sld [smem:[#allocation8 + %s821_s8]]  ;;  %v600_v61 = vmul.f32 %v599_v24, %v3328_v30  ;;  %v776_v41 = vmul.f32 %v775_v43, %v3474_v26  ;;  %v601_v30 = vmul.f32 %v599_v24, %v3338_v52  ;;  %s4298_s8 = smov 127  }
 0x333   : > { %v3576_v3 = vpop.permute.xlu0 %861  ;;  %v3578_v19 = vpop.permute.xlu1 %863  ;;  %v621_v58 = vadd.f32 %v2974_v63, %v569_v16  ;;  %v622_v56 = vadd.f32 %v3017_v17, %v570_v20  ;;  %v551_v16 = vmul.f32 %v550_v14, %v3298_v50  ;;  %v589_v5 = vmul.f32 %v588_v46, %v3320_v51  ;;  %s3672_s19 = sld [smem:[#allocation8 + %s946_s26]]  ;;  %s1016_s2 = sadd.s32 37, %s2881_s29 }
 0x334   : > { %v834_v62 = vstv %s3574_s0  ;;  %s924_s0 = sadd.s32 30, %s2881_s29  ;;  %v602_v52 = vadd.f32 %v600_v61, %v560_v60  ;;  %v662_v59 = vmul.f32 %v661_v34, %v3408_v21  ;;  %v603_v51 = vadd.f32 %v601_v30, %v561_v49  ;;  %s3678_s17 = sld [smem:[#allocation8 + %s913_s5]] }
 0x335   : > { %1547 = vrot.lane.b32.xlu0 %v3032_v32, %s4295_s16  ;;  %1549 = vrot.lane.b32.xlu1 %v3047_v37, %s4295_s16  ;;  %v675_v63 = vadd.f32 %v673_v23, %v621_v58  ;;  %v676_v17 = vadd.f32 %v674_v54, %v622_v56  ;;  %v835_v9 = vmul.f32 %v834_v62, %v3513_v39  ;;  %s3656_s13 = sld [smem:[#allocation8 + %s924_s0]]  ;;  %s1038_s26 = sadd.s32 39, %s2881_s29 }
 0x336   : > { %v878_v20 = vstv %s3585_s14  ;;  %v836_v50 = vmul.f32 %v834_v62, %v3515_v38  ;;  %s854_s14 = sadd.s32 25, %s2881_s29  ;;  %v552_v21 = vmul.f32 %v550_v14, %v3386_v18  ;;  %v591_v18 = vadd.f32 %v589_v5, %v551_v16  ;;  %s1049_s5 = sadd.s32 40, %s2881_s29 }
 0x337   : > { %v873_v44 = vpop.permute.xlu0 %872  ;;  %v875_v1 = vpop.permute.xlu1 %874  ;;  %v734_v27 = vadd.f32 %v732_v53, %v675_v63  ;;  %v735_v26 = vadd.f32 %v733_v11, %v676_v17  ;;  %v764_v43 = vstv %s3602_s1  ;;  %v664_v14 = vadd.f32 %v662_v59, %v602_v52  ;;  %s3670_s0 = sld [smem:[#allocation8 + %s854_s14]]  ;;  %s4299_s1 = smov 126  }
 0x338   : > { %v879_v38 = vmul.f32 %v878_v20, %v873_v44  ;;  %v880_v54 = vmul.f32 %v878_v20, %v875_v1  ;;  %v823_v44 = vstv %s3615_s12  ;;  %v766_v16 = vmul.f32 %v764_v43, %v3462_v13  ;;  %s1005_s12 = sadd.s32 36, %s2881_s29 }
 0x339   : > { %1558 = vrot.lane.b32.xlu0 %v3032_v32, %s4296_s7  ;;  %1560 = vrot.lane.b32.xlu1 %v3047_v37, %s4296_s7  ;;  %v778_v39 = vadd.f32 %v776_v41, %v734_v27  ;;  %v779_v23 = vadd.f32 %v777_v42, %v735_v26  ;;  %v765_v42 = vmul.f32 %v764_v43, %v3460_v57 }
 0x33a   : > { %v716_v26 = vadd.f32 %v3044_v36, %v664_v14  ;;  %v824_v13 = vmul.f32 %v823_v44, %v3499_v12  ;;  %v825_v5 = vmul.f32 %v823_v44, %v3501_v4 }
 0x33b   : > { %v3622_v33 = vpop.permute.xlu0 %909  ;;  %v3624_v0 = vpop.permute.xlu1 %911  ;;  %v837_v1 = vadd.f32 %v835_v9, %v778_v39  ;;  %v838_v58 = vadd.f32 %v836_v50, %v779_v23  ;;  %v926_v39 = vstv %s3656_s13  ;;  %s3759_s13 = sld [smem:[#allocation8 + %s1038_s26]] }
 0x33c   : > { %v767_v4 = vadd.f32 %v765_v42, %v716_v26 }
 0x33d   : > { %1569 = vrot.lane.b32.xlu0 %v3032_v32, %s4297_s4  ;;  %1571 = vrot.lane.b32.xlu1 %v3047_v37, %s4297_s4  ;;  %v663_v32 = vmul.f32 %v661_v34, %v3410_v25  ;;  %v651_v25 = vmul.f32 %v650_v28, %v3400_v22  ;;  %v937_v34 = vstv %s3609_s9  ;;  %v590_v22 = vmul.f32 %v588_v46, %v3330_v45  ;;  %s3684_s9 = sld [smem:[#allocation8 + %s968_s3]] }
 0x33e   : > { %v881_v60 = vadd.f32 %v879_v38, %v837_v1  ;;  %v882_v61 = vadd.f32 %v880_v54, %v838_v58  ;;  %v652_v45 = vmul.f32 %v650_v28, %v3402_v10  ;;  %v867_v46 = vstv %s3631_s18  ;;  %s3717_s3 = sld [smem:[#allocation8 + %s957_s30]]  ;;  %s1097_s30 = sadd.s32 43, %s2881_s29 }
 0x33f   : > { %v3646_v37 = vpop.permute.xlu0 %920  ;;  %v3648_v24 = vpop.permute.xlu1 %922  ;;  %v665_v56 = vadd.f32 %v663_v32, %v603_v51  ;;  %v592_v17 = vadd.f32 %v590_v22, %v552_v21  ;;  %v653_v41 = vadd.f32 %v651_v25, %v591_v18  ;;  %v4300_v10 = vstv %s3562_s10  ;;  %s3719_s10 = sld [smem:[#allocation8 + %s1005_s12]] }
 0x340   : > { %v695_v28 = vmul.f32 %v4300_v10, %v3428_v8  ;;  %v4301_v20 = vmov %v4300_v10  ;;  %v856_v38 = vstv %s3670_s0  ;;  %v948_v54 = vstv %s3672_s19  ;;  %s3733_s18 = sld [smem:[#allocation8 + %s1016_s2]]  ;;  %s1027_s19 = sadd.s32 38, %s2881_s29 }
 0x341   : > { %1605 = vrot.lane.b32.xlu0 %v3070_v47, %s4298_s8  ;;  %1607 = vrot.lane.b32.xlu1 %v3073_v48, %s4298_s8  ;;  %v696_v27 = vmul.f32 %v4301_v20, %v3430_v2  ;;  %v717_v9 = vadd.f32 %v3055_v40, %v665_v56  ;;  %v654_v8 = vadd.f32 %v652_v45, %v592_v17  ;;  %v4302_v2 = vld [vmem:[#allocation60_spill] sm:$0xff]  ;;  %v4303_v40 = vld [vmem:[#allocation61_spill] sm:$0xff]  ;;  %v915_v22 = vstv %s3678_s17  ;;  %v4304_v17 = vld [vmem:[#allocation26_spill] sm:$0xff]  ;;  %s3747_s14 = sld [smem:[#allocation8 + %s1027_s19]]  ;;  %s1060_s17 = sadd.s32 41, %s2881_s29 }
 0x342   : > { %v754_v36 = vmul.f32 %v753_v55, %v4302_v2  ;;  %v755_v32 = vmul.f32 %v753_v55, %v4303_v40  ;;  %v697_v55 = vadd.f32 %v695_v28, %v653_v41  ;;  %v826_v25 = vadd.f32 %v824_v13, %v767_v4  ;;  %v4305_v45 = vld [vmem:[#allocation27_spill] sm:$0xff]  ;;  %v4306_v4 = vld [vmem:[#allocation28_spill] sm:$0xff]  ;;  %s3767_s0 = sld [smem:[#allocation8 + %s1049_s5]]  ;;  %s1119_s2 = sadd.s32 45, %s2881_s29 }
 0x343   : > { %v932_v53 = vpop.permute.xlu0 %931  ;;  %v934_v11 = vpop.permute.xlu1 %933  ;;  %v768_v12 = vadd.f32 %v766_v16, %v717_v9  ;;  %v698_v23 = vadd.f32 %v696_v27, %v654_v8  ;;  %v927_v43 = vmul.f32 %v926_v39, %v3646_v37  ;;  %v928_v44 = vmul.f32 %v926_v39, %v3648_v24  ;;  %s1098_s12 = sld [smem:[#allocation8 + %s1097_s30]]  ;;  %s1130_s19 = sadd.s32 46, %s2881_s29 }
 0x344   : > { %v938_v62 = vmul.f32 %v937_v34, %v932_v53  ;;  %v939_v63 = vmul.f32 %v937_v34, %v934_v11  ;;  %v756_v1 = vadd.f32 %v754_v36, %v697_v55  ;;  %v857_v37 = vmul.f32 %v856_v38, %v3550_v15  ;;  %s3815_s26 = sld [smem:[#allocation8 + %s1130_s19]]  ;;  %s1333_s5 = sadd.s32 1, %s2976_s15 }
 0x345   : > { %1616 = vrot.lane.b32.xlu0 %v3070_v47, %s4299_s1  ;;  %1618 = vrot.lane.b32.xlu1 %v3073_v48, %s4299_s1  ;;  %v827_v34 = vadd.f32 %v825_v5, %v768_v12  ;;  %v858_v24 = vmul.f32 %v856_v38, %v3552_v6  ;;  %v959_v42 = vstv %s3717_s3  ;;  %v1007_v15 = vstv %s3719_s10  ;;  %s1108_s3 = sadd.s32 44, %s2881_s29  ;;  %s3836_s30 = sld [smem:[#allocation8 + %s1333_s5]] }
 0x346   : > { %v940_v49 = vadd.f32 %v938_v62, %v881_v60  ;;  %v941_v30 = vadd.f32 %v939_v63, %v882_v61  ;;  %v808_v41 = vadd.f32 %v4304_v17, %v756_v1  ;;  %v916_v6 = vmul.f32 %v915_v22, %v3622_v33  ;;  %s3797_s10 = sld [smem:[#allocation8 + %s1108_s3]]  ;;  %s1355_s3 = sadd.s32 3, %s2976_s15 }
 0x347   : > { %v943_v57 = vpop.permute.xlu0 %942  ;;  %v945_v50 = vpop.permute.xlu1 %944  ;;  %v917_v16 = vmul.f32 %v915_v22, %v3624_v0  ;;  %v1018_v0 = vstv %s3733_s18  ;;  %v1029_v12 = vstv %s3747_s14  ;;  %s3804_s18 = sld [smem:[#allocation8 + %s1119_s2]]  ;;  %s1427_s19 = sadd.s32 8, %s2976_s15 }
 0x348   : > { %v3701_v52 = vadd.f32 %v3119_v29, %v940_v49  ;;  %v3704_v59 = vadd.f32 %v3125_v35, %v941_v30  ;;  %v868_v29 = vmul.f32 %v867_v46, %v3576_v3  ;;  %v869_v35 = vmul.f32 %v867_v46, %v3578_v19  ;;  %s3808_s14 = sld [smem:[#allocation8 + %s2976_s15]]  ;;  %s1438_s5 = sadd.s32 9, %s2976_s15 }
 0x349   : > { %1627 = vrot.lane.b32.xlu0 %v3070_v47, %s4294_s20  ;;  %1629 = vrot.lane.b32.xlu1 %v3073_v48, %s4294_s20  ;;  %v757_v3 = vadd.f32 %v755_v32, %v698_v23  ;;  %v970_v19 = vstv %s3684_s9  ;;  %v949_v14 = vmul.f32 %v948_v54, %v943_v57  ;;  %v950_v56 = vmul.f32 %v948_v54, %v945_v50  ;;  %s3775_s9 = sld [smem:[#allocation8 + %s1060_s17]]  ;;  %s1344_s17 = sadd.s32 2, %s2976_s15 }
 0x34a   : > { %v870_v58 = vadd.f32 %v868_v29, %v826_v25  ;;  %v871_v18 = vadd.f32 %v869_v35, %v827_v34  ;;  %v859_v10 = vadd.f32 %v857_v37, %v808_v41  ;;  %v1051_v22 = vstv %s3767_s0  ;;  %s3842_s2 = sld [smem:[#allocation8 + %s1344_s17]]  ;;  %s1388_s17 = sadd.s32 6, %s2976_s15 }
 0x34b   : > { %v954_v51 = vpop.permute.xlu0 %953  ;;  %v956_v21 = vpop.permute.xlu1 %955  ;;  %v809_v46 = vadd.f32 %v4305_v45, %v757_v3  ;;  %v951_v20 = vadd.f32 %v949_v14, %v3557_v7  ;;  %v952_v27 = vadd.f32 %v950_v56, %v3560_v31  ;;  %v4308_v3 = vld [vmem:[#allocation32_spill] sm:$0xff]  ;;  %v1099_v41 = vstv %s1098_s12  ;;  %s1366_s12 = sadd.s32 4, %s2976_s15 }
 0x34c   : > { %v929_v60 = vadd.f32 %v927_v43, %v870_v58  ;;  %v930_v61 = vadd.f32 %v928_v44, %v871_v18  ;;  %v960_v57 = vmul.f32 %v959_v42, %v954_v51  ;;  %v961_v50 = vmul.f32 %v959_v42, %v956_v21  ;;  %v4309_v58 = vld [vmem:[#allocation33_spill] sm:$0xff] }
 0x34d   : > { %1638 = vrot.lane.b32.xlu0 %v3070_v47, %s4295_s16  ;;  %1640 = vrot.lane.b32.xlu1 %v3073_v48, %s4295_s16  ;;  %v860_v28 = vadd.f32 %v858_v24, %v809_v46  ;;  %v918_v7 = vadd.f32 %v916_v6, %v859_v10  ;;  %v1040_v51 = vstv %s3759_s13  ;;  %s1141_s13 = sadd.s32 47, %s2881_s29 }
 0x34e   : > { %s3828_s0 = sld [smem:[#allocation8 + %s1141_s13]] }
 0x34f   : > { %v965_v53 = vpop.permute.xlu0 %964  ;;  %v967_v11 = vpop.permute.xlu1 %966  ;;  %v919_v33 = vadd.f32 %v917_v16, %v860_v28  ;;  %v962_v40 = vadd.f32 %v960_v57, %v918_v7  ;;  %v4311_v57 = vld [vmem:[#allocation31_spill] sm:$0xff] }
 0x350   : > { %v971_v62 = vmul.f32 %v970_v19, %v965_v53  ;;  %v972_v63 = vmul.f32 %v970_v19, %v967_v11 }
 0x351   : > { %1649 = vrot.lane.b32.xlu0 %v3070_v47, %s4296_s7  ;;  %1651 = vrot.lane.b32.xlu1 %v3073_v48, %s4296_s7  ;;  %v963_v32 = vadd.f32 %v961_v50, %v919_v33  ;;  %v1121_v50 = vstv %s3804_s18  ;;  %s3851_s18 = sld [smem:[#allocation8 + %s1366_s12]] }
 0x352   : > { %v973_v49 = vadd.f32 %v971_v62, %v929_v60  ;;  %v974_v30 = vadd.f32 %v972_v63, %v930_v61  ;;  %v1062_v60 = vstv %s3775_s9  ;;  %s1152_s9 = sadd.s32 48, %s2881_s29 }
 0x353   : > { %v1002_v26 = vpop.permute.xlu0 %1001  ;;  %v1004_v9 = vpop.permute.xlu1 %1003  ;;  %s3849_s29 = sld [smem:[#allocation8 + %s1152_s9]]  ;;  %s1449_s9 = sadd.s32 10, %s2976_s15 }
 0x354   : > { %v1008_v13 = vmul.f32 %v1007_v15, %v1002_v26  ;;  %v1009_v5 = vmul.f32 %v1007_v15, %v1004_v9  ;;  %v4310_v9 = vld [vmem:[#allocation30_spill] sm:$0xff]  ;;  %s3898_s12 = sld [smem:[#allocation8 + %s1449_s9]]  ;;  %s1609_s9 = sadd.s32 22, %s2976_s15 }
 0x355   : > { %1660 = vrot.lane.b32.xlu0 %v3070_v47, %s4297_s4  ;;  %1662 = vrot.lane.b32.xlu1 %v3073_v48, %s4297_s4  ;;  %v4307_v48 = vld [vmem:[#allocation29_spill] sm:$0xff] }
 0x356   : > { %v1010_v31 = vadd.f32 %v1008_v13, %v951_v20  ;;  %v1011_v8 = vadd.f32 %v1009_v5, %v952_v27 }
 0x357   : > { %v1013_v2 = vpop.permute.xlu0 %1012  ;;  %v1015_v36 = vpop.permute.xlu1 %1014 }
 0x358   : > { %v1019_v39 = vmul.f32 %v1018_v0, %v1013_v2  ;;  %v1020_v47 = vmul.f32 %v1018_v0, %v1015_v36  ;;  %v1324_v0 = vstv %s3808_s14  ;;  %v1132_v2 = vstv %s3815_s26  ;;  %v4312_v36 = vld [vmem:[#allocation24_spill] sm:$0xff]  ;;  %s3856_s14 = sld [smem:[#allocation8 + %s1355_s3]]  ;;  %s1460_s3 = sadd.s32 11, %s2976_s15 }
 0x359   : > { %1696 = vrot.lane.b32.xlu0 %v4306_v4, %s4298_s8  ;;  %1698 = vrot.lane.b32.xlu1 %v4307_v48, %s4298_s8  ;;  %s3865_s26 = sld [smem:[#allocation8 + %s1427_s19]]  ;;  %s1518_s19 = sadd.s32 15, %s2976_s15 }
 0x35a   : > { %v1021_v29 = vadd.f32 %v1019_v39, %v962_v40  ;;  %v1022_v35 = vadd.f32 %v1020_v47, %v963_v32  ;;  %v1325_v40 = vmul.f32 %v1324_v0, %v4312_v36  ;;  %v4313_v39 = vld [vmem:[#allocation25_spill] sm:$0xff]  ;;  %v4322_v36 = vld [vmem:[#allocation55_spill] sm:$0xff] }
 0x35b   : > { %v1024_v55 = vpop.permute.xlu0 %1023  ;;  %v1026_v23 = vpop.permute.xlu1 %1025  ;;  %v1326_v47 = vmul.f32 %v1324_v0, %v4313_v39 }
 0x35c   : > { %v1030_v38 = vmul.f32 %v1029_v12, %v1024_v55  ;;  %v1031_v54 = vmul.f32 %v1029_v12, %v1026_v23 }
 0x35d   : > { %1707 = vrot.lane.b32.xlu0 %v4306_v4, %s4299_s1  ;;  %1709 = vrot.lane.b32.xlu1 %v4307_v48, %s4299_s1 }
 0x35e   : > { %v1032_v21 = vadd.f32 %v1030_v38, %v973_v49  ;;  %v1033_v25 = vadd.f32 %v1031_v54, %v974_v30  ;;  %v1110_v49 = vstv %s3797_s10  ;;  %s1377_s10 = sadd.s32 5, %s2976_s15  ;;  %v1143_v38 = vstv %s3828_s0  ;;  %s3878_s0 = sld [smem:[#allocation8 + %s1438_s5]] }
 0x35f   : > { %v1035_v34 = vpop.permute.xlu0 %1034  ;;  %v1037_v43 = vpop.permute.xlu1 %1036  ;;  %s3858_s13 = sld [smem:[#allocation8 + %s1377_s10]] }
 0x360   : > { %v1041_v44 = vmul.f32 %v1040_v51, %v1035_v34  ;;  %v1042_v1 = vmul.f32 %v1040_v51, %v1037_v43  ;;  %v3779_v19 = vadd.f32 %v4308_v3, %v1032_v21  ;;  %v3782_v18 = vadd.f32 %v4309_v58, %v1033_v25  ;;  %s3913_s10 = sld [smem:[#allocation8 + %s1460_s3]] }
 0x361   : > { %1718 = vrot.lane.b32.xlu0 %v4306_v4, %s4294_s20  ;;  %1720 = vrot.lane.b32.xlu1 %v4307_v48, %s4294_s20  ;;  %v1335_v34 = vstv %s3836_s30  ;;  %v1154_v3 = vstv %s3849_s29  ;;  %s3886_s30 = sld [smem:[#allocation8 + %s1388_s17]] }
 0x362   : > { %v1043_v37 = vadd.f32 %v1041_v44, %v3701_v52  ;;  %v1044_v24 = vadd.f32 %v1042_v1, %v3704_v59  ;;  %v1346_v1 = vstv %s3842_s2  ;;  %s1471_s2 = sadd.s32 12, %s2976_s15 }
 0x363   : > { %v1046_v14 = vpop.permute.xlu0 %1045  ;;  %v1048_v56 = vpop.permute.xlu1 %1047  ;;  %s3924_s29 = sld [smem:[#allocation8 + %s1471_s2]] }
 0x364   : > { %v1052_v53 = vmul.f32 %v1051_v22, %v1046_v14  ;;  %v1053_v11 = vmul.f32 %v1051_v22, %v1048_v56  ;;  %v1357_v22 = vstv %s3856_s14  ;;  %v4314_v56 = vld [vmem:[#allocation48_spill] sm:$0xff]  ;;  %s1529_s14 = sadd.s32 16, %s2976_s15 }
 0x365   : > { %1729 = vrot.lane.b32.xlu0 %v4306_v4, %s4295_s16  ;;  %1731 = vrot.lane.b32.xlu1 %v4307_v48, %s4295_s16 }
 0x366   : > { %v1054_v61 = vadd.f32 %v1052_v53, %v1010_v31  ;;  %v1055_v52 = vadd.f32 %v1053_v11, %v1011_v8  ;;  %v1336_v53 = vmul.f32 %v1335_v34, %v4314_v56  ;;  %v4315_v11 = vld [vmem:[#allocation49_spill] sm:$0xff] }
 0x367   : > { %v1057_v59 = vpop.permute.xlu0 %1056  ;;  %v1059_v62 = vpop.permute.xlu1 %1058 }
 0x368   : > { %v1063_v63 = vmul.f32 %v1062_v60, %v1057_v59  ;;  %v1064_v17 = vmul.f32 %v1062_v60, %v1059_v62  ;;  %v1347_v60 = vmul.f32 %v1346_v1, %v4315_v11  ;;  %v4316_v59 = vld [vmem:[#allocation50_spill] sm:$0xff]  ;;  %v1462_v11 = vstv %s3913_s10  ;;  %s1631_s10 = sadd.s32 24, %s2976_s15 }
 0x369   : > { %1740 = vrot.lane.b32.xlu0 %v4306_v4, %s4296_s7  ;;  %1742 = vrot.lane.b32.xlu1 %v4307_v48, %s4296_s7  ;;  %v1337_v62 = vmul.f32 %v1335_v34, %v4316_v59  ;;  %v4327_v34 = vld [vmem:[#allocation35_spill] sm:$0xff]  ;;  %s1632_s2 = sld [smem:[#allocation8 + %s1631_s10]]  ;;  %s1802_s10 = sadd.s32 37, %s2976_s15 }
 0x36a   : > { %v1065_v45 = vadd.f32 %v1063_v63, %v1021_v29  ;;  %v1066_v46 = vadd.f32 %v1064_v17, %v1022_v35  ;;  %v4317_v63 = vld [vmem:[#allocation53_spill] sm:$0xff] }
 0x36b   : > { %v1094_v42 = vpop.permute.xlu0 %1093  ;;  %v1096_v15 = vpop.permute.xlu1 %1095 }
 0x36c   : > { %v1100_v6 = vmul.f32 %v1099_v41, %v1094_v42  ;;  %v1101_v16 = vmul.f32 %v1099_v41, %v1096_v15  ;;  %v4318_v41 = vld [vmem:[#allocation56_spill] sm:$0xff]  ;;  %v4319_v42 = vld [vmem:[#allocation51_spill] sm:$0xff] }
 0x36d   : > { %1751 = vrot.lane.b32.xlu0 %v4306_v4, %s4297_s4  ;;  %1753 = vrot.lane.b32.xlu1 %v4307_v48, %s4297_s4  ;;  %v1358_v15 = vmul.f32 %v1357_v22, %v4319_v42  ;;  %v1473_v42 = vstv %s3924_s29  ;;  %s1642_s29 = sadd.s32 25, %s2976_s15 }
 0x36e   : > { %v3817_v30 = vadd.f32 %v1100_v6, %v1043_v37  ;;  %v3819_v10 = vadd.f32 %v1101_v16, %v1044_v24  ;;  %v1379_v37 = vstv %s3858_s13  ;;  %v4320_v6 = vld [vmem:[#allocation54_spill] sm:$0xff]  ;;  %s1530_s13 = sld [smem:[#allocation8 + %s1529_s14]] }
 0x36f   : > { %v1105_v28 = vpop.permute.xlu0 %1104  ;;  %v1107_v20 = vpop.permute.xlu1 %1106  ;;  %v1359_v16 = vmul.f32 %v1357_v22, %v4320_v6 }
 0x370   : > { %v1111_v27 = vmul.f32 %v1110_v49, %v1105_v28  ;;  %v1112_v26 = vmul.f32 %v1110_v49, %v1107_v20 }
 0x371   : > { %1787 = vrot.lane.b32.xlu0 %v4310_v9, %s4298_s8  ;;  %1789 = vrot.lane.b32.xlu1 %v4311_v57, %s4298_s8 }
 0x372   : > { %v3831_v13 = vadd.f32 %v1111_v27, %v1054_v61  ;;  %v3833_v5 = vadd.f32 %v1112_v26, %v1055_v52 }
 0x373   : > { %v1116_v7 = vpop.permute.xlu0 %1115  ;;  %v1118_v33 = vpop.permute.xlu1 %1117 }
 0x374   : > { %v1122_v31 = vmul.f32 %v1121_v50, %v1116_v7  ;;  %v1123_v8 = vmul.f32 %v1121_v50, %v1118_v33 }
 0x375   : > { %1798 = vrot.lane.b32.xlu0 %v4310_v9, %s4299_s1  ;;  %1800 = vrot.lane.b32.xlu1 %v4311_v57, %s4299_s1 }
 0x376   : > { %v1124_v32 = vadd.f32 %v1122_v31, %v1065_v45  ;;  %v1125_v4 = vadd.f32 %v1123_v8, %v1066_v46  ;;  %v1429_v46 = vstv %s3865_s26  ;;  %v4321_v8 = vld [vmem:[#allocation52_spill] sm:$0xff] }
 0x377   : > { %v1127_v48 = vpop.permute.xlu0 %1126  ;;  %v1129_v12 = vpop.permute.xlu1 %1128 }
 0x378   : > { %v1327_v29 = vadd.f32 %v1325_v40, %v1124_v32  ;;  %v1328_v35 = vadd.f32 %v1326_v47, %v1125_v4  ;;  %v1133_v55 = vmul.f32 %v1132_v2, %v1127_v48  ;;  %v1134_v23 = vmul.f32 %v1132_v2, %v1129_v12  ;;  %v4323_v40 = vld [vmem:[#allocation58_spill] sm:$0xff]  ;;  %v4324_v4 = vld [vmem:[#allocation36_spill] sm:$0xff]  ;;  %v4325_v12 = vld [vmem:[#allocation37_spill] sm:$0xff] }
 0x379   : > { %1809 = vrot.lane.b32.xlu0 %v4310_v9, %s4294_s20  ;;  %1811 = vrot.lane.b32.xlu1 %v4311_v57, %s4294_s20  ;;  %v1348_v2 = vmul.f32 %v1346_v1, %v4321_v8  ;;  %v1440_v32 = vstv %s3878_s0  ;;  %s1573_s0 = sadd.s32 20, %s2976_s15 }
 0x37a   : > { %v1135_v54 = vadd.f32 %v1133_v55, %v3779_v19  ;;  %v1136_v51 = vadd.f32 %v1134_v23, %v3782_v18  ;;  %v1368_v19 = vstv %s3851_s18  ;;  %s1482_s18 = sadd.s32 13, %s2976_s15 }
 0x37b   : > { %v1138_v21 = vpop.permute.xlu0 %1137  ;;  %v1140_v25 = vpop.permute.xlu1 %1139  ;;  %v1369_v17 = vmul.f32 %v1368_v19, %v4317_v63  ;;  %v1370_v45 = vmul.f32 %v1368_v19, %v4318_v41 }
 0x37c   : > { %v1144_v43 = vmul.f32 %v1143_v38, %v1138_v21  ;;  %v1145_v44 = vmul.f32 %v1143_v38, %v1140_v25  ;;  %v1339_v28 = vadd.f32 %v1337_v62, %v1136_v51  ;;  %v4326_v25 = vld [vmem:[#allocation34_spill] sm:$0xff] }
 0x37d   : > { %1820 = vrot.lane.b32.xlu0 %v4310_v9, %s4295_s16  ;;  %1822 = vrot.lane.b32.xlu1 %v4311_v57, %s4295_s16  ;;  %v1371_v20 = vadd.f32 %v1369_v17, %v1327_v29  ;;  %v1372_v26 = vadd.f32 %v1370_v45, %v1328_v35  ;;  %v1390_v35 = vstv %s3886_s30  ;;  %v4330_v17 = vld [vmem:[#allocation38_spill] sm:$0xff]  ;;  %v4331_v45 = vld [vmem:[#allocation39_spill] sm:$0xff]  ;;  %s1610_s30 = sld [smem:[#allocation8 + %s1609_s9]]  ;;  %s1733_s9 = sadd.s32 32, %s2976_s15 }
 0x37e   : > { %v1146_v58 = vadd.f32 %v1144_v43, %v3817_v30  ;;  %v1147_v18 = vadd.f32 %v1145_v44, %v3819_v10  ;;  %v1338_v10 = vadd.f32 %v1336_v53, %v1135_v54  ;;  %v1451_v43 = vstv %s3898_s12  ;;  %v4328_v44 = vld [vmem:[#allocation57_spill] sm:$0xff]  ;;  %s1620_s12 = sadd.s32 23, %s2976_s15 }
 0x37f   : > { %v1149_v24 = vpop.permute.xlu0 %1148  ;;  %v1151_v14 = vpop.permute.xlu1 %1150  ;;  %v1391_v1 = vmul.f32 %v1390_v35, %v4328_v44  ;;  %s1621_s3 = sld [smem:[#allocation8 + %s1620_s12]]  ;;  %s1744_s12 = sadd.s32 33, %s2976_s15 }
 0x380   : > { %v1155_v61 = vmul.f32 %v1154_v3, %v1149_v24  ;;  %v1156_v52 = vmul.f32 %v1154_v3, %v1151_v14  ;;  %v1349_v54 = vadd.f32 %v1347_v60, %v1146_v58  ;;  %v1350_v51 = vadd.f32 %v1348_v2, %v1147_v18  ;;  %v4329_v3 = vld [vmem:[#allocation59_spill] sm:$0xff] }
 0x381   : > { %1831 = vrot.lane.b32.xlu0 %v4310_v9, %s4296_s7  ;;  %1833 = vrot.lane.b32.xlu1 %v4311_v57, %s4296_s7  ;;  %v1392_v19 = vmul.f32 %v1390_v35, %v4329_v3 }
 0x382   : > { %v1157_v49 = vadd.f32 %v1155_v61, %v3831_v13  ;;  %v1158_v30 = vadd.f32 %v1156_v52, %v3833_v5  ;;  %v1380_v13 = vmul.f32 %v1379_v37, %v4322_v36  ;;  %v1381_v5 = vmul.f32 %v1379_v37, %v4323_v40 }
 0x383   : > { %v1424_v27 = vpop.permute.xlu0 %1423  ;;  %v1426_v50 = vpop.permute.xlu1 %1425  ;;  %v1393_v24 = vadd.f32 %v1391_v1, %v1349_v54  ;;  %v1394_v56 = vadd.f32 %v1392_v19, %v1350_v51  ;;  %v4332_v1 = vld [vmem:[#allocation40_spill] sm:$0xff]  ;;  %v4333_v19 = vld [vmem:[#allocation41_spill] sm:$0xff] }
 0x384   : > { %v1360_v0 = vadd.f32 %v1358_v15, %v1157_v49  ;;  %v1361_v7 = vadd.f32 %v1359_v16, %v1158_v30  ;;  %v1430_v33 = vmul.f32 %v1429_v46, %v1424_v27  ;;  %v1431_v31 = vmul.f32 %v1429_v46, %v1426_v50 }
 0x385   : > { %1842 = vrot.lane.b32.xlu0 %v4310_v9, %s4297_s4  ;;  %1844 = vrot.lane.b32.xlu1 %v4311_v57, %s4297_s4  ;;  %v1382_v55 = vadd.f32 %v1380_v13, %v1338_v10  ;;  %v1383_v38 = vadd.f32 %v1381_v5, %v1339_v28  ;;  %v1531_v5 = vstv %s1530_s13  ;;  %s1722_s13 = sadd.s32 31, %s2976_s15 }
 0x386   : > { %v1432_v39 = vadd.f32 %v1430_v33, %v1371_v20  ;;  %v1433_v47 = vadd.f32 %v1431_v31, %v1372_v26  ;;  %v1411_v48 = vadd.f32 %v4324_v4, %v1360_v0  ;;  %v1412_v29 = vadd.f32 %v4325_v12, %v1361_v7 }
 0x387   : > { %v1435_v23 = vpop.permute.xlu0 %1434  ;;  %v1437_v9 = vpop.permute.xlu1 %1436 }
 0x388   : > { %v1441_v57 = vmul.f32 %v1440_v32, %v1435_v23  ;;  %v1442_v21 = vmul.f32 %v1440_v32, %v1437_v9 }
 0x389   : > { %1878 = vrot.lane.b32.xlu0 %v4326_v25, %s4298_s8  ;;  %1880 = vrot.lane.b32.xlu1 %v4327_v34, %s4298_s8  ;;  %s3934_s8 = sld [smem:[#allocation8 + %s1482_s18]] }
 0x38a   : > { %v1443_v22 = vadd.f32 %v1441_v57, %v1382_v55  ;;  %v1444_v58 = vadd.f32 %v1442_v21, %v1383_v38  ;;  %s1643_s18 = sld [smem:[#allocation8 + %s1642_s29]]  ;;  %s1824_s29 = sadd.s32 39, %s2976_s15 }
 0x38b   : > { %v1446_v18 = vpop.permute.xlu0 %1445  ;;  %v1448_v37 = vpop.permute.xlu1 %1447 }
 0x38c   : > { %v1452_v14 = vmul.f32 %v1451_v43, %v1446_v18  ;;  %v1453_v53 = vmul.f32 %v1451_v43, %v1448_v37 }
 0x38d   : > { %1889 = vrot.lane.b32.xlu0 %v4326_v25, %s4299_s1  ;;  %1891 = vrot.lane.b32.xlu1 %v4327_v34, %s4299_s1  ;;  %s1519_s1 = sld [smem:[#allocation8 + %s1518_s19]] }
 0x38e   : > { %v1454_v60 = vadd.f32 %v1452_v14, %v1393_v24  ;;  %v1455_v61 = vadd.f32 %v1453_v53, %v1394_v56 }
 0x38f   : > { %v1457_v52 = vpop.permute.xlu0 %1456  ;;  %v1459_v59 = vpop.permute.xlu1 %1458  ;;  %v1484_v28 = vstv %s3934_s8  ;;  %s1653_s8 = sadd.s32 26, %s2976_s15 }
 0x390   : > { %v1463_v62 = vmul.f32 %v1462_v11, %v1457_v52  ;;  %v1464_v63 = vmul.f32 %v1462_v11, %v1459_v59  ;;  %v3938_v41 = vadd.f32 %v4330_v17, %v1454_v60  ;;  %v3941_v46 = vadd.f32 %v4331_v45, %v1455_v61  ;;  %s1654_s19 = sld [smem:[#allocation8 + %s1653_s8]]  ;;  %s1846_s8 = sadd.s32 41, %s2976_s15 }
 0x391   : > { %1900 = vrot.lane.b32.xlu0 %v4326_v25, %s4294_s20  ;;  %1902 = vrot.lane.b32.xlu1 %v4327_v34, %s4294_s20  ;;  %s1540_s20 = sadd.s32 17, %s2976_s15  ;;  %v1611_v17 = vstv %s1610_s30 }
 0x392   : > { %v1465_v15 = vadd.f32 %v1463_v62, %v1411_v48  ;;  %v1466_v6 = vadd.f32 %v1464_v63, %v1412_v29  ;;  %s1541_s26 = sld [smem:[#allocation8 + %s1540_s20]] }
 0x393   : > { %v1468_v16 = vpop.permute.xlu0 %1467  ;;  %v1470_v49 = vpop.permute.xlu1 %1469  ;;  %v1520_v33 = vstv %s1519_s1  ;;  %s1664_s1 = sadd.s32 27, %s2976_s15  ;;  %s1723_s20 = sld [smem:[#allocation8 + %s1722_s13]] }
 0x394   : > { %v1474_v30 = vmul.f32 %v1473_v42, %v1468_v16  ;;  %v1475_v10 = vmul.f32 %v1473_v42, %v1470_v49  ;;  %v1622_v16 = vstv %s1621_s3  ;;  %s1665_s14 = sld [smem:[#allocation8 + %s1664_s1]]  ;;  %s1791_s3 = sadd.s32 36, %s2976_s15 }
 0x395   : > { %1911 = vrot.lane.b32.xlu0 %v4326_v25, %s4295_s16  ;;  %1913 = vrot.lane.b32.xlu1 %v4327_v34, %s4295_s16  ;;  %s1551_s16 = sadd.s32 18, %s2976_s15  ;;  %s4045_s1 = sld [smem:[#allocation8 + %s1802_s10]] }
 0x396   : > { %v1476_v20 = vadd.f32 %v1474_v30, %v1432_v39  ;;  %v1477_v27 = vadd.f32 %v1475_v10, %v1433_v47  ;;  %s1552_s5 = sld [smem:[#allocation8 + %s1551_s16]]  ;;  %s1755_s16 = sadd.s32 34, %s2976_s15 }
 0x397   : > { %v1479_v26 = vpop.permute.xlu0 %1478  ;;  %v1481_v50 = vpop.permute.xlu1 %1480  ;;  %s1835_s13 = sadd.s32 40, %s2976_s15 }
 0x398   : > { %v1485_v0 = vmul.f32 %v1484_v28, %v1479_v26  ;;  %v1486_v7 = vmul.f32 %v1484_v28, %v1481_v50  ;;  %v1542_v29 = vstv %s1541_s26  ;;  %v1633_v26 = vstv %s1632_s2  ;;  %s1711_s26 = sadd.s32 30, %s2976_s15  ;;  %s4037_s2 = sld [smem:[#allocation8 + %s1733_s9]] }
 0x399   : > { %1922 = vrot.lane.b32.xlu0 %v4326_v25, %s4296_s7  ;;  %1924 = vrot.lane.b32.xlu1 %v4327_v34, %s4296_s7  ;;  %s1562_s7 = sadd.s32 19, %s2976_s15 }
 0x39a   : > { %v1487_v31 = vadd.f32 %v1485_v0, %v1443_v22  ;;  %v1488_v8 = vadd.f32 %v1486_v7, %v1444_v58  ;;  %s1563_s17 = sld [smem:[#allocation8 + %s1562_s7]] }
 0x39b   : > { %v1515_v2 = vpop.permute.xlu0 %1514  ;;  %v1517_v36 = vpop.permute.xlu1 %1516  ;;  %s1756_s7 = sld [smem:[#allocation8 + %s1755_s16]]  ;;  %s1882_s16 = sadd.s32 43, %s2976_s15 }
 0x39c   : > { %v1521_v13 = vmul.f32 %v1520_v33, %v1515_v2  ;;  %v1522_v40 = vmul.f32 %v1520_v33, %v1517_v36  ;;  %v1553_v51 = vstv %s1552_s5  ;;  %v1644_v2 = vstv %s1643_s18  ;;  %s1712_s5 = sld [smem:[#allocation8 + %s1711_s26]]  ;;  %s1904_s26 = sadd.s32 45, %s2976_s15 }
 0x39d   : > { %1933 = vrot.lane.b32.xlu0 %v4326_v25, %s4297_s4  ;;  %1935 = vrot.lane.b32.xlu1 %v4327_v34, %s4297_s4  ;;  %s1574_s4 = sld [smem:[#allocation8 + %s1573_s0]] }
 0x39e   : > { %v1523_v32 = vadd.f32 %v1521_v13, %v1465_v15  ;;  %v1524_v39 = vadd.f32 %v1522_v40, %v1466_v6  ;;  %s4040_s18 = sld [smem:[#allocation8 + %s1744_s12]] }
 0x39f   : > { %v1526_v47 = vpop.permute.xlu0 %1525  ;;  %v1528_v4 = vpop.permute.xlu1 %1527  ;;  %s4066_s9 = sld [smem:[#allocation8 + %s1882_s16]] }
 0x3a0   : > { %v1532_v48 = vmul.f32 %v1531_v5, %v1526_v47  ;;  %v1533_v12 = vmul.f32 %v1531_v5, %v1528_v4  ;;  %v1564_v58 = vstv %s1563_s17  ;;  %v4334_v47 = vld [vmem:[#allocation42_spill] sm:$0xff]  ;;  %s1813_s17 = sadd.s32 38, %s2976_s15 }
 0x3a1   : > { %s1814_s0 = sld [smem:[#allocation8 + %s1813_s17]]  ;;  %s1926_s17 = sadd.s32 47, %s2976_s15 }
 0x3a2   : > { %v1534_v35 = vadd.f32 %v1532_v48, %v1476_v20  ;;  %v1535_v55 = vadd.f32 %v1533_v12, %v1477_v27  ;;  %v4335_v48 = vld [vmem:[#allocation43_spill] sm:$0xff]  ;;  %s4073_s10 = sld [smem:[#allocation8 + %s1926_s17]] }
 0x3a3   : > { %v1537_v23 = vpop.permute.xlu0 %1536  ;;  %v1539_v38 = vpop.permute.xlu1 %1538  ;;  %v1575_v11 = vstv %s1574_s4  ;;  %s1700_s4 = sadd.s32 29, %s2976_s15 }
 0x3a4   : > { %v1543_v9 = vmul.f32 %v1542_v29, %v1537_v23  ;;  %v1544_v54 = vmul.f32 %v1542_v29, %v1539_v38  ;;  %v1655_v29 = vstv %s1654_s19  ;;  %s4028_s30 = sld [smem:[#allocation8 + %s1700_s4]] }
 0x3a5   : > { %s4043_s19 = sld [smem:[#allocation8 + %s1791_s3]] }
 0x3a6   : > { %v1545_v57 = vadd.f32 %v1543_v9, %v1487_v31  ;;  %v1546_v21 = vadd.f32 %v1544_v54, %v1488_v8  ;;  %s4064_s4 = sld [smem:[#allocation8 + %s1904_s26]] }
 0x3a7   : > { %v1548_v25 = vpop.permute.xlu0 %1547  ;;  %v1550_v34 = vpop.permute.xlu1 %1549 }
 0x3a8   : > { %v1554_v43 = vmul.f32 %v1553_v51, %v1548_v25  ;;  %v1555_v44 = vmul.f32 %v1553_v51, %v1550_v34  ;;  %v1596_v3 = vadd.f32 %v4332_v1, %v1545_v57  ;;  %v1597_v22 = vadd.f32 %v4333_v19, %v1546_v21 }
 0x3aa   : > { %v1556_v18 = vadd.f32 %v1554_v43, %v3938_v41  ;;  %v1557_v37 = vadd.f32 %v1555_v44, %v3941_v46  ;;  %v1666_v44 = vstv %s1665_s14  ;;  %s4047_s14 = sld [smem:[#allocation8 + %s1824_s29]]  ;;  %s2155_s29 = sshll.u32 %s2544_s25, 3 }
 0x3ab   : > { %v1559_v24 = vpop.permute.xlu0 %1558  ;;  %v1561_v14 = vpop.permute.xlu1 %1560 }
 0x3ac   : > { %v1565_v56 = vmul.f32 %v1564_v58, %v1559_v24  ;;  %v1566_v53 = vmul.f32 %v1564_v58, %v1561_v14  ;;  %v1724_v58 = vstv %s1723_s20  ;;  %s4050_s20 = sld [smem:[#allocation8 + %s1846_s8]] }
 0x3ae   : > { %v1567_v60 = vadd.f32 %v1565_v56, %v1523_v32  ;;  %v1568_v61 = vadd.f32 %v1566_v53, %v1524_v39 }
 0x3af   : > { %v1570_v52 = vpop.permute.xlu0 %1569  ;;  %v1572_v59 = vpop.permute.xlu1 %1571 }
 0x3b0   : > { %v1576_v62 = vmul.f32 %v1575_v11, %v1570_v52  ;;  %v1577_v63 = vmul.f32 %v1575_v11, %v1572_v59  ;;  %v4336_v59 = vld [vmem:[#allocation44_spill] sm:$0xff] }
 0x3b2   : > { %v1578_v41 = vadd.f32 %v1576_v62, %v1534_v35  ;;  %v1579_v45 = vadd.f32 %v1577_v63, %v1535_v55  ;;  %v4337_v63 = vld [vmem:[#allocation45_spill] sm:$0xff] }
 0x3b3   : > { %v1606_v46 = vpop.permute.xlu0 %1605  ;;  %v1608_v42 = vpop.permute.xlu1 %1607 }
 0x3b4   : > { %v1612_v15 = vmul.f32 %v1611_v17, %v1606_v46  ;;  %v1613_v6 = vmul.f32 %v1611_v17, %v1608_v42 }
 0x3b6   : > { %v1614_v49 = vadd.f32 %v1612_v15, %v1556_v18  ;;  %v1615_v30 = vadd.f32 %v1613_v6, %v1557_v37  ;;  %v1713_v15 = vstv %s1712_s5  ;;  %s1893_s5 = sadd.s32 44, %s2976_s15 }
 0x3b7   : > { %v1617_v10 = vpop.permute.xlu0 %1616  ;;  %v1619_v28 = vpop.permute.xlu1 %1618  ;;  %s4068_s12 = sld [smem:[#allocation8 + %s1893_s5]] }
 0x3b8   : > { %v1623_v20 = vmul.f32 %v1622_v16, %v1617_v10  ;;  %v1624_v27 = vmul.f32 %v1622_v16, %v1619_v28 }
 0x3ba   : > { %v1625_v50 = vadd.f32 %v1623_v20, %v1567_v60  ;;  %v1626_v0 = vadd.f32 %v1624_v27, %v1568_v61 }
 0x3bb   : > { %v1628_v7 = vpop.permute.xlu0 %1627  ;;  %v1630_v33 = vpop.permute.xlu1 %1629 }
 0x3bc   : > { %v1634_v31 = vmul.f32 %v1633_v26, %v1628_v7  ;;  %v1635_v8 = vmul.f32 %v1633_v26, %v1630_v33 }
 0x3be   : > { %v1636_v36 = vadd.f32 %v1634_v31, %v1578_v41  ;;  %v1637_v13 = vadd.f32 %v1635_v8, %v1579_v45 }
 0x3bf   : > { %v1639_v40 = vpop.permute.xlu0 %1638  ;;  %v1641_v5 = vpop.permute.xlu1 %1640 }
 0x3c0   : > { %v1645_v32 = vmul.f32 %v1644_v2, %v1639_v40  ;;  %v1646_v39 = vmul.f32 %v1644_v2, %v1641_v5  ;;  %v3976_v4 = vadd.f32 %v4334_v47, %v1636_v36  ;;  %v3979_v12 = vadd.f32 %v4335_v48, %v1637_v13  ;;  %v4338_v47 = vld [vmem:[#allocation46_spill] sm:$0xff] }
 0x3c2   : > { %v3981_v35 = vadd.f32 %v1645_v32, %v1596_v3  ;;  %v3983_v55 = vadd.f32 %v1646_v39, %v1597_v22 }
 0x3c3   : > { %v1650_v23 = vpop.permute.xlu0 %1649  ;;  %v1652_v38 = vpop.permute.xlu1 %1651 }
 0x3c4   : > { %v1656_v9 = vmul.f32 %v1655_v29, %v1650_v23  ;;  %v1657_v54 = vmul.f32 %v1655_v29, %v1652_v38  ;;  %v4339_v29 = vld [vmem:[#allocation47_spill] sm:$0xff] }
 0x3c6   : > { %v1658_v51 = vadd.f32 %v1656_v9, %v1614_v49  ;;  %v1659_v57 = vadd.f32 %v1657_v54, %v1615_v30  ;;  %v1757_v49 = vstv %s1756_s7  ;;  %s1915_s7 = sadd.s32 46, %s2976_s15 }
 0x3c7   : > { %v1661_v21 = vpop.permute.xlu0 %1660  ;;  %v1663_v25 = vpop.permute.xlu1 %1662  ;;  %s4071_s3 = sld [smem:[#allocation8 + %s1915_s7]] }
 0x3c8   : > { %v1667_v19 = vmul.f32 %v1666_v44, %v1661_v21  ;;  %v1668_v22 = vmul.f32 %v1666_v44, %v1663_v25  ;;  %v1746_v44 = vstv %s4040_s18  ;;  %s4340_s18 = sshll.u32 %s2540_s24, 1 }
 0x3c9   : > { %s1981_s8 = sadd.s32 %s2155_s29, %s4340_s18 }
 0x3ca   : > { %v1669_v24 = vadd.f32 %v1667_v19, %v1625_v50  ;;  %v1670_v14 = vadd.f32 %v1668_v22, %v1626_v0  ;;  %v1815_v50 = vstv %s1814_s0  ;;  %s4058_s0 = sld [smem:[#allocation8 + %s1835_s13]]  ;;  %v1804_v19 = vstv %s4045_s1  ;;  %s358_s1 = scalar_lea.vmem [#allocation11], %s2827_s21 }
 0x3cb   : > { %v3987_v34 = vpop.permute.xlu0 %1696  ;;  %v3989_v43 = vpop.permute.xlu1 %1698  ;;  %s2573_s21 = smov [#allocation11]  }
 0x3cc   : > { %s2450_s16 = sshll.u32 %s2573_s21, 4  ;;  %s2451_s16 = int_to_ptr.vmem [resolvable:$false] %s2450_s16 }
 0x3cd   : > { %s2452_s5 = scalar_lea.vmem %s2451_s16, 512 }
 0x3cf   : > { %v1708_v1 = vpop.permute.xlu0 %1707  ;;  %v1710_v3 = vpop.permute.xlu1 %1709 }
 0x3d0   : > { %v1714_v30 = vmul.f32 %v1713_v15, %v1708_v1  ;;  %v1715_v10 = vmul.f32 %v1713_v15, %v1710_v3 }
 0x3d2   : > { %v1716_v0 = vadd.f32 %v1714_v30, %v1658_v51  ;;  %v1717_v7 = vadd.f32 %v1715_v10, %v1659_v57  ;;  %v1702_v57 = vstv %s4028_s30  ;;  %s1937_s30 = sadd.s32 48, %s2976_s15  ;;  %v1895_v10 = vstv %s4068_s12  ;;  %s1950_s15 = sld [smem:[#allocation9 + %s2540_s24]] }
 0x3d3   : > { %v1719_v18 = vpop.permute.xlu0 %1718  ;;  %v1721_v37 = vpop.permute.xlu1 %1720  ;;  %v1703_v1 = vmul.f32 %v1702_v57, %v3987_v34  ;;  %v1704_v3 = vmul.f32 %v1702_v57, %v3989_v43  ;;  %s1969_s24 = scalar_lea.sflag [#allocation4], %s2824_s27 }
 0x3d4   : > { %v1725_v56 = vmul.f32 %v1724_v58, %v1719_v18  ;;  %v1726_v53 = vmul.f32 %v1724_v58, %v1721_v37  ;;  %v1735_v18 = vstv %s4037_s2  ;;  %s4097_s2 = sld [smem:[#allocation8 + %s1937_s30]] }
 0x3d5   : > { %v1706_v34 = vadd.f32 %v1704_v3, %v3983_v55  ;;  %v1884_v55 = vstv %s4066_s9 }
 0x3d6   : > { %v1727_v11 = vadd.f32 %v1725_v56, %v1669_v24  ;;  %v1728_v60 = vadd.f32 %v1726_v53, %v1670_v14  ;;  %v1793_v14 = vstv %s4043_s19  ;;  %v1826_v56 = vstv %s4047_s14  ;;  %s2156_s19 = sshll.u32 %s1981_s8, 7  ;;  %s1984_s14 = sshll.u32 %s358_s1, 4  ;;  %s4124_s14 = int_to_ptr.vmem [resolvable:$true] %s1984_s14 }
 0x3d7   : > { %v3991_v61 = vpop.permute.xlu0 %1729  ;;  %v3993_v52 = vpop.permute.xlu1 %1731  ;;  %v1848_v53 = vstv %s4050_s20  ;;  %s4122_s26 = scalar_lea.hbm %s4186_s6, %s2156_s19  ;;  %s2446_s25 = scalar_lea.vmem %s4124_s14, 256 }
 0x3d8   : > { %v3997_v62 = vadd.f32 %v4336_v59, %v1727_v11  ;;  %v4000_v17 = vadd.f32 %v4337_v63, %v1728_v60  ;;  %v1705_v11 = vadd.f32 %v1703_v1, %v3981_v35  ;;  %v1736_v59 = vmul.f32 %v1735_v18, %v3991_v61  ;;  %p2447_p7 = scmp.ne.s32.totalorder %s4124_s14, %s2446_s25  ;;  %p2453_p2 = scmp.lt.s32.totalorder %s4124_s14, %s2451_s16 }
 0x3d9   : > { %v1737_v63 = vmul.f32 %v1735_v18, %v3993_v52  ;;  %p2454_p11 = scmp.lt.s32.totalorder %s2452_s5, %s2446_s25 }
 0x3da   : > { %v1738_v52 = vadd.f32 %v1736_v59, %v3976_v4  ;;  %p2448_p8 = pnand %p2447_p7, %p4341_p3 }
 0x3db   : > { %v4003_v41 = vpop.permute.xlu0 %1740  ;;  %v4005_v45 = vpop.permute.xlu1 %1742  ;;  %p2455_p5 = por %p2454_p11, %p2453_p2 }
 0x3dc   : > { %v1747_v37 = vmul.f32 %v1746_v44, %v4003_v41  ;;  %v1748_v24 = vmul.f32 %v1746_v44, %v4005_v45  ;;  %v1837_v41 = vstv %s4058_s0  ;;  %v1906_v45 = vstv %s4064_s4  ;;  %p2449_p9 = pneg %p2448_p8 }
 0x3de   : > { %v1749_v15 = vadd.f32 %v1747_v37, %v1705_v11  ;;  %v1750_v35 = vadd.f32 %v1748_v24, %v1706_v34  ;;  %v1939_v24 = vstv %s4097_s2  ;;  %p2456_p6 = pnand %p2455_p5, %p2449_p9 }
 0x3df   : > { %v1752_v46 = vpop.permute.xlu0 %1751  ;;  %v1754_v42 = vpop.permute.xlu1 %1753 }
 0x3e0   : > { %v1758_v27 = vmul.f32 %v1757_v49, %v1752_v46  ;;  %v1759_v26 = vmul.f32 %v1757_v49, %v1754_v42 }
 0x3e2   : > { %v1760_v8 = vadd.f32 %v1758_v27, %v1716_v0  ;;  %v1761_v2 = vadd.f32 %v1759_v26, %v1717_v7  ;;  %v1917_v27 = vstv %s4071_s3  ;;  %v1739_v0 = vadd.f32 %v1737_v63, %v3979_v12 }
 0x3e3   : > { %v4008_v6 = vpop.permute.xlu0 %1787  ;;  %v4010_v16 = vpop.permute.xlu1 %1789 }
 0x3e4   : > { %v1794_v7 = vmul.f32 %v1793_v14, %v4008_v6 }
 0x3e7   : > { %v4012_v28 = vpop.permute.xlu0 %1798  ;;  %v4014_v20 = vpop.permute.xlu1 %1800 }
 0x3e8   : > { %v1805_v43 = vmul.f32 %v1804_v19, %v4012_v28  ;;  %v1806_v60 = vmul.f32 %v1804_v19, %v4014_v20  ;;  %v1928_v28 = vstv %s4073_s10 }
 0x3ea   : > { %v1807_v20 = vadd.f32 %v1805_v43, %v1749_v15  ;;  %v1808_v26 = vadd.f32 %v1806_v60, %v1750_v35 }
 0x3eb   : > { %v1810_v33 = vpop.permute.xlu0 %1809  ;;  %v1812_v31 = vpop.permute.xlu1 %1811 }
 0x3ec   : > { %v1816_v36 = vmul.f32 %v1815_v50, %v1810_v33  ;;  %v1817_v13 = vmul.f32 %v1815_v50, %v1812_v31  ;;  %v1795_v33 = vmul.f32 %v1793_v14, %v4010_v16 }
 0x3ee   : > { %v1818_v40 = vadd.f32 %v1816_v36, %v1760_v8  ;;  %v1819_v5 = vadd.f32 %v1817_v13, %v1761_v2  ;;  %v1797_v57 = vadd.f32 %v1795_v33, %v1739_v0 }
 0x3ef   : > { %v4017_v32 = vpop.permute.xlu0 %1820  ;;  %v4019_v39 = vpop.permute.xlu1 %1822 }
 0x3f0   : > { %v4022_v48 = vadd.f32 %v4338_v47, %v1818_v40  ;;  %v4025_v23 = vadd.f32 %v4339_v29, %v1819_v5  ;;  %v1827_v5 = vmul.f32 %v1826_v56, %v4017_v32  ;;  %v1828_v47 = vmul.f32 %v1826_v56, %v4019_v39 }
 0x3f2   : > { %v1829_v18 = vadd.f32 %v1827_v5, %v3997_v62  ;;  %v1830_v37 = vadd.f32 %v1828_v47, %v4000_v17 }
 0x3f3   : > { %v4033_v38 = vpop.permute.xlu0 %1831  ;;  %v4035_v9 = vpop.permute.xlu1 %1833 }
 0x3f4   : > { %v1838_v29 = vmul.f32 %v1837_v41, %v4033_v38  ;;  %v1839_v4 = vmul.f32 %v1837_v41, %v4035_v9 }
 0x3f7   : > { %v1843_v54 = vpop.permute.xlu0 %1842  ;;  %v1845_v51 = vpop.permute.xlu1 %1844 }
 0x3f8   : > { %v1849_v49 = vmul.f32 %v1848_v53, %v1843_v54  ;;  %v1850_v30 = vmul.f32 %v1848_v53, %v1845_v51  ;;  %v1796_v51 = vadd.f32 %v1794_v7, %v1738_v52 }
 0x3fa   : > { %v1851_v2 = vadd.f32 %v1849_v49, %v1807_v20  ;;  %v1852_v36 = vadd.f32 %v1850_v30, %v1808_v26 }
 0x3fb   : > { %v4060_v21 = vpop.permute.xlu0 %1878  ;;  %v4062_v25 = vpop.permute.xlu1 %1880 }
 0x3fc   : > { %v1885_v44 = vmul.f32 %v1884_v55, %v4060_v21  ;;  %v1886_v32 = vmul.f32 %v1884_v55, %v4062_v25 }
 0x3fe   : > { %v1887_v53 = vadd.f32 %v1885_v44, %v1829_v18  ;;  %v1888_v21 = vadd.f32 %v1886_v32, %v1830_v37 }
 0x3ff   : > { %v1890_v22 = vpop.permute.xlu0 %1889  ;;  %v1892_v58 = vpop.permute.xlu1 %1891 }
 0x400   : > { %v1896_v3 = vmul.f32 %v1895_v10, %v1890_v22  ;;  %v1897_v38 = vmul.f32 %v1895_v10, %v1892_v58 }
 0x403   : > { %v1901_v46 = vpop.permute.xlu0 %1900  ;;  %v1903_v42 = vpop.permute.xlu1 %1902 }
 0x404   : > { %v1907_v50 = vmul.f32 %v1906_v45, %v1901_v46  ;;  %v1908_v61 = vmul.f32 %v1906_v45, %v1903_v42  ;;  %v1951_v45 = vstv %s1950_s15 }
 0x406   : > { %v1909_v54 = vadd.f32 %v1907_v50, %v1851_v2  ;;  %v1910_v12 = vadd.f32 %v1908_v61, %v1852_v36 }
 0x407   : > { %v1912_v31 = vpop.permute.xlu0 %1911  ;;  %v1914_v8 = vpop.permute.xlu1 %1913 }
 0x408   : > { %v1918_v13 = vmul.f32 %v1917_v27, %v1912_v31  ;;  %v1919_v40 = vmul.f32 %v1917_v27, %v1914_v8 }
 0x40a   : > { %v1920_v6 = vadd.f32 %v1918_v13, %v4022_v48  ;;  %v1921_v16 = vadd.f32 %v1919_v40, %v4025_v23  ;;  %v1840_v48 = vadd.f32 %v1838_v29, %v1796_v51  ;;  %v1841_v23 = vadd.f32 %v1839_v4, %v1797_v57 }
 0x40b   : > { %v1923_v1 = vpop.permute.xlu0 %1922  ;;  %v1925_v39 = vpop.permute.xlu1 %1924 }
 0x40c   : > { %v1946_v19 = vadd.f32 %v1920_v6, %v1909_v54  ;;  %v1947_v9 = vadd.f32 %v1921_v16, %v1910_v12  ;;  %v1929_v14 = vmul.f32 %v1928_v28, %v1923_v1  ;;  %v1930_v56 = vmul.f32 %v1928_v28, %v1925_v39 }
 0x40d   : > { %v1898_v34 = vadd.f32 %v1896_v3, %v1840_v48  ;;  %v1899_v43 = vadd.f32 %v1897_v38, %v1841_v23 }
 0x40e   : > { %v1931_v60 = vadd.f32 %v1929_v14, %v1887_v53  ;;  %v1932_v59 = vadd.f32 %v1930_v56, %v1888_v21 }
 0x40f   : > { %v1934_v11 = vpop.permute.xlu0 %1933  ;;  %v1936_v25 = vpop.permute.xlu1 %1935 }
 0x410   : > { %v1940_v22 = vmul.f32 %v1939_v24, %v1934_v11  ;;  %v1941_v58 = vmul.f32 %v1939_v24, %v1936_v25 }
 0x412   : > { %v1942_v63 = vadd.f32 %v1940_v22, %v1898_v34  ;;  %v1943_v62 = vadd.f32 %v1941_v58, %v1899_v43 }
 0x414   : > { %v1944_v41 = vadd.f32 %v1942_v63, %v1931_v60  ;;  %v1945_v17 = vadd.f32 %v1943_v62, %v1932_v59 }
 0x416   : > { %v1948_v46 = vadd.f32 %v1946_v19, %v1944_v41  ;;  %v1949_v42 = vadd.f32 %v1947_v9, %v1945_v17 }
 0x418   : > { %v1952_v15 = vadd.f32 %v1951_v45, %v1948_v46  ;;  %v1953_v35 = vadd.f32 %v1951_v45, %v1949_v42 }
 0x41a   : > { %v1954_v49 = vsub.f32 0.0, %v1952_v15  ;;  %v1955_v30 = vsub.f32 0.0, %v1953_v35 }
 0x41c   : > { %v1956_v55 = vmul.f32 1.442695, %v1954_v49  ;;  %v1958_v10 = vmul.f32 1.442695, %v1955_v30 }
 0x41e   : > { %2348 = vpow2.f32 %v1956_v55 }
 0x41f   : > { %2350 = vpow2.f32 %v1958_v10 }
 0x428   : > { %v2349_v27 = vpop.eup %2348 }
 0x429   : > { %v2351_v28 = vpop.eup %2350  ;;  %v1960_v20 = vadd.f32 1.0, %v2349_v27 }
 0x42a   : > { %v1961_v26 = vadd.f32 1.0, %v2351_v28 }
 0x42b   : > { %2352 = vrcp.f32 %v1960_v20 }
 0x42c   : > { %2354 = vrcp.f32 %v1961_v26 }
 0x435   : > { %v2353_v50 = vpop.eup %2352 }
 0x436   : > { %v2355_v61 = vpop.eup %2354  ;;  %1966 = vst.msk [vmem:[%s358_s1] sm:$0xff] %vm368_vm0, %v2353_v50 }
 0x437   : > { %1967 = vst.msk [vmem:[%s358_s1 + $0x8] sm:$0xff] %vm368_vm0, %v2355_v61 }
 0x438   : > { %2459 = shalt.err (!%p2456_p6)
}
 0x439   : > { %s2460_s7 = scalar_lea.hbm %s4122_s26, 256  ;;  %s2464_s4 = scalar_lea.hbm %s4186_s6, 2048 }
 0x43a   : > { %p2461_p13 = scmp.ne.s32.totalorder %s4122_s26, %s2460_s7  ;;  %p2465_p1 = scmp.lt.u32.totalorder %s4122_s26, %s4186_s6 }
 0x43b   : > { %p2466_p0 = scmp.lt.u32.totalorder %s2464_s4, %s2460_s7  ;;  %p2468_p7 = scmp.lt.u32.totalorder %s2460_s7, %s4122_s26 }
 0x43c   : > { %p2462_p4 = pnand %p2461_p13, %p4341_p3 }
 0x43d   : > { %p2467_p12 = por %p2466_p0, %p2465_p1 }
 0x43e   : > { %p2463_p10 = pneg %p2462_p4 }
 0x43f   : > { %p2469_p8 = por %p2468_p7, %p2467_p12 }
 0x441   : > { %p2470_p9 = pnand %p2469_p8, %p2463_p10 }
 0x443   : > { %2473 = shalt.err (!%p2470_p9)
}
 0x444   : > { %s2574_s3 = smov 128   ;;  %s2575_s10 = smov 8  }
 0x445   : > { %2243 = dma.vmem_to_hbm [thread:$0]  (%p4341_p3), %s4124_s14, 256, %s4122_s26, %s1969_s24, %s2574_s3, %s2574_s3, %s2575_s10  }
 0x446 PF: > { %s4342_s30 = sld [smem:[#allocation17_spill]]  ;;  %s4343_s2 = sld [smem:[#allocation20_spill]] }
 0x447   : > { %p2268_p2 = scmp.ge.s32.totalorder %s2556_s28, 2 }
 0x44c   : > { %s1999_s15 = sand.u32 1, %s4342_s30   ;;  %p4344_p11 = scmp.ne.s32.totalorder %s4343_s2, 0 }
 0x44d   : > { %s2000_s29 = scalar_lea.sflag [#allocation4], %s1999_s15 }
 0x44e   : > { %p2260_p5 = pnand %p2268_p2, %p4344_p11 }
 0x450   : > { %2523 = dma.done.wait (!%p2260_p5), %s2000_s29, 256  }
 0x451   : > { %2525 = vsyncadd (!%p2260_p5), %s2000_s29, 4294967040  ;;  %s27_s28 = sadd.s32 1, %s2556_s28   ;;  %s4345_s18 = sld [smem:[#allocation23_spill]] }
 0x452   : > { %p24_p6 = scmp.ge.s32.totalorder %s27_s28, 10   ;;  %s4346_s24 = sld [smem:[#allocation18_spill]] }
 0x453   : > { %s4347_s25 = sld [smem:[#allocation19_spill]]  ;;  %s4348_s26 = sld [smem:[#allocation21_spill]] }
 0x454   : > { %s4349_s27 = sld [smem:[#allocation22_spill]]  ;;  %s4350_s21 = smov %s2532_s22 }
 0x455   : > { %s4351_s22 = smov %s2536_s23  ;;  %26 = sbr.rel (!%p24_p6) target bundleno = 18 (0x12), region = 111 }
 0x457   : > { %s4352_s23 = smov %s4345_s18 }
 0x45c   :  { %2005 = vsyncpa [#allocation3], 1 }
 0x45d   :  { %2007 = vsyncpa [#allocation3 + $0x1], 1 }
 0x45e   :  { %2008 = vsyncpa [#allocation7], 1 }
 0x45f   :  { %2010 = vsyncpa [#allocation7 + $0x1], 1 }
 0x460   :  { %2011 = vsyncpa [#allocation4], 1 }
 0x461   :  { %2013 = vsyncpa [#allocation4 + $0x1], 1 }
 0x462   :  { %2014 = vsyncpa [#allocation5], 1 }
 0x463   :  { %2016 = vsyncpa [#allocation5 + $0x1], 1 }
 0x464   :  { %2017 = vsyncpa [#allocation10], 1 }

</bundles_post_ra>
